<compile_context>
chip_gen: v7x
topology: tpu7x:2x2x1
jax: 0.10.0
libtpu: 0.0.40
codegen_flags: <defaults>
</compile_context>

<pallas_src>
import functools
import math

import jax
import jax.numpy as jnp
from jax import lax
from jax.experimental import pallas as pl
from jax.experimental.pallas import tpu as pltpu


def _round_up(x, m):
    return (x + m - 1) // m * m


# --------------------------------------------------------------------------
# Kernel 1: stacked LSTM recurrence over a chunk of timesteps
# --------------------------------------------------------------------------
def _lstm_kernel(x_ref, w_ref, b_ref, out_ref, h_ref, c_ref, *,
                 num_layers, hidden_pad, time_chunk):
    """One grid step == one (batch-block, time-chunk) tile.

    x_ref   : (T_CHUNK, B_BLK, Hp)   embedded input, time-major, zero-padded
    w_ref   : (L, 2*Hp, 4*Hp)        fused [W_ih^T ; W_hh^T], per-gate padded
    b_ref   : (L, 1, 4*Hp)           combined bias (b_ih + b_hh), per-gate padded
    out_ref : (T_CHUNK, B_BLK, Hp)   last-layer hidden states
    h_ref   : (L, B_BLK, Hp)         hidden state scratch (carried over time)
    c_ref   : (L, B_BLK, Hp)         cell  state scratch (carried over time)
    """
    Hp = hidden_pad
    t_blk = pl.program_id(1)              # time is the inner, sequential axis

    @pl.when(t_blk == 0)
    def _():
        h_ref[...] = jnp.zeros_like(h_ref)
        c_ref[...] = jnp.zeros_like(c_ref)

    b_blk = out_ref.shape[1]
    # Hoist the bias broadcast out of the (unrolled) time/layer hot loop.
    biases = [jnp.broadcast_to(b_ref[l], (b_blk, 4 * Hp))
              for l in range(num_layers)]

    def step(s, carry):
        inp = x_ref[s]                                        # (B_BLK, Hp)
        for l in range(num_layers):                           # static unroll
            w_l = w_ref[l]                                    # (2Hp, 4Hp)
            xh = jnp.concatenate([inp, h_ref[l]], axis=-1)    # (B_BLK, 2Hp)
            gates = jnp.dot(xh.astype(w_l.dtype), w_l,
                            preferred_element_type=jnp.float32) + biases[l]
            # PyTorch gate order i, f, g, o; slices are 128-lane aligned.
            i_g = jax.nn.sigmoid(gates[:, 0 * Hp:1 * Hp])
            f_g = jax.nn.sigmoid(gates[:, 1 * Hp:2 * Hp])
            g_g = jnp.tanh(gates[:, 2 * Hp:3 * Hp])
            o_g = jax.nn.sigmoid(gates[:, 3 * Hp:4 * Hp])
            c_new = f_g * c_ref[l] + i_g * g_g
            h_new = o_g * jnp.tanh(c_new)
            c_ref[l] = c_new
            h_ref[l] = h_new
            inp = h_new
        out_ref[s] = inp.astype(out_ref.dtype)
        return carry

    lax.fori_loop(0, time_chunk, step, 0, unroll=True)


# --------------------------------------------------------------------------
# Kernel 2: hoisted output projection  (rows, Hp) @ (Hp, Vp) + bias
# --------------------------------------------------------------------------
def _fc_kernel(h_ref, w_ref, b_ref, o_ref):
    o_ref[...] = (jnp.dot(h_ref[...].astype(w_ref.dtype), w_ref[...],
                          preferred_element_type=jnp.float32)
                  + b_ref[...]).astype(o_ref.dtype)


# --------------------------------------------------------------------------
# Wrapper
# --------------------------------------------------------------------------
def lstm_model_forward(token_ids, params, *, num_layers, hidden_dim,
                       time_chunk=8, param_dtype=jnp.float32):
    """token_ids: (B, T) int32  ->  logits (B, T, V)  (matches PyTorch module).

    param_dtype: jnp.bfloat16 is recommended on v6e/v7x (halves weight
    DMA/VMEM; accumulation stays f32); default f32 for bit-accurate checks.
    """
    emb = params["embedding"]                                  # (V, E)
    B, T = token_ids.shape
    V, E = emb.shape
    H = hidden_dim
    L = num_layers
    assert E == H, "kernel assumes embed_dim == hidden_dim"

    # ---- padded, hardware-friendly sizes ----
    Hp = _round_up(H, 128)            # lane-aligned gate slices
    Bp = _round_up(B, 8)              # full f32 sublanes
    Tc = time_chunk
    Tp = _round_up(T, Tc)
    Vp = _round_up(V, 128)

    # Two parallel batch blocks when possible (v7x has 2 TensorCores).
    B_BLK = Bp // 2 if Bp % 16 == 0 else Bp
    NB = Bp // B_BLK
    NT = Tp // Tc

    # ---- glue: embedding gather + padding (plain JAX) ----
    tok = jnp.pad(token_ids, ((0, Bp - B), (0, Tp - T)))
    emb_p = jnp.pad(emb.astype(jnp.float32), ((0, 0), (0, Hp - E)))
    x = jnp.take(emb_p, tok, axis=0)                           # (Bp, Tp, Hp)
    x_tm = jnp.transpose(x, (1, 0, 2))                         # (Tp, Bp, Hp) H-wide, cheap

    # ---- glue: fuse + gate-pad LSTM weights ----
    def pad_gate_cols(w_t):                                    # (in, 4H) -> (in, 4Hp)
        n = w_t.shape[0]
        w4 = w_t.reshape(n, 4, H)
        return jnp.pad(w4, ((0, 0), (0, 0), (0, Hp - H))).reshape(n, 4 * Hp)

    w_layers, b_layers = [], []
    for l in range(L):
        wih_t = pad_gate_cols(params[f"w_ih_{l}"].T)           # (E, 4Hp)
        whh_t = pad_gate_cols(params[f"w_hh_{l}"].T)           # (H, 4Hp)
        wih_t = jnp.pad(wih_t, ((0, Hp - E), (0, 0)))          # (Hp, 4Hp)
        whh_t = jnp.pad(whh_t, ((0, Hp - H), (0, 0)))          # (Hp, 4Hp)
        w_layers.append(jnp.concatenate([wih_t, whh_t], axis=0))   # (2Hp, 4Hp)
        b = (params[f"b_ih_{l}"] + params[f"b_hh_{l}"]).reshape(4, H)
        b_layers.append(jnp.pad(b, ((0, 0), (0, Hp - H))).reshape(1, 4 * Hp))
    w_cat = jnp.stack(w_layers).astype(param_dtype)            # (L, 2Hp, 4Hp)
    b_cat = jnp.stack(b_layers).astype(jnp.float32)            # (L, 1, 4Hp)

    wfc = jnp.pad(params["fc_w"].T,
                  ((0, Hp - H), (0, Vp - V))).astype(param_dtype)   # (Hp, Vp)
    bfc = jnp.pad(params["fc_b"], (0, Vp - V)).reshape(1, Vp).astype(jnp.float32)

    # ---- VMEM budget: only raise the scoped limit when we would exceed it ----
    def nbytes(shape, dtype):
        return math.prod(shape) * jnp.dtype(dtype).itemsize

    vmem_est = (2 * nbytes((Tc, B_BLK, Hp), jnp.float32)       # x (double buf)
                + 2 * nbytes((Tc, B_BLK, Hp), jnp.float32)     # out (double buf)
                + 2 * nbytes((L, 2 * Hp, 4 * Hp), param_dtype) # resident weights
                + 2 * nbytes((L, 1, 4 * Hp), jnp.float32)      # bias
                + 2 * nbytes((L, B_BLK, Hp), jnp.float32))     # h + c scratch
    vmem_kwargs = {}
    if vmem_est > 32 * 2**20:
        vmem_kwargs["vmem_limit_bytes"] = int(min(vmem_est * 3 // 2, 100 * 2**20))

    # ---- kernel 1: recurrence, emits last-layer hidden states ----
    lstm_kernel = functools.partial(_lstm_kernel, num_layers=L,
                                    hidden_pad=Hp, time_chunk=Tc)
    hid_tm = pl.pallas_call(
        lstm_kernel,
        out_shape=jax.ShapeDtypeStruct((Tp, Bp, Hp), jnp.float32),
        grid_spec=pltpu.PrefetchScalarGridSpec(
            num_scalar_prefetch=0,
            grid=(NB, NT),                       # (batch parallel, time sequential)
            in_specs=[
                pl.BlockSpec((Tc, B_BLK, Hp), lambda b, t: (t, b, 0)),      # x chunk
                pl.BlockSpec((L, 2 * Hp, 4 * Hp), lambda b, t: (0, 0, 0)),  # fused W
                pl.BlockSpec((L, 1, 4 * Hp), lambda b, t: (0, 0, 0)),       # bias
            ],
            out_specs=pl.BlockSpec((Tc, B_BLK, Hp), lambda b, t: (t, b, 0)),
            scratch_shapes=[
                pltpu.VMEM((L, B_BLK, Hp), jnp.float32),   # h state
                pltpu.VMEM((L, B_BLK, Hp), jnp.float32),   # c state
            ],
        ),
        compiler_params=pltpu.CompilerParams(
            dimension_semantics=("parallel", "arbitrary"), **vmem_kwargs),
    )(x_tm, w_cat, b_cat)

    # ---- kernel 2: hoisted FC over all T*B rows at once ----
    # Only the H-wide hidden states are transposed (never V-wide logits).
    hid_bm = jnp.transpose(hid_tm, (1, 0, 2)).reshape(Bp * Tp, Hp)
    ROWS = Bp * Tp
    TM = next(c for c in (512, 256, 128, 64, 32, 16, 8) if ROWS % c == 0)
    TN = next(c for c in (512, 256, 128) if Vp % c == 0)

    logits_flat = pl.pallas_call(
        _fc_kernel,
        out_shape=jax.ShapeDtypeStruct((ROWS, Vp), jnp.float32),
        grid_spec=pltpu.PrefetchScalarGridSpec(
            num_scalar_prefetch=0,
            grid=(ROWS // TM, Vp // TN),
            in_specs=[
                pl.BlockSpec((TM, Hp), lambda r, c: (r, 0)),
                pl.BlockSpec((Hp, TN), lambda r, c: (0, c)),
                pl.BlockSpec((1, TN), lambda r, c: (0, c)),
            ],
            out_specs=pl.BlockSpec((TM, TN), lambda r, c: (r, c)),
        ),
        compiler_params=pltpu.CompilerParams(
            dimension_semantics=("parallel", "parallel")),
    )(hid_bm, wfc, bfc)

    logits = logits_flat.reshape(Bp, Tp, Vp)[:B, :T, :V]       # strip padding
    return logits


# --------------------------------------------------------------------------
# Pure-JAX reference (nn.Embedding -> nn.LSTM(batch_first) -> nn.Linear)
# --------------------------------------------------------------------------
def lstm_model_reference(token_ids, params, *, num_layers, hidden_dim):
    emb = params["embedding"]
    x = jnp.take(emb, token_ids, axis=0)                       # (B, T, E)
    B, T, _ = x.shape
    H = hidden_dim
    layer_in = x
    for l in range(num_layers):
        w_ih = params[f"w_ih_{l}"]; w_hh = params[f"w_hh_{l}"]
        b = params[f"b_ih_{l}"] + params[f"b_hh_{l}"]

        def step(carry, x_t):
            h, c = carry
            gates = x_t @ w_ih.T + h @ w_hh.T + b
            i = jax.nn.sigmoid(gates[:, 0 * H:1 * H])
            f = jax.nn.sigmoid(gates[:, 1 * H:2 * H])
            g = jnp.tanh(gates[:, 2 * H:3 * H])
            o = jax.nn.sigmoid(gates[:, 3 * H:4 * H])
            c = f * c + i * g
            h = o * jnp.tanh(c)
            return (h, c), h

        h0 = jnp.zeros((B, H), jnp.float32)
        c0 = jnp.zeros((B, H), jnp.float32)
        _, hs = lax.scan(step, (h0, c0), jnp.transpose(layer_in, (1, 0, 2)))
        layer_in = jnp.transpose(hs, (1, 0, 2))                 # (B, T, H)
    return layer_in @ params["fc_w"].T + params["fc_b"]


def init_params(key, vocab_size, embed_dim, hidden_dim, num_layers):
    keys = jax.random.split(key, 3 + 4 * num_layers)
    k = iter(keys)
    scale = 1.0 / jnp.sqrt(hidden_dim)
    params = {
        "embedding": jax.random.normal(next(k), (vocab_size, embed_dim),
                                       jnp.float32) * 0.02,
        "fc_w": jax.random.uniform(next(k), (vocab_size, hidden_dim),
                                   jnp.float32, -scale, scale),
        "fc_b": jax.random.uniform(next(k), (vocab_size,),
                                   jnp.float32, -scale, scale),
    }
    for l in range(num_layers):
        in_dim = embed_dim if l == 0 else hidden_dim
        params[f"w_ih_{l}"] = jax.random.uniform(
            next(k), (4 * hidden_dim, in_dim), jnp.float32, -scale, scale)
        params[f"w_hh_{l}"] = jax.random.uniform(
            next(k), (4 * hidden_dim, hidden_dim), jnp.float32, -scale, scale)
        params[f"b_ih_{l}"] = jax.random.uniform(
            next(k), (4 * hidden_dim,), jnp.float32, -scale, scale)
        params[f"b_hh_{l}"] = jax.random.uniform(
            next(k), (4 * hidden_dim,), jnp.float32, -scale, scale)
    return params


if __name__ == "__main__":
    VOCAB, EMBED, HIDDEN, LAYERS = 256, 32, 32, 2
    BATCH, SEQ = 2, 8

    key = jax.random.PRNGKey(0)
    k_param, k_tok = jax.random.split(key)
    params = init_params(k_param, VOCAB, EMBED, HIDDEN, LAYERS)
    token_ids = jax.random.randint(k_tok, (BATCH, SEQ), 0, VOCAB, jnp.int32)

    fwd = jax.jit(functools.partial(lstm_model_forward,
                                    num_layers=LAYERS, hidden_dim=HIDDEN,
                                    time_chunk=4))          # 2 time chunks: exercise state carry
    out = jax.block_until_ready(fwd(token_ids, params))

    ref = lstm_model_reference(token_ids, params,
                               num_layers=LAYERS, hidden_dim=HIDDEN)
    assert out.shape == (BATCH, SEQ, VOCAB)
    assert jnp.allclose(out, ref, atol=1e-4, rtol=1e-4), "mismatch vs reference"

    print("KERNEL_OK")
</pallas_src>

<mosaic_0001>
module attributes {stable_mosaic.version = 11 : i64} {
  func.func @_fc_kernel(%arg0: i32, %arg1: i32, %arg2: memref<64x128xf32, #tpu.memory_space<vmem>>, %arg3: memref<128x256xf32, #tpu.memory_space<vmem>>, %arg4: memref<1x256xf32, #tpu.memory_space<vmem>>, %arg5: memref<64x256xf32, #tpu.memory_space<vmem>>) attributes {dimension_semantics = [#tpu.dimension_semantics<parallel>, #tpu.dimension_semantics<parallel>], iteration_bounds = array<i64: 1, 1>, scalar_prefetch = 0 : i64, scratch_operands = 0 : i64, tpu.core_type = #tpu.core_type<tc>, window_params = [{transform_indices = @transform_0, window_bounds = array<i64: 64, 128>}, {transform_indices = @transform_1, window_bounds = array<i64: 128, 256>}, {transform_indices = @transform_2, window_bounds = array<i64: 1, 256>}, {transform_indices = @transform_3, window_bounds = array<i64: 64, 256>}]} {
    %c0 = arith.constant 0 : index
    %c0_0 = arith.constant 0 : index
    %0 = vector.load %arg2[%c0, %c0_0] : memref<64x128xf32, #tpu.memory_space<vmem>>, vector<64x128xf32>
    %c0_1 = arith.constant 0 : index
    %c0_2 = arith.constant 0 : index
    %1 = vector.load %arg3[%c0_1, %c0_2] : memref<128x256xf32, #tpu.memory_space<vmem>>, vector<128x256xf32>
    %cst = arith.constant dense<0.000000e+00> : vector<64x256xf32>
    %2 = tpu.matmul %0, %1, %cst {dimension_numbers = #tpu.dot_dimension_numbers<[1], [0], [0], [1], [0, 0, 1, 1], [], []>} : vector<64x128xf32>, vector<128x256xf32>, vector<64x256xf32> -> vector<64x256xf32>
    %c0_3 = arith.constant 0 : index
    %c0_4 = arith.constant 0 : index
    %3 = vector.load %arg4[%c0_3, %c0_4] : memref<1x256xf32, #tpu.memory_space<vmem>>, vector<1x256xf32>
    %4 = vector.broadcast %3 : vector<1x256xf32> to vector<64x256xf32>
    %5 = arith.addf %2, %4 : vector<64x256xf32>
    %c0_5 = arith.constant 0 : index
    %c0_6 = arith.constant 0 : index
    %6 = vector.load %arg5[%c0_5, %c0_6] : memref<64x256xf32, #tpu.memory_space<vmem>>, vector<64x256xf32>
    tpu.vector_store %arg5[%c0_5, %c0_6], %5 {strides = array<i32>} : memref<64x256xf32, #tpu.memory_space<vmem>>, vector<64x256xf32>,
    return
  }
  func.func @transform_0(%arg0: i32, %arg1: i32) -> (i32, i32) {
    %c0_i32 = arith.constant 0 : i32
    %c0_i32_0 = arith.constant 0 : i32
    return %arg0, %c0_i32 : i32, i32
  }
  func.func @transform_1(%arg0: i32, %arg1: i32) -> (i32, i32) {
    %c0_i32 = arith.constant 0 : i32
    %c0_i32_0 = arith.constant 0 : i32
    return %c0_i32, %arg1 : i32, i32
  }
  func.func @transform_2(%arg0: i32, %arg1: i32) -> (i32, i32) {
    %c0_i32 = arith.constant 0 : i32
    %c0_i32_0 = arith.constant 0 : i32
    return %c0_i32, %arg1 : i32, i32
  }
  func.func @transform_3(%arg0: i32, %arg1: i32) -> (i32, i32) {
    %c0_i32 = arith.constant 0 : i32
    return %arg0, %arg1 : i32, i32
  }
}

module attributes {stable_mosaic.version = 11 : i64} {
  func.func @_lstm_kernel(%arg0: i32, %arg1: i32, %arg2: memref<4x8x128xf32, #tpu.memory_space<vmem>>, %arg3: memref<2x256x512xf32, #tpu.memory_space<vmem>>, %arg4: memref<2x1x512xf32, #tpu.memory_space<vmem>>, %arg5: memref<4x8x128xf32, #tpu.memory_space<vmem>>, %arg6: memref<2x8x128xf32, #tpu.memory_space<vmem>>, %arg7: memref<2x8x128xf32, #tpu.memory_space<vmem>>) attributes {dimension_semantics = [#tpu.dimension_semantics<parallel>, #tpu.dimension_semantics<arbitrary>], iteration_bounds = array<i64: 1, 2>, scalar_prefetch = 0 : i64, scratch_operands = 2 : i64, tpu.core_type = #tpu.core_type<tc>, window_params = [{transform_indices = @transform_0, window_bounds = array<i64: 4, 8, 128>}, {pipeline_mode = #tpu.pipeline_mode<synchronous>, transform_indices = @transform_1, window_bounds = array<i64: 2, 256, 512>}, {pipeline_mode = #tpu.pipeline_mode<synchronous>, transform_indices = @transform_2, window_bounds = array<i64: 2, 1, 512>}, {transform_indices = @transform_3, window_bounds = array<i64: 4, 8, 128>}]} {
    %c0_i32 = arith.constant 0 : i32
    %0 = arith.cmpi eq, %arg1, %c0_i32 : i32
    %1 = arith.extui %0 : i1 to i32
    %c0_i32_0 = arith.constant 0 : i32
    %2 = arith.cmpi ne, %1, %c0_i32_0 : i32
    scf.if %2 {
      %cst_173 = arith.constant 0.000000e+00 : f32
      %359 = vector.broadcast %cst_173 : f32 to vector<2x8x128xf32>
      %c0_174 = arith.constant 0 : index
      %c0_175 = arith.constant 0 : index
      %c0_176 = arith.constant 0 : index
      %360 = vector.load %arg6[%c0_174, %c0_175, %c0_176] : memref<2x8x128xf32, #tpu.memory_space<vmem>>, vector<2x8x128xf32>
      tpu.vector_store %arg6[%c0_174, %c0_175, %c0_176], %359 {strides = array<i32>} : memref<2x8x128xf32, #tpu.memory_space<vmem>>, vector<2x8x128xf32>,
      %cst_177 = arith.constant 0.000000e+00 : f32
      %361 = vector.broadcast %cst_177 : f32 to vector<2x8x128xf32>
      %c0_178 = arith.constant 0 : index
      %c0_179 = arith.constant 0 : index
      %c0_180 = arith.constant 0 : index
      %362 = vector.load %arg7[%c0_178, %c0_179, %c0_180] : memref<2x8x128xf32, #tpu.memory_space<vmem>>, vector<2x8x128xf32>
      tpu.vector_store %arg7[%c0_178, %c0_179, %c0_180], %361 {strides = array<i32>} : memref<2x8x128xf32, #tpu.memory_space<vmem>>, vector<2x8x128xf32>,
    } else {
    }
    %c0 = arith.constant 0 : index
    %c0_1 = arith.constant 0 : index
    %c0_2 = arith.constant 0 : index
    %3 = vector.load %arg4[%c0, %c0_1, %c0_2] : memref<2x1x512xf32, #tpu.memory_space<vmem>>, vector<1x1x512xf32>
    %4 = vector.shape_cast %3 : vector<1x1x512xf32> to vector<1x512xf32>
    %5 = vector.shape_cast %4 : vector<1x512xf32> to vector<1x512xf32>
    %6 = vector.broadcast %5 : vector<1x512xf32> to vector<8x512xf32>
    %c1 = arith.constant 1 : index
    %c0_3 = arith.constant 0 : index
    %c0_4 = arith.constant 0 : index
    %7 = vector.load %arg4[%c1, %c0_3, %c0_4] : memref<2x1x512xf32, #tpu.memory_space<vmem>>, vector<1x1x512xf32>
    %8 = vector.shape_cast %7 : vector<1x1x512xf32> to vector<1x512xf32>
    %9 = vector.shape_cast %8 : vector<1x512xf32> to vector<1x512xf32>
    %10 = vector.broadcast %9 : vector<1x512xf32> to vector<8x512xf32>
    %c0_i32_5 = arith.constant 0 : i32
    %11 = arith.index_cast %c0_i32_5 : i32 to index
    %c0_6 = arith.constant 0 : index
    %c0_7 = arith.constant 0 : index
    %12 = vector.load %arg2[%11, %c0_6, %c0_7] : memref<4x8x128xf32, #tpu.memory_space<vmem>>, vector<1x8x128xf32>
    %13 = vector.shape_cast %12 : vector<1x8x128xf32> to vector<8x128xf32>
    %c0_8 = arith.constant 0 : index
    %c0_9 = arith.constant 0 : index
    %c0_10 = arith.constant 0 : index
    %14 = vector.load %arg3[%c0_8, %c0_9, %c0_10] : memref<2x256x512xf32, #tpu.memory_space<vmem>>, vector<1x256x512xf32>
    %15 = vector.shape_cast %14 : vector<1x256x512xf32> to vector<256x512xf32>
    %c0_11 = arith.constant 0 : index
    %c0_12 = arith.constant 0 : index
    %c0_13 = arith.constant 0 : index
    %16 = vector.load %arg6[%c0_11, %c0_12, %c0_13] : memref<2x8x128xf32, #tpu.memory_space<vmem>>, vector<1x8x128xf32>
    %17 = vector.shape_cast %16 : vector<1x8x128xf32> to vector<8x128xf32>
    %18 = tpu.concatenate %13, %17 in 1 : vector<8x128xf32>, vector<8x128xf32> -> vector<8x256xf32>
    %cst = arith.constant dense<0.000000e+00> : vector<8x512xf32>
    %19 = tpu.matmul %18, %15, %cst {dimension_numbers = #tpu.dot_dimension_numbers<[1], [0], [0], [1], [0, 0, 1, 1], [], []>} : vector<8x256xf32>, vector<256x512xf32>, vector<8x512xf32> -> vector<8x512xf32>
    %20 = arith.addf %19, %6 : vector<8x512xf32>
    %21 = vector.extract_strided_slice %20 {offsets = [0, 0], sizes = [8, 128], strides = [1, 1]} : vector<8x512xf32> to vector<8x128xf32>
    %22 = arith.negf %21 : vector<8x128xf32>
    %23 = math.exp %22 : vector<8x128xf32>
    %cst_14 = arith.constant 1.000000e+00 : f32
    %24 = vector.broadcast %cst_14 : f32 to vector<8x128xf32>
    %25 = arith.addf %24, %23 : vector<8x128xf32>
    %26 = arith.divf %24, %25 : vector<8x128xf32>
    %27 = vector.extract_strided_slice %20 {offsets = [0, 128], sizes = [8, 128], strides = [1, 1]} : vector<8x512xf32> to vector<8x128xf32>
    %28 = arith.negf %27 : vector<8x128xf32>
    %29 = math.exp %28 : vector<8x128xf32>
    %cst_15 = arith.constant 1.000000e+00 : f32
    %30 = vector.broadcast %cst_15 : f32 to vector<8x128xf32>
    %31 = arith.addf %30, %29 : vector<8x128xf32>
    %32 = arith.divf %30, %31 : vector<8x128xf32>
    %33 = vector.extract_strided_slice %20 {offsets = [0, 256], sizes = [8, 128], strides = [1, 1]} : vector<8x512xf32> to vector<8x128xf32>
    %34 = math.tanh %33 : vector<8x128xf32>
    %35 = vector.extract_strided_slice %20 {offsets = [0, 384], sizes = [8, 128], strides = [1, 1]} : vector<8x512xf32> to vector<8x128xf32>
    %36 = arith.negf %35 : vector<8x128xf32>
    %37 = math.exp %36 : vector<8x128xf32>
    %cst_16 = arith.constant 1.000000e+00 : f32
    %38 = vector.broadcast %cst_16 : f32 to vector<8x128xf32>
    %39 = arith.addf %38, %37 : vector<8x128xf32>
    %40 = arith.divf %38, %39 : vector<8x128xf32>
    %c0_17 = arith.constant 0 : index
    %c0_18 = arith.constant 0 : index
    %c0_19 = arith.constant 0 : index
    %41 = vector.load %arg7[%c0_17, %c0_18, %c0_19] : memref<2x8x128xf32, #tpu.memory_space<vmem>>, vector<1x8x128xf32>
    %42 = vector.shape_cast %41 : vector<1x8x128xf32> to vector<8x128xf32>
    %43 = arith.mulf %32, %42 : vector<8x128xf32>
    %44 = arith.mulf %26, %34 : vector<8x128xf32>
    %45 = arith.addf %43, %44 : vector<8x128xf32>
    %46 = math.tanh %45 : vector<8x128xf32>
    %47 = arith.mulf %40, %46 : vector<8x128xf32>
    %c0_20 = arith.constant 0 : index
    %c0_21 = arith.constant 0 : index
    %c0_22 = arith.constant 0 : index
    %48 = vector.load %arg7[%c0_20, %c0_21, %c0_22] : memref<2x8x128xf32, #tpu.memory_space<vmem>>, vector<1x8x128xf32>
    %49 = vector.shape_cast %48 : vector<1x8x128xf32> to vector<8x128xf32>
    %50 = vector.shape_cast %45 : vector<8x128xf32> to vector<1x8x128xf32>
    tpu.vector_store %arg7[%c0_20, %c0_21, %c0_22], %50 {strides = array<i32>} : memref<2x8x128xf32, #tpu.memory_space<vmem>>, vector<1x8x128xf32>,
    %c0_23 = arith.constant 0 : index
    %c0_24 = arith.constant 0 : index
    %c0_25 = arith.constant 0 : index
    %51 = vector.load %arg6[%c0_23, %c0_24, %c0_25] : memref<2x8x128xf32, #tpu.memory_space<vmem>>, vector<1x8x128xf32>
    %52 = vector.shape_cast %51 : vector<1x8x128xf32> to vector<8x128xf32>
    %53 = vector.shape_cast %47 : vector<8x128xf32> to vector<1x8x128xf32>
    tpu.vector_store %arg6[%c0_23, %c0_24, %c0_25], %53 {strides = array<i32>} : memref<2x8x128xf32, #tpu.memory_space<vmem>>, vector<1x8x128xf32>,
    %c1_26 = arith.constant 1 : index
    %c0_27 = arith.constant 0 : index
    %c0_28 = arith.constant 0 : index
    %54 = vector.load %arg3[%c1_26, %c0_27, %c0_28] : memref<2x256x512xf32, #tpu.memory_space<vmem>>, vector<1x256x512xf32>
    %55 = vector.shape_cast %54 : vector<1x256x512xf32> to vector<256x512xf32>
    %c1_29 = arith.constant 1 : index
    %c0_30 = arith.constant 0 : index
    %c0_31 = arith.constant 0 : index
    %56 = vector.load %arg6[%c1_29, %c0_30, %c0_31] : memref<2x8x128xf32, #tpu.memory_space<vmem>>, vector<1x8x128xf32>
    %57 = vector.shape_cast %56 : vector<1x8x128xf32> to vector<8x128xf32>
    %58 = tpu.concatenate %47, %57 in 1 : vector<8x128xf32>, vector<8x128xf32> -> vector<8x256xf32>
    %cst_32 = arith.constant dense<0.000000e+00> : vector<8x512xf32>
    %59 = tpu.matmul %58, %55, %cst_32 {dimension_numbers = #tpu.dot_dimension_numbers<[1], [0], [0], [1], [0, 0, 1, 1], [], []>} : vector<8x256xf32>, vector<256x512xf32>, vector<8x512xf32> -> vector<8x512xf32>
    %60 = arith.addf %59, %10 : vector<8x512xf32>
    %61 = vector.extract_strided_slice %60 {offsets = [0, 0], sizes = [8, 128], strides = [1, 1]} : vector<8x512xf32> to vector<8x128xf32>
    %62 = arith.negf %61 : vector<8x128xf32>
    %63 = math.exp %62 : vector<8x128xf32>
    %cst_33 = arith.constant 1.000000e+00 : f32
    %64 = vector.broadcast %cst_33 : f32 to vector<8x128xf32>
    %65 = arith.addf %64, %63 : vector<8x128xf32>
    %66 = arith.divf %64, %65 : vector<8x128xf32>
    %67 = vector.extract_strided_slice %60 {offsets = [0, 128], sizes = [8, 128], strides = [1, 1]} : vector<8x512xf32> to vector<8x128xf32>
    %68 = arith.negf %67 : vector<8x128xf32>
    %69 = math.exp %68 : vector<8x128xf32>
    %cst_34 = arith.constant 1.000000e+00 : f32
    %70 = vector.broadcast %cst_34 : f32 to vector<8x128xf32>
    %71 = arith.addf %70, %69 : vector<8x128xf32>
    %72 = arith.divf %70, %71 : vector<8x128xf32>
    %73 = vector.extract_strided_slice %60 {offsets = [0, 256], sizes = [8, 128], strides = [1, 1]} : vector<8x512xf32> to vector<8x128xf32>
    %74 = math.tanh %73 : vector<8x128xf32>
    %75 = vector.extract_strided_slice %60 {offsets = [0, 384], sizes = [8, 128], strides = [1, 1]} : vector<8x512xf32> to vector<8x128xf32>
    %76 = arith.negf %75 : vector<8x128xf32>
    %77 = math.exp %76 : vector<8x128xf32>
    %cst_35 = arith.constant 1.000000e+00 : f32
    %78 = vector.broadcast %cst_35 : f32 to vector<8x128xf32>
    %79 = arith.addf %78, %77 : vector<8x128xf32>
    %80 = arith.divf %78, %79 : vector<8x128xf32>
    %c1_36 = arith.constant 1 : index
    %c0_37 = arith.constant 0 : index
    %c0_38 = arith.constant 0 : index
    %81 = vector.load %arg7[%c1_36, %c0_37, %c0_38] : memref<2x8x128xf32, #tpu.memory_space<vmem>>, vector<1x8x128xf32>
    %82 = vector.shape_cast %81 : vector<1x8x128xf32> to vector<8x128xf32>
    %83 = arith.mulf %72, %82 : vector<8x128xf32>
    %84 = arith.mulf %66, %74 : vector<8x128xf32>
    %85 = arith.addf %83, %84 : vector<8x128xf32>
    %86 = math.tanh %85 : vector<8x128xf32>
    %87 = arith.mulf %80, %86 : vector<8x128xf32>
    %c1_39 = arith.constant 1 : index
    %c0_40 = arith.constant 0 : index
    %c0_41 = arith.constant 0 : index
    %88 = vector.load %arg7[%c1_39, %c0_40, %c0_41] : memref<2x8x128xf32, #tpu.memory_space<vmem>>, vector<1x8x128xf32>
    %89 = vector.shape_cast %88 : vector<1x8x128xf32> to vector<8x128xf32>
    %90 = vector.shape_cast %85 : vector<8x128xf32> to vector<1x8x128xf32>
    tpu.vector_store %arg7[%c1_39, %c0_40, %c0_41], %90 {strides = array<i32>} : memref<2x8x128xf32, #tpu.memory_space<vmem>>, vector<1x8x128xf32>,
    %c1_42 = arith.constant 1 : index
    %c0_43 = arith.constant 0 : index
    %c0_44 = arith.constant 0 : index
    %91 = vector.load %arg6[%c1_42, %c0_43, %c0_44] : memref<2x8x128xf32, #tpu.memory_space<vmem>>, vector<1x8x128xf32>
    %92 = vector.shape_cast %91 : vector<1x8x128xf32> to vector<8x128xf32>
    %93 = vector.shape_cast %87 : vector<8x128xf32> to vector<1x8x128xf32>
    tpu.vector_store %arg6[%c1_42, %c0_43, %c0_44], %93 {strides = array<i32>} : memref<2x8x128xf32, #tpu.memory_space<vmem>>, vector<1x8x128xf32>,
    %94 = arith.index_cast %c0_i32_5 : i32 to index
    %c0_45 = arith.constant 0 : index
    %c0_46 = arith.constant 0 : index
    %95 = vector.load %arg5[%94, %c0_45, %c0_46] : memref<4x8x128xf32, #tpu.memory_space<vmem>>, vector<1x8x128xf32>
    %96 = vector.shape_cast %95 : vector<1x8x128xf32> to vector<8x128xf32>
    %97 = vector.shape_cast %87 : vector<8x128xf32> to vector<1x8x128xf32>
    tpu.vector_store %arg5[%94, %c0_45, %c0_46], %97 {strides = array<i32>} : memref<4x8x128xf32, #tpu.memory_space<vmem>>, vector<1x8x128xf32>,
    %c1_i32 = arith.constant 1 : i32
    %98 = arith.index_cast %c1_i32 : i32 to index
    %c0_47 = arith.constant 0 : index
    %c0_48 = arith.constant 0 : index
    %99 = vector.load %arg2[%98, %c0_47, %c0_48] : memref<4x8x128xf32, #tpu.memory_space<vmem>>, vector<1x8x128xf32>
    %100 = vector.shape_cast %99 : vector<1x8x128xf32> to vector<8x128xf32>
    %c0_49 = arith.constant 0 : index
    %c0_50 = arith.constant 0 : index
    %c0_51 = arith.constant 0 : index
    %101 = vector.load %arg3[%c0_49, %c0_50, %c0_51] : memref<2x256x512xf32, #tpu.memory_space<vmem>>, vector<1x256x512xf32>
    %102 = vector.shape_cast %101 : vector<1x256x512xf32> to vector<256x512xf32>
    %c0_52 = arith.constant 0 : index
    %c0_53 = arith.constant 0 : index
    %c0_54 = arith.constant 0 : index
    %103 = vector.load %arg6[%c0_52, %c0_53, %c0_54] : memref<2x8x128xf32, #tpu.memory_space<vmem>>, vector<1x8x128xf32>
    %104 = vector.shape_cast %103 : vector<1x8x128xf32> to vector<8x128xf32>
    %105 = tpu.concatenate %100, %104 in 1 : vector<8x128xf32>, vector<8x128xf32> -> vector<8x256xf32>
    %cst_55 = arith.constant dense<0.000000e+00> : vector<8x512xf32>
    %106 = tpu.matmul %105, %102, %cst_55 {dimension_numbers = #tpu.dot_dimension_numbers<[1], [0], [0], [1], [0, 0, 1, 1], [], []>} : vector<8x256xf32>, vector<256x512xf32>, vector<8x512xf32> -> vector<8x512xf32>
    %107 = arith.addf %106, %6 : vector<8x512xf32>
    %108 = vector.extract_strided_slice %107 {offsets = [0, 0], sizes = [8, 128], strides = [1, 1]} : vector<8x512xf32> to vector<8x128xf32>
    %109 = arith.negf %108 : vector<8x128xf32>
    %110 = math.exp %109 : vector<8x128xf32>
    %cst_56 = arith.constant 1.000000e+00 : f32
    %111 = vector.broadcast %cst_56 : f32 to vector<8x128xf32>
    %112 = arith.addf %111, %110 : vector<8x128xf32>
    %113 = arith.divf %111, %112 : vector<8x128xf32>
    %114 = vector.extract_strided_slice %107 {offsets = [0, 128], sizes = [8, 128], strides = [1, 1]} : vector<8x512xf32> to vector<8x128xf32>
    %115 = arith.negf %114 : vector<8x128xf32>
    %116 = math.exp %115 : vector<8x128xf32>
    %cst_57 = arith.constant 1.000000e+00 : f32
    %117 = vector.broadcast %cst_57 : f32 to vector<8x128xf32>
    %118 = arith.addf %117, %116 : vector<8x128xf32>
    %119 = arith.divf %117, %118 : vector<8x128xf32>
    %120 = vector.extract_strided_slice %107 {offsets = [0, 256], sizes = [8, 128], strides = [1, 1]} : vector<8x512xf32> to vector<8x128xf32>
    %121 = math.tanh %120 : vector<8x128xf32>
    %122 = vector.extract_strided_slice %107 {offsets = [0, 384], sizes = [8, 128], strides = [1, 1]} : vector<8x512xf32> to vector<8x128xf32>
    %123 = arith.negf %122 : vector<8x128xf32>
    %124 = math.exp %123 : vector<8x128xf32>
    %cst_58 = arith.constant 1.000000e+00 : f32
    %125 = vector.broadcast %cst_58 : f32 to vector<8x128xf32>
    %126 = arith.addf %125, %124 : vector<8x128xf32>
    %127 = arith.divf %125, %126 : vector<8x128xf32>
    %c0_59 = arith.constant 0 : index
    %c0_60 = arith.constant 0 : index
    %c0_61 = arith.constant 0 : index
    %128 = vector.load %arg7[%c0_59, %c0_60, %c0_61] : memref<2x8x128xf32, #tpu.memory_space<vmem>>, vector<1x8x128xf32>
    %129 = vector.shape_cast %128 : vector<1x8x128xf32> to vector<8x128xf32>
    %130 = arith.mulf %119, %129 : vector<8x128xf32>
    %131 = arith.mulf %113, %121 : vector<8x128xf32>
    %132 = arith.addf %130, %131 : vector<8x128xf32>
    %133 = math.tanh %132 : vector<8x128xf32>
    %134 = arith.mulf %127, %133 : vector<8x128xf32>
    %c0_62 = arith.constant 0 : index
    %c0_63 = arith.constant 0 : index
    %c0_64 = arith.constant 0 : index
    %135 = vector.load %arg7[%c0_62, %c0_63, %c0_64] : memref<2x8x128xf32, #tpu.memory_space<vmem>>, vector<1x8x128xf32>
    %136 = vector.shape_cast %135 : vector<1x8x128xf32> to vector<8x128xf32>
    %137 = vector.shape_cast %132 : vector<8x128xf32> to vector<1x8x128xf32>
    tpu.vector_store %arg7[%c0_62, %c0_63, %c0_64], %137 {strides = array<i32>} : memref<2x8x128xf32, #tpu.memory_space<vmem>>, vector<1x8x128xf32>,
    %c0_65 = arith.constant 0 : index
    %c0_66 = arith.constant 0 : index
    %c0_67 = arith.constant 0 : index
    %138 = vector.load %arg6[%c0_65, %c0_66, %c0_67] : memref<2x8x128xf32, #tpu.memory_space<vmem>>, vector<1x8x128xf32>
    %139 = vector.shape_cast %138 : vector<1x8x128xf32> to vector<8x128xf32>
    %140 = vector.shape_cast %134 : vector<8x128xf32> to vector<1x8x128xf32>
    tpu.vector_store %arg6[%c0_65, %c0_66, %c0_67], %140 {strides = array<i32>} : memref<2x8x128xf32, #tpu.memory_space<vmem>>, vector<1x8x128xf32>,
    %c1_68 = arith.constant 1 : index
    %c0_69 = arith.constant 0 : index
    %c0_70 = arith.constant 0 : index
    %141 = vector.load %arg3[%c1_68, %c0_69, %c0_70] : memref<2x256x512xf32, #tpu.memory_space<vmem>>, vector<1x256x512xf32>
    %142 = vector.shape_cast %141 : vector<1x256x512xf32> to vector<256x512xf32>
    %c1_71 = arith.constant 1 : index
    %c0_72 = arith.constant 0 : index
    %c0_73 = arith.constant 0 : index
    %143 = vector.load %arg6[%c1_71, %c0_72, %c0_73] : memref<2x8x128xf32, #tpu.memory_space<vmem>>, vector<1x8x128xf32>
    %144 = vector.shape_cast %143 : vector<1x8x128xf32> to vector<8x128xf32>
    %145 = tpu.concatenate %134, %144 in 1 : vector<8x128xf32>, vector<8x128xf32> -> vector<8x256xf32>
    %cst_74 = arith.constant dense<0.000000e+00> : vector<8x512xf32>
    %146 = tpu.matmul %145, %142, %cst_74 {dimension_numbers = #tpu.dot_dimension_numbers<[1], [0], [0], [1], [0, 0, 1, 1], [], []>} : vector<8x256xf32>, vector<256x512xf32>, vector<8x512xf32> -> vector<8x512xf32>
    %147 = arith.addf %146, %10 : vector<8x512xf32>
    %148 = vector.extract_strided_slice %147 {offsets = [0, 0], sizes = [8, 128], strides = [1, 1]} : vector<8x512xf32> to vector<8x128xf32>
    %149 = arith.negf %148 : vector<8x128xf32>
    %150 = math.exp %149 : vector<8x128xf32>
    %cst_75 = arith.constant 1.000000e+00 : f32
    %151 = vector.broadcast %cst_75 : f32 to vector<8x128xf32>
    %152 = arith.addf %151, %150 : vector<8x128xf32>
    %153 = arith.divf %151, %152 : vector<8x128xf32>
    %154 = vector.extract_strided_slice %147 {offsets = [0, 128], sizes = [8, 128], strides = [1, 1]} : vector<8x512xf32> to vector<8x128xf32>
    %155 = arith.negf %154 : vector<8x128xf32>
    %156 = math.exp %155 : vector<8x128xf32>
    %cst_76 = arith.constant 1.000000e+00 : f32
    %157 = vector.broadcast %cst_76 : f32 to vector<8x128xf32>
    %158 = arith.addf %157, %156 : vector<8x128xf32>
    %159 = arith.divf %157, %158 : vector<8x128xf32>
    %160 = vector.extract_strided_slice %147 {offsets = [0, 256], sizes = [8, 128], strides = [1, 1]} : vector<8x512xf32> to vector<8x128xf32>
    %161 = math.tanh %160 : vector<8x128xf32>
    %162 = vector.extract_strided_slice %147 {offsets = [0, 384], sizes = [8, 128], strides = [1, 1]} : vector<8x512xf32> to vector<8x128xf32>
    %163 = arith.negf %162 : vector<8x128xf32>
    %164 = math.exp %163 : vector<8x128xf32>
    %cst_77 = arith.constant 1.000000e+00 : f32
    %165 = vector.broadcast %cst_77 : f32 to vector<8x128xf32>
    %166 = arith.addf %165, %164 : vector<8x128xf32>
    %167 = arith.divf %165, %166 : vector<8x128xf32>
    %c1_78 = arith.constant 1 : index
    %c0_79 = arith.constant 0 : index
    %c0_80 = arith.constant 0 : index
    %168 = vector.load %arg7[%c1_78, %c0_79, %c0_80] : memref<2x8x128xf32, #tpu.memory_space<vmem>>, vector<1x8x128xf32>
    %169 = vector.shape_cast %168 : vector<1x8x128xf32> to vector<8x128xf32>
    %170 = arith.mulf %159, %169 : vector<8x128xf32>
    %171 = arith.mulf %153, %161 : vector<8x128xf32>
    %172 = arith.addf %170, %171 : vector<8x128xf32>
    %173 = math.tanh %172 : vector<8x128xf32>
    %174 = arith.mulf %167, %173 : vector<8x128xf32>
    %c1_81 = arith.constant 1 : index
    %c0_82 = arith.constant 0 : index
    %c0_83 = arith.constant 0 : index
    %175 = vector.load %arg7[%c1_81, %c0_82, %c0_83] : memref<2x8x128xf32, #tpu.memory_space<vmem>>, vector<1x8x128xf32>
    %176 = vector.shape_cast %175 : vector<1x8x128xf32> to vector<8x128xf32>
    %177 = vector.shape_cast %172 : vector<8x128xf32> to vector<1x8x128xf32>
    tpu.vector_store %arg7[%c1_81, %c0_82, %c0_83], %177 {strides = array<i32>} : memref<2x8x128xf32, #tpu.memory_space<vmem>>, vector<1x8x128xf32>,
    %c1_84 = arith.constant 1 : index
    %c0_85 = arith.constant 0 : index
    %c0_86 = arith.constant 0 : index
    %178 = vector.load %arg6[%c1_84, %c0_85, %c0_86] : memref<2x8x128xf32, #tpu.memory_space<vmem>>, vector<1x8x128xf32>
    %179 = vector.shape_cast %178 : vector<1x8x128xf32> to vector<8x128xf32>
    %180 = vector.shape_cast %174 : vector<8x128xf32> to vector<1x8x128xf32>
    tpu.vector_store %arg6[%c1_84, %c0_85, %c0_86], %180 {strides = array<i32>} : memref<2x8x128xf32, #tpu.memory_space<vmem>>, vector<1x8x128xf32>,
    %181 = arith.index_cast %c1_i32 : i32 to index
    %c0_87 = arith.constant 0 : index
    %c0_88 = arith.constant 0 : index
    %182 = vector.load %arg5[%181, %c0_87, %c0_88] : memref<4x8x128xf32, #tpu.memory_space<vmem>>, vector<1x8x128xf32>
    %183 = vector.shape_cast %182 : vector<1x8x128xf32> to vector<8x128xf32>
    %184 = vector.shape_cast %174 : vector<8x128xf32> to vector<1x8x128xf32>
    tpu.vector_store %arg5[%181, %c0_87, %c0_88], %184 {strides = array<i32>} : memref<4x8x128xf32, #tpu.memory_space<vmem>>, vector<1x8x128xf32>,
    %c2_i32 = arith.constant 2 : i32
    %185 = arith.index_cast %c2_i32 : i32 to index
    %c0_89 = arith.constant 0 : index
    %c0_90 = arith.constant 0 : index
    %186 = vector.load %arg2[%185, %c0_89, %c0_90] : memref<4x8x128xf32, #tpu.memory_space<vmem>>, vector<1x8x128xf32>
    %187 = vector.shape_cast %186 : vector<1x8x128xf32> to vector<8x128xf32>
    %c0_91 = arith.constant 0 : index
    %c0_92 = arith.constant 0 : index
    %c0_93 = arith.constant 0 : index
    %188 = vector.load %arg3[%c0_91, %c0_92, %c0_93] : memref<2x256x512xf32, #tpu.memory_space<vmem>>, vector<1x256x512xf32>
    %189 = vector.shape_cast %188 : vector<1x256x512xf32> to vector<256x512xf32>
    %c0_94 = arith.constant 0 : index
    %c0_95 = arith.constant 0 : index
    %c0_96 = arith.constant 0 : index
    %190 = vector.load %arg6[%c0_94, %c0_95, %c0_96] : memref<2x8x128xf32, #tpu.memory_space<vmem>>, vector<1x8x128xf32>
    %191 = vector.shape_cast %190 : vector<1x8x128xf32> to vector<8x128xf32>
    %192 = tpu.concatenate %187, %191 in 1 : vector<8x128xf32>, vector<8x128xf32> -> vector<8x256xf32>
    %cst_97 = arith.constant dense<0.000000e+00> : vector<8x512xf32>
    %193 = tpu.matmul %192, %189, %cst_97 {dimension_numbers = #tpu.dot_dimension_numbers<[1], [0], [0], [1], [0, 0, 1, 1], [], []>} : vector<8x256xf32>, vector<256x512xf32>, vector<8x512xf32> -> vector<8x512xf32>
    %194 = arith.addf %193, %6 : vector<8x512xf32>
    %195 = vector.extract_strided_slice %194 {offsets = [0, 0], sizes = [8, 128], strides = [1, 1]} : vector<8x512xf32> to vector<8x128xf32>
    %196 = arith.negf %195 : vector<8x128xf32>
    %197 = math.exp %196 : vector<8x128xf32>
    %cst_98 = arith.constant 1.000000e+00 : f32
    %198 = vector.broadcast %cst_98 : f32 to vector<8x128xf32>
    %199 = arith.addf %198, %197 : vector<8x128xf32>
    %200 = arith.divf %198, %199 : vector<8x128xf32>
    %201 = vector.extract_strided_slice %194 {offsets = [0, 128], sizes = [8, 128], strides = [1, 1]} : vector<8x512xf32> to vector<8x128xf32>
    %202 = arith.negf %201 : vector<8x128xf32>
    %203 = math.exp %202 : vector<8x128xf32>
    %cst_99 = arith.constant 1.000000e+00 : f32
    %204 = vector.broadcast %cst_99 : f32 to vector<8x128xf32>
    %205 = arith.addf %204, %203 : vector<8x128xf32>
    %206 = arith.divf %204, %205 : vector<8x128xf32>
    %207 = vector.extract_strided_slice %194 {offsets = [0, 256], sizes = [8, 128], strides = [1, 1]} : vector<8x512xf32> to vector<8x128xf32>
    %208 = math.tanh %207 : vector<8x128xf32>
    %209 = vector.extract_strided_slice %194 {offsets = [0, 384], sizes = [8, 128], strides = [1, 1]} : vector<8x512xf32> to vector<8x128xf32>
    %210 = arith.negf %209 : vector<8x128xf32>
    %211 = math.exp %210 : vector<8x128xf32>
    %cst_100 = arith.constant 1.000000e+00 : f32
    %212 = vector.broadcast %cst_100 : f32 to vector<8x128xf32>
    %213 = arith.addf %212, %211 : vector<8x128xf32>
    %214 = arith.divf %212, %213 : vector<8x128xf32>
    %c0_101 = arith.constant 0 : index
    %c0_102 = arith.constant 0 : index
    %c0_103 = arith.constant 0 : index
    %215 = vector.load %arg7[%c0_101, %c0_102, %c0_103] : memref<2x8x128xf32, #tpu.memory_space<vmem>>, vector<1x8x128xf32>
    %216 = vector.shape_cast %215 : vector<1x8x128xf32> to vector<8x128xf32>
    %217 = arith.mulf %206, %216 : vector<8x128xf32>
    %218 = arith.mulf %200, %208 : vector<8x128xf32>
    %219 = arith.addf %217, %218 : vector<8x128xf32>
    %220 = math.tanh %219 : vector<8x128xf32>
    %221 = arith.mulf %214, %220 : vector<8x128xf32>
    %c0_104 = arith.constant 0 : index
    %c0_105 = arith.constant 0 : index
    %c0_106 = arith.constant 0 : index
    %222 = vector.load %arg7[%c0_104, %c0_105, %c0_106] : memref<2x8x128xf32, #tpu.memory_space<vmem>>, vector<1x8x128xf32>
    %223 = vector.shape_cast %222 : vector<1x8x128xf32> to vector<8x128xf32>
    %224 = vector.shape_cast %219 : vector<8x128xf32> to vector<1x8x128xf32>
    tpu.vector_store %arg7[%c0_104, %c0_105, %c0_106], %224 {strides = array<i32>} : memref<2x8x128xf32, #tpu.memory_space<vmem>>, vector<1x8x128xf32>,
    %c0_107 = arith.constant 0 : index
    %c0_108 = arith.constant 0 : index
    %c0_109 = arith.constant 0 : index
    %225 = vector.load %arg6[%c0_107, %c0_108, %c0_109] : memref<2x8x128xf32, #tpu.memory_space<vmem>>, vector<1x8x128xf32>
    %226 = vector.shape_cast %225 : vector<1x8x128xf32> to vector<8x128xf32>
    %227 = vector.shape_cast %221 : vector<8x128xf32> to vector<1x8x128xf32>
    tpu.vector_store %arg6[%c0_107, %c0_108, %c0_109], %227 {strides = array<i32>} : memref<2x8x128xf32, #tpu.memory_space<vmem>>, vector<1x8x128xf32>,
    %c1_110 = arith.constant 1 : index
    %c0_111 = arith.constant 0 : index
    %c0_112 = arith.constant 0 : index
    %228 = vector.load %arg3[%c1_110, %c0_111, %c0_112] : memref<2x256x512xf32, #tpu.memory_space<vmem>>, vector<1x256x512xf32>
    %229 = vector.shape_cast %228 : vector<1x256x512xf32> to vector<256x512xf32>
    %c1_113 = arith.constant 1 : index
    %c0_114 = arith.constant 0 : index
    %c0_115 = arith.constant 0 : index
    %230 = vector.load %arg6[%c1_113, %c0_114, %c0_115] : memref<2x8x128xf32, #tpu.memory_space<vmem>>, vector<1x8x128xf32>
    %231 = vector.shape_cast %230 : vector<1x8x128xf32> to vector<8x128xf32>
    %232 = tpu.concatenate %221, %231 in 1 : vector<8x128xf32>, vector<8x128xf32> -> vector<8x256xf32>
    %cst_116 = arith.constant dense<0.000000e+00> : vector<8x512xf32>
    %233 = tpu.matmul %232, %229, %cst_116 {dimension_numbers = #tpu.dot_dimension_numbers<[1], [0], [0], [1], [0, 0, 1, 1], [], []>} : vector<8x256xf32>, vector<256x512xf32>, vector<8x512xf32> -> vector<8x512xf32>
    %234 = arith.addf %233, %10 : vector<8x512xf32>
    %235 = vector.extract_strided_slice %234 {offsets = [0, 0], sizes = [8, 128], strides = [1, 1]} : vector<8x512xf32> to vector<8x128xf32>
    %236 = arith.negf %235 : vector<8x128xf32>
    %237 = math.exp %236 : vector<8x128xf32>
    %cst_117 = arith.constant 1.000000e+00 : f32
    %238 = vector.broadcast %cst_117 : f32 to vector<8x128xf32>
    %239 = arith.addf %238, %237 : vector<8x128xf32>
    %240 = arith.divf %238, %239 : vector<8x128xf32>
    %241 = vector.extract_strided_slice %234 {offsets = [0, 128], sizes = [8, 128], strides = [1, 1]} : vector<8x512xf32> to vector<8x128xf32>
    %242 = arith.negf %241 : vector<8x128xf32>
    %243 = math.exp %242 : vector<8x128xf32>
    %cst_118 = arith.constant 1.000000e+00 : f32
    %244 = vector.broadcast %cst_118 : f32 to vector<8x128xf32>
    %245 = arith.addf %244, %243 : vector<8x128xf32>
    %246 = arith.divf %244, %245 : vector<8x128xf32>
    %247 = vector.extract_strided_slice %234 {offsets = [0, 256], sizes = [8, 128], strides = [1, 1]} : vector<8x512xf32> to vector<8x128xf32>
    %248 = math.tanh %247 : vector<8x128xf32>
    %249 = vector.extract_strided_slice %234 {offsets = [0, 384], sizes = [8, 128], strides = [1, 1]} : vector<8x512xf32> to vector<8x128xf32>
    %250 = arith.negf %249 : vector<8x128xf32>
    %251 = math.exp %250 : vector<8x128xf32>
    %cst_119 = arith.constant 1.000000e+00 : f32
    %252 = vector.broadcast %cst_119 : f32 to vector<8x128xf32>
    %253 = arith.addf %252, %251 : vector<8x128xf32>
    %254 = arith.divf %252, %253 : vector<8x128xf32>
    %c1_120 = arith.constant 1 : index
    %c0_121 = arith.constant 0 : index
    %c0_122 = arith.constant 0 : index
    %255 = vector.load %arg7[%c1_120, %c0_121, %c0_122] : memref<2x8x128xf32, #tpu.memory_space<vmem>>, vector<1x8x128xf32>
    %256 = vector.shape_cast %255 : vector<1x8x128xf32> to vector<8x128xf32>
    %257 = arith.mulf %246, %256 : vector<8x128xf32>
    %258 = arith.mulf %240, %248 : vector<8x128xf32>
    %259 = arith.addf %257, %258 : vector<8x128xf32>
    %260 = math.tanh %259 : vector<8x128xf32>
    %261 = arith.mulf %254, %260 : vector<8x128xf32>
    %c1_123 = arith.constant 1 : index
    %c0_124 = arith.constant 0 : index
    %c0_125 = arith.constant 0 : index
    %262 = vector.load %arg7[%c1_123, %c0_124, %c0_125] : memref<2x8x128xf32, #tpu.memory_space<vmem>>, vector<1x8x128xf32>
    %263 = vector.shape_cast %262 : vector<1x8x128xf32> to vector<8x128xf32>
    %264 = vector.shape_cast %259 : vector<8x128xf32> to vector<1x8x128xf32>
    tpu.vector_store %arg7[%c1_123, %c0_124, %c0_125], %264 {strides = array<i32>} : memref<2x8x128xf32, #tpu.memory_space<vmem>>, vector<1x8x128xf32>,
    %c1_126 = arith.constant 1 : index
    %c0_127 = arith.constant 0 : index
    %c0_128 = arith.constant 0 : index
    %265 = vector.load %arg6[%c1_126, %c0_127, %c0_128] : memref<2x8x128xf32, #tpu.memory_space<vmem>>, vector<1x8x128xf32>
    %266 = vector.shape_cast %265 : vector<1x8x128xf32> to vector<8x128xf32>
    %267 = vector.shape_cast %261 : vector<8x128xf32> to vector<1x8x128xf32>
    tpu.vector_store %arg6[%c1_126, %c0_127, %c0_128], %267 {strides = array<i32>} : memref<2x8x128xf32, #tpu.memory_space<vmem>>, vector<1x8x128xf32>,
    %268 = arith.index_cast %c2_i32 : i32 to index
    %c0_129 = arith.constant 0 : index
    %c0_130 = arith.constant 0 : index
    %269 = vector.load %arg5[%268, %c0_129, %c0_130] : memref<4x8x128xf32, #tpu.memory_space<vmem>>, vector<1x8x128xf32>
    %270 = vector.shape_cast %269 : vector<1x8x128xf32> to vector<8x128xf32>
    %271 = vector.shape_cast %261 : vector<8x128xf32> to vector<1x8x128xf32>
    tpu.vector_store %arg5[%268, %c0_129, %c0_130], %271 {strides = array<i32>} : memref<4x8x128xf32, #tpu.memory_space<vmem>>, vector<1x8x128xf32>,
    %c3_i32 = arith.constant 3 : i32
    %272 = arith.index_cast %c3_i32 : i32 to index
    %c0_131 = arith.constant 0 : index
    %c0_132 = arith.constant 0 : index
    %273 = vector.load %arg2[%272, %c0_131, %c0_132] : memref<4x8x128xf32, #tpu.memory_space<vmem>>, vector<1x8x128xf32>
    %274 = vector.shape_cast %273 : vector<1x8x128xf32> to vector<8x128xf32>
    %c0_133 = arith.constant 0 : index
    %c0_134 = arith.constant 0 : index
    %c0_135 = arith.constant 0 : index
    %275 = vector.load %arg3[%c0_133, %c0_134, %c0_135] : memref<2x256x512xf32, #tpu.memory_space<vmem>>, vector<1x256x512xf32>
    %276 = vector.shape_cast %275 : vector<1x256x512xf32> to vector<256x512xf32>
    %c0_136 = arith.constant 0 : index
    %c0_137 = arith.constant 0 : index
    %c0_138 = arith.constant 0 : index
    %277 = vector.load %arg6[%c0_136, %c0_137, %c0_138] : memref<2x8x128xf32, #tpu.memory_space<vmem>>, vector<1x8x128xf32>
    %278 = vector.shape_cast %277 : vector<1x8x128xf32> to vector<8x128xf32>
    %279 = tpu.concatenate %274, %278 in 1 : vector<8x128xf32>, vector<8x128xf32> -> vector<8x256xf32>
    %cst_139 = arith.constant dense<0.000000e+00> : vector<8x512xf32>
    %280 = tpu.matmul %279, %276, %cst_139 {dimension_numbers = #tpu.dot_dimension_numbers<[1], [0], [0], [1], [0, 0, 1, 1], [], []>} : vector<8x256xf32>, vector<256x512xf32>, vector<8x512xf32> -> vector<8x512xf32>
    %281 = arith.addf %280, %6 : vector<8x512xf32>
    %282 = vector.extract_strided_slice %281 {offsets = [0, 0], sizes = [8, 128], strides = [1, 1]} : vector<8x512xf32> to vector<8x128xf32>
    %283 = arith.negf %282 : vector<8x128xf32>
    %284 = math.exp %283 : vector<8x128xf32>
    %cst_140 = arith.constant 1.000000e+00 : f32
    %285 = vector.broadcast %cst_140 : f32 to vector<8x128xf32>
    %286 = arith.addf %285, %284 : vector<8x128xf32>
    %287 = arith.divf %285, %286 : vector<8x128xf32>
    %288 = vector.extract_strided_slice %281 {offsets = [0, 128], sizes = [8, 128], strides = [1, 1]} : vector<8x512xf32> to vector<8x128xf32>
    %289 = arith.negf %288 : vector<8x128xf32>
    %290 = math.exp %289 : vector<8x128xf32>
    %cst_141 = arith.constant 1.000000e+00 : f32
    %291 = vector.broadcast %cst_141 : f32 to vector<8x128xf32>
    %292 = arith.addf %291, %290 : vector<8x128xf32>
    %293 = arith.divf %291, %292 : vector<8x128xf32>
    %294 = vector.extract_strided_slice %281 {offsets = [0, 256], sizes = [8, 128], strides = [1, 1]} : vector<8x512xf32> to vector<8x128xf32>
    %295 = math.tanh %294 : vector<8x128xf32>
    %296 = vector.extract_strided_slice %281 {offsets = [0, 384], sizes = [8, 128], strides = [1, 1]} : vector<8x512xf32> to vector<8x128xf32>
    %297 = arith.negf %296 : vector<8x128xf32>
    %298 = math.exp %297 : vector<8x128xf32>
    %cst_142 = arith.constant 1.000000e+00 : f32
    %299 = vector.broadcast %cst_142 : f32 to vector<8x128xf32>
    %300 = arith.addf %299, %298 : vector<8x128xf32>
    %301 = arith.divf %299, %300 : vector<8x128xf32>
    %c0_143 = arith.constant 0 : index
    %c0_144 = arith.constant 0 : index
    %c0_145 = arith.constant 0 : index
    %302 = vector.load %arg7[%c0_143, %c0_144, %c0_145] : memref<2x8x128xf32, #tpu.memory_space<vmem>>, vector<1x8x128xf32>
    %303 = vector.shape_cast %302 : vector<1x8x128xf32> to vector<8x128xf32>
    %304 = arith.mulf %293, %303 : vector<8x128xf32>
    %305 = arith.mulf %287, %295 : vector<8x128xf32>
    %306 = arith.addf %304, %305 : vector<8x128xf32>
    %307 = math.tanh %306 : vector<8x128xf32>
    %308 = arith.mulf %301, %307 : vector<8x128xf32>
    %c0_146 = arith.constant 0 : index
    %c0_147 = arith.constant 0 : index
    %c0_148 = arith.constant 0 : index
    %309 = vector.load %arg7[%c0_146, %c0_147, %c0_148] : memref<2x8x128xf32, #tpu.memory_space<vmem>>, vector<1x8x128xf32>
    %310 = vector.shape_cast %309 : vector<1x8x128xf32> to vector<8x128xf32>
    %311 = vector.shape_cast %306 : vector<8x128xf32> to vector<1x8x128xf32>
    tpu.vector_store %arg7[%c0_146, %c0_147, %c0_148], %311 {strides = array<i32>} : memref<2x8x128xf32, #tpu.memory_space<vmem>>, vector<1x8x128xf32>,
    %c0_149 = arith.constant 0 : index
    %c0_150 = arith.constant 0 : index
    %c0_151 = arith.constant 0 : index
    %312 = vector.load %arg6[%c0_149, %c0_150, %c0_151] : memref<2x8x128xf32, #tpu.memory_space<vmem>>, vector<1x8x128xf32>
    %313 = vector.shape_cast %312 : vector<1x8x128xf32> to vector<8x128xf32>
    %314 = vector.shape_cast %308 : vector<8x128xf32> to vector<1x8x128xf32>
    tpu.vector_store %arg6[%c0_149, %c0_150, %c0_151], %314 {strides = array<i32>} : memref<2x8x128xf32, #tpu.memory_space<vmem>>, vector<1x8x128xf32>,
    %c1_152 = arith.constant 1 : index
    %c0_153 = arith.constant 0 : index
    %c0_154 = arith.constant 0 : index
    %315 = vector.load %arg3[%c1_152, %c0_153, %c0_154] : memref<2x256x512xf32, #tpu.memory_space<vmem>>, vector<1x256x512xf32>
    %316 = vector.shape_cast %315 : vector<1x256x512xf32> to vector<256x512xf32>
    %c1_155 = arith.constant 1 : index
    %c0_156 = arith.constant 0 : index
    %c0_157 = arith.constant 0 : index
    %317 = vector.load %arg6[%c1_155, %c0_156, %c0_157] : memref<2x8x128xf32, #tpu.memory_space<vmem>>, vector<1x8x128xf32>
    %318 = vector.shape_cast %317 : vector<1x8x128xf32> to vector<8x128xf32>
    %319 = tpu.concatenate %308, %318 in 1 : vector<8x128xf32>, vector<8x128xf32> -> vector<8x256xf32>
    %cst_158 = arith.constant dense<0.000000e+00> : vector<8x512xf32>
    %320 = tpu.matmul %319, %316, %cst_158 {dimension_numbers = #tpu.dot_dimension_numbers<[1], [0], [0], [1], [0, 0, 1, 1], [], []>} : vector<8x256xf32>, vector<256x512xf32>, vector<8x512xf32> -> vector<8x512xf32>
    %321 = arith.addf %320, %10 : vector<8x512xf32>
    %322 = vector.extract_strided_slice %321 {offsets = [0, 0], sizes = [8, 128], strides = [1, 1]} : vector<8x512xf32> to vector<8x128xf32>
    %323 = arith.negf %322 : vector<8x128xf32>
    %324 = math.exp %323 : vector<8x128xf32>
    %cst_159 = arith.constant 1.000000e+00 : f32
    %325 = vector.broadcast %cst_159 : f32 to vector<8x128xf32>
    %326 = arith.addf %325, %324 : vector<8x128xf32>
    %327 = arith.divf %325, %326 : vector<8x128xf32>
    %328 = vector.extract_strided_slice %321 {offsets = [0, 128], sizes = [8, 128], strides = [1, 1]} : vector<8x512xf32> to vector<8x128xf32>
    %329 = arith.negf %328 : vector<8x128xf32>
    %330 = math.exp %329 : vector<8x128xf32>
    %cst_160 = arith.constant 1.000000e+00 : f32
    %331 = vector.broadcast %cst_160 : f32 to vector<8x128xf32>
    %332 = arith.addf %331, %330 : vector<8x128xf32>
    %333 = arith.divf %331, %332 : vector<8x128xf32>
    %334 = vector.extract_strided_slice %321 {offsets = [0, 256], sizes = [8, 128], strides = [1, 1]} : vector<8x512xf32> to vector<8x128xf32>
    %335 = math.tanh %334 : vector<8x128xf32>
    %336 = vector.extract_strided_slice %321 {offsets = [0, 384], sizes = [8, 128], strides = [1, 1]} : vector<8x512xf32> to vector<8x128xf32>
    %337 = arith.negf %336 : vector<8x128xf32>
    %338 = math.exp %337 : vector<8x128xf32>
    %cst_161 = arith.constant 1.000000e+00 : f32
    %339 = vector.broadcast %cst_161 : f32 to vector<8x128xf32>
    %340 = arith.addf %339, %338 : vector<8x128xf32>
    %341 = arith.divf %339, %340 : vector<8x128xf32>
    %c1_162 = arith.constant 1 : index
    %c0_163 = arith.constant 0 : index
    %c0_164 = arith.constant 0 : index
    %342 = vector.load %arg7[%c1_162, %c0_163, %c0_164] : memref<2x8x128xf32, #tpu.memory_space<vmem>>, vector<1x8x128xf32>
    %343 = vector.shape_cast %342 : vector<1x8x128xf32> to vector<8x128xf32>
    %344 = arith.mulf %333, %343 : vector<8x128xf32>
    %345 = arith.mulf %327, %335 : vector<8x128xf32>
    %346 = arith.addf %344, %345 : vector<8x128xf32>
    %347 = math.tanh %346 : vector<8x128xf32>
    %348 = arith.mulf %341, %347 : vector<8x128xf32>
    %c1_165 = arith.constant 1 : index
    %c0_166 = arith.constant 0 : index
    %c0_167 = arith.constant 0 : index
    %349 = vector.load %arg7[%c1_165, %c0_166, %c0_167] : memref<2x8x128xf32, #tpu.memory_space<vmem>>, vector<1x8x128xf32>
    %350 = vector.shape_cast %349 : vector<1x8x128xf32> to vector<8x128xf32>
    %351 = vector.shape_cast %346 : vector<8x128xf32> to vector<1x8x128xf32>
    tpu.vector_store %arg7[%c1_165, %c0_166, %c0_167], %351 {strides = array<i32>} : memref<2x8x128xf32, #tpu.memory_space<vmem>>, vector<1x8x128xf32>,
    %c1_168 = arith.constant 1 : index
    %c0_169 = arith.constant 0 : index
    %c0_170 = arith.constant 0 : index
    %352 = vector.load %arg6[%c1_168, %c0_169, %c0_170] : memref<2x8x128xf32, #tpu.memory_space<vmem>>, vector<1x8x128xf32>
    %353 = vector.shape_cast %352 : vector<1x8x128xf32> to vector<8x128xf32>
    %354 = vector.shape_cast %348 : vector<8x128xf32> to vector<1x8x128xf32>
    tpu.vector_store %arg6[%c1_168, %c0_169, %c0_170], %354 {strides = array<i32>} : memref<2x8x128xf32, #tpu.memory_space<vmem>>, vector<1x8x128xf32>,
    %355 = arith.index_cast %c3_i32 : i32 to index
    %c0_171 = arith.constant 0 : index
    %c0_172 = arith.constant 0 : index
    %356 = vector.load %arg5[%355, %c0_171, %c0_172] : memref<4x8x128xf32, #tpu.memory_space<vmem>>, vector<1x8x128xf32>
    %357 = vector.shape_cast %356 : vector<1x8x128xf32> to vector<8x128xf32>
    %358 = vector.shape_cast %348 : vector<8x128xf32> to vector<1x8x128xf32>
    tpu.vector_store %arg5[%355, %c0_171, %c0_172], %358 {strides = array<i32>} : memref<4x8x128xf32, #tpu.memory_space<vmem>>, vector<1x8x128xf32>,
    %c4_i32 = arith.constant 4 : i32
    return
  }
  func.func @transform_0(%arg0: i32, %arg1: i32) -> (i32, i32, i32) {
    %c0_i32 = arith.constant 0 : i32
    %c0_i32_0 = arith.constant 0 : i32
    return %arg1, %arg0, %c0_i32 : i32, i32, i32
  }
  func.func @transform_1(%arg0: i32, %arg1: i32) -> (i32, i32, i32) {
    %c0_i32 = arith.constant 0 : i32
    %c0_i32_0 = arith.constant 0 : i32
    %c0_i32_1 = arith.constant 0 : i32
    %c0_i32_2 = arith.constant 0 : i32
    return %c0_i32, %c0_i32_0, %c0_i32_1 : i32, i32, i32
  }
  func.func @transform_2(%arg0: i32, %arg1: i32) -> (i32, i32, i32) {
    %c0_i32 = arith.constant 0 : i32
    %c0_i32_0 = arith.constant 0 : i32
    %c0_i32_1 = arith.constant 0 : i32
    %c0_i32_2 = arith.constant 0 : i32
    return %c0_i32, %c0_i32_0, %c0_i32_1 : i32, i32, i32
  }
  func.func @transform_3(%arg0: i32, %arg1: i32) -> (i32, i32, i32) {
    %c0_i32 = arith.constant 0 : i32
    %c0_i32_0 = arith.constant 0 : i32
    return %arg1, %arg0, %c0_i32 : i32, i32, i32
  }
}

</mosaic_0001>

<bundles_post_ra>
// kernel: lstm_model_forward.3
= control target key start
LH: loop header
LB: loop body
LE: loop exit
PB: predicated region body
PF: predicated region fallthrough
CT: control target
= control target key end

     0   :  { %v248_v3 = vmov 0.0   ;;  %v56_v57 = vlaneseq  ;;  %s448_s1 = inlined_call_operand.vmem [shape: f32[128,256], index: 1, kind: input, shape index: {}]   ;;  %s449_s0 = inlined_call_operand.vmem [shape: f32[64,128], index: 0, kind: input, shape index: {}]   ;;  %s450_s2 = inlined_call_operand.vmem [shape: f32[1,256], index: 2, kind: input, shape index: {}]   ;;  %s451_s3 = inlined_call_operand.vmem [shape: f32[64,256], index: 3, kind: output, shape index: {}]  }
   0x1   :  { %v23_v0 = vld [vmem:[%s448_s1 + $0x8] sm:$0xff]  ;;  %v25_v1 = vld [vmem:[%s448_s1 + $0x18] sm:$0xff]  ;;  %v22_v2 = vld [vmem:[%s448_s1] sm:$0xff]  ;;  %130 = vmatprep.mubr.f32.mxu0 %v248_v3  ;;  %154 = vmatprep.mubr.f32.mxu1 %v248_v3 }
   0x2   :  { %v199_v4 = vpack.c.bf16 %v25_v1, %v23_v0  ;;  %v24_v5 = vld [vmem:[%s448_s1 + $0x10] sm:$0xff]  ;;  %v27_v6 = vld [vmem:[%s448_s1 + $0x28] sm:$0xff]  ;;  %v29_v7 = vld [vmem:[%s448_s1 + $0x38] sm:$0xff]  ;;  %v57_v58 = vshrl.u32 %v56_v57, 7 }
   0x3   :  { %v201_v8 = vpack.c.bf16 %v24_v5, %v22_v2  ;;  %v203_v9 = vpack.c.bf16 %v29_v7, %v27_v6  ;;  %v26_v10 = vld [vmem:[%s448_s1 + $0x20] sm:$0xff]  ;;  %v28_v11 = vld [vmem:[%s448_s1 + $0x30] sm:$0xff]  ;;  %v31_v12 = vld [vmem:[%s448_s1 + $0x48] sm:$0xff] }
   0x4   :  { %200 = vmatprep.subr.bf16.mxu0 %v199_v4  ;;  %231 = vmatprep.subr.bf16.mxu1 %v199_v4  ;;  %v33_v13 = vld [vmem:[%s448_s1 + $0x58] sm:$0xff]  ;;  %v205_v14 = vpack.c.bf16 %v28_v11, %v26_v10  ;;  %v30_v16 = vld [vmem:[%s448_s1 + $0x40] sm:$0xff]  ;;  %v32_v17 = vld [vmem:[%s448_s1 + $0x50] sm:$0xff]  ;;  %v58_v59 = vsub.s32 0, %v57_v58  ;;  %v62_v61 = vsub.s32 1, %v57_v58 }
   0x5   :  { %202 = vmatpush1.bf16.msra.mxu0 %v201_v8  ;;  %239 = vmatpush1.bf16.msra.mxu1 %v201_v8  ;;  %v207_v15 = vpack.c.bf16 %v33_v13, %v31_v12  ;;  %v35_v18 = vld [vmem:[%s448_s1 + $0x68] sm:$0xff]  ;;  %v37_v19 = vld [vmem:[%s448_s1 + $0x78] sm:$0xff]  ;;  %v209_v20 = vpack.c.bf16 %v32_v17, %v30_v16  ;;  %v34_v22 = vld [vmem:[%s448_s1 + $0x60] sm:$0xff] }
   0x6   :  { %204 = vmatprep.subr.bf16.mxu0 %v203_v9  ;;  %232 = vmatprep.subr.bf16.mxu1 %v203_v9  ;;  %v211_v21 = vpack.c.bf16 %v37_v19, %v35_v18  ;;  %v36_v23 = vld [vmem:[%s448_s1 + $0x70] sm:$0xff]  ;;  %v39_v24 = vld [vmem:[%s448_s1 + $0x88] sm:$0xff]  ;;  %v41_v25 = vld [vmem:[%s448_s1 + $0x98] sm:$0xff] }
   0x7   :  { %v213_v26 = vpack.c.bf16 %v36_v23, %v34_v22  ;;  %v215_v27 = vpack.c.bf16 %v41_v25, %v39_v24  ;;  %v38_v28 = vld [vmem:[%s448_s1 + $0x80] sm:$0xff]  ;;  %v40_v29 = vld [vmem:[%s448_s1 + $0x90] sm:$0xff]  ;;  %v43_v30 = vld [vmem:[%s448_s1 + $0xa8] sm:$0xff] }
   0x8   :  { %v45_v31 = vld [vmem:[%s448_s1 + $0xb8] sm:$0xff]  ;;  %v217_v32 = vpack.c.bf16 %v40_v29, %v38_v28  ;;  %v42_v34 = vld [vmem:[%s448_s1 + $0xa0] sm:$0xff]  ;;  %v44_v35 = vld [vmem:[%s448_s1 + $0xb0] sm:$0xff] }
   0x9   :  { %206 = vmatpush1.bf16.msra.mxu0 %v205_v14  ;;  %240 = vmatpush1.bf16.msra.mxu1 %v205_v14  ;;  %v219_v33 = vpack.c.bf16 %v45_v31, %v43_v30  ;;  %v47_v36 = vld [vmem:[%s448_s1 + $0xc8] sm:$0xff]  ;;  %v49_v37 = vld [vmem:[%s448_s1 + $0xd8] sm:$0xff]  ;;  %v221_v38 = vpack.c.bf16 %v44_v35, %v42_v34  ;;  %v46_v40 = vld [vmem:[%s448_s1 + $0xc0] sm:$0xff] }
   0xa   :  { %208 = vmatprep.subr.bf16.mxu0 %v207_v15  ;;  %233 = vmatprep.subr.bf16.mxu1 %v207_v15  ;;  %v223_v39 = vpack.c.bf16 %v49_v37, %v47_v36  ;;  %v48_v41 = vld [vmem:[%s448_s1 + $0xd0] sm:$0xff]  ;;  %v51_v42 = vld [vmem:[%s448_s1 + $0xe8] sm:$0xff]  ;;  %v53_v43 = vld [vmem:[%s448_s1 + $0xf8] sm:$0xff] }
   0xb   :  { %v225_v44 = vpack.c.bf16 %v48_v41, %v46_v40  ;;  %v227_v45 = vpack.c.bf16 %v53_v43, %v51_v42  ;;  %v50_v46 = vld [vmem:[%s448_s1 + $0xe0] sm:$0xff]  ;;  %v52_v47 = vld [vmem:[%s448_s1 + $0xf0] sm:$0xff]  ;;  %v15_v51 = vld [vmem:[%s449_s0 + $0x8] sm:$0xff] }
   0xc   :  { %v229_v48 = vpack.c.bf16 %v52_v47, %v50_v46  ;;  %v14_v49 = vld [vmem:[%s449_s0] sm:$0xff]  ;;  %v19_v52 = vld [vmem:[%s449_s0 + $0x28] sm:$0xff]  ;;  %v16_v53 = vld [vmem:[%s449_s0 + $0x10] sm:$0xff] }
   0xd   :  { %210 = vmatpush1.bf16.msra.mxu0 %v209_v20  ;;  %241 = vmatpush1.bf16.msra.mxu1 %v209_v20  ;;  %v18_v50 = vld [vmem:[%s449_s0 + $0x20] sm:$0xff]  ;;  %v20_v54 = vld [vmem:[%s449_s0 + $0x30] sm:$0xff]  ;;  %v17_v55 = vld [vmem:[%s449_s0 + $0x18] sm:$0xff] }
   0xe   :  { %212 = vmatprep.subr.bf16.mxu0 %v211_v21  ;;  %234 = vmatprep.subr.bf16.mxu1 %v211_v21  ;;  %v21_v56 = vld [vmem:[%s449_s0 + $0x38] sm:$0xff]  ;;  %v54_v60 = vld [vmem:[%s450_s2] sm:$0x3] }
   0xf   :  { %v59_v62 = vrot.slane %v54_v60, %v58_v59  ;;  %v63_v63 = vrot.slane %v54_v60, %v62_v61 }
  0x11   :  { %214 = vmatpush1.bf16.msra.mxu0 %v213_v26  ;;  %242 = vmatpush1.bf16.msra.mxu1 %v213_v26 }
  0x12   :  { %216 = vmatprep.subr.bf16.mxu0 %v215_v27  ;;  %235 = vmatprep.subr.bf16.mxu1 %v215_v27 }
  0x15   :  { %218 = vmatpush1.bf16.msra.mxu0 %v217_v32  ;;  %243 = vmatpush1.bf16.msra.mxu1 %v217_v32 }
  0x16   :  { %220 = vmatprep.subr.bf16.mxu0 %v219_v33  ;;  %236 = vmatprep.subr.bf16.mxu1 %v219_v33 }
  0x19   :  { %222 = vmatpush1.bf16.msra.mxu0 %v221_v38  ;;  %244 = vmatpush1.bf16.msra.mxu1 %v221_v38 }
  0x1a   :  { %224 = vmatprep.subr.bf16.mxu0 %v223_v39  ;;  %237 = vmatprep.subr.bf16.mxu1 %v223_v39 }
  0x1d   :  { %226 = vmatpush1.bf16.msra.mxu0 %v225_v44  ;;  %245 = vmatpush1.bf16.msra.mxu1 %v225_v44 }
  0x1e   :  { %228 = vmatprep.subr.bf16.mxu0 %v227_v45  ;;  %238 = vmatprep.subr.bf16.mxu1 %v227_v45 }
  0x21   :  { %230 = vmatpush1.bf16.msra.mxu0 %v229_v48  ;;  %246 = vmatpush1.bf16.msra.mxu1 %v229_v48 }
  0x24   :  { %131 = vmatmul.mubr.f32.vlgmr.msra.gmra.mrb[0].mxu0 %v14_v49  ;;  %155 = vmatmul.mubr.f32.vlgmr.msra.gmra.mrb[0].mxu1 %v18_v50 }
  0x25   :  { %136 = vmatprep.mubr.f32.mxu0 %v248_v3  ;;  %160 = vmatprep.mubr.f32.mxu1 %v248_v3 }
  0x28   :  { %137 = vmatmul.mubr.f32.gmra.mrb[2].mxu0 %v15_v51  ;;  %161 = vmatmul.mubr.f32.gmra.mrb[2].mxu1 %v19_v52 }
  0x29   :  { %142 = vmatprep.mubr.f32.mxu0 %v248_v3  ;;  %166 = vmatprep.mubr.f32.mxu1 %v248_v3 }
  0x2c   :  { %143 = vmatmul.mubr.f32.gmra.mrb[4].mxu0 %v16_v53  ;;  %167 = vmatmul.mubr.f32.gmra.mrb[4].mxu1 %v20_v54 }
  0x2d   :  { %148 = vmatprep.mubr.f32.mxu0 %v248_v3  ;;  %172 = vmatprep.mubr.f32.mxu1 %v248_v3 }
  0x30   :  { %149 = vmatmul.mubr.f32.gmra.mrb[6].mxu0 %v17_v55  ;;  %173 = vmatmul.mubr.f32.gmra.mrb[6].mxu1 %v21_v56 }
  0xf7   :  { %v132_v0 = vpop.f32.mrb[0].mxu0  ;;  %v156_v1 = vpop.f32.mrb[0].mxu1 }
  0xf8   :  { %v133_v2 = vadd.f32 %v132_v0, %v59_v62  ;;  %v157_v3 = vadd.f32 %v156_v1, %v59_v62  ;;  %v134_v4 = vpop.f32.mrb[1].mxu0  ;;  %v158_v5 = vpop.f32.mrb[1].mxu1 }
  0xf9   :  { %v135_v6 = vadd.f32 %v134_v4, %v63_v63  ;;  %v159_v7 = vadd.f32 %v158_v5, %v63_v63 }
  0xfa   :  { %179 = vst [vmem:[%s451_s3] sm:$0xff] %v133_v2  ;;  %187 = vst [vmem:[%s451_s3 + $0x40] sm:$0xff] %v157_v3 }
  0xfb   :  { %180 = vst [vmem:[%s451_s3 + $0x8] sm:$0xff] %v135_v6  ;;  %188 = vst [vmem:[%s451_s3 + $0x48] sm:$0xff] %v159_v7  ;;  %v138_v8 = vpop.f32.mrb[2].mxu0  ;;  %v162_v9 = vpop.f32.mrb[2].mxu1 }
  0xfc   :  { %v139_v10 = vadd.f32 %v138_v8, %v59_v62  ;;  %v163_v11 = vadd.f32 %v162_v9, %v59_v62  ;;  %v140_v12 = vpop.f32.mrb[3].mxu0  ;;  %v164_v13 = vpop.f32.mrb[3].mxu1 }
  0xfd   :  { %v141_v14 = vadd.f32 %v140_v12, %v63_v63  ;;  %v165_v15 = vadd.f32 %v164_v13, %v63_v63 }
  0xfe   :  { %181 = vst [vmem:[%s451_s3 + $0x10] sm:$0xff] %v139_v10  ;;  %189 = vst [vmem:[%s451_s3 + $0x50] sm:$0xff] %v163_v11 }
  0xff   :  { %182 = vst [vmem:[%s451_s3 + $0x18] sm:$0xff] %v141_v14  ;;  %190 = vst [vmem:[%s451_s3 + $0x58] sm:$0xff] %v165_v15  ;;  %v144_v16 = vpop.f32.mrb[4].mxu0  ;;  %v168_v17 = vpop.f32.mrb[4].mxu1 }
 0x100   :  { %v145_v18 = vadd.f32 %v144_v16, %v59_v62  ;;  %v169_v19 = vadd.f32 %v168_v17, %v59_v62  ;;  %v146_v20 = vpop.f32.mrb[5].mxu0  ;;  %v170_v21 = vpop.f32.mrb[5].mxu1 }
 0x101   :  { %v147_v22 = vadd.f32 %v146_v20, %v63_v63  ;;  %v171_v23 = vadd.f32 %v170_v21, %v63_v63 }
 0x102   :  { %183 = vst [vmem:[%s451_s3 + $0x20] sm:$0xff] %v145_v18  ;;  %191 = vst [vmem:[%s451_s3 + $0x60] sm:$0xff] %v169_v19 }
 0x103   :  { %184 = vst [vmem:[%s451_s3 + $0x28] sm:$0xff] %v147_v22  ;;  %192 = vst [vmem:[%s451_s3 + $0x68] sm:$0xff] %v171_v23  ;;  %v150_v24 = vpop.f32.mrb[6].mxu0  ;;  %v174_v25 = vpop.f32.mrb[6].mxu1 }
 0x104   :  { %v151_v26 = vadd.f32 %v150_v24, %v59_v62  ;;  %v175_v27 = vadd.f32 %v174_v25, %v59_v62  ;;  %v152_v28 = vpop.f32.mrb[7].mxu0  ;;  %v176_v29 = vpop.f32.mrb[7].mxu1 }
 0x105   :  { %v153_v30 = vadd.f32 %v152_v28, %v63_v63  ;;  %v177_v31 = vadd.f32 %v176_v29, %v63_v63 }
 0x106   :  { %185 = vst [vmem:[%s451_s3 + $0x30] sm:$0xff] %v151_v26  ;;  %193 = vst [vmem:[%s451_s3 + $0x70] sm:$0xff] %v175_v27 }
 0x107   :  { %186 = vst [vmem:[%s451_s3 + $0x38] sm:$0xff] %v153_v30  ;;  %194 = vst [vmem:[%s451_s3 + $0x78] sm:$0xff] %v177_v31 }

// kernel: lstm_model_forward.2
= control target key start
LH: loop header
LB: loop body
LE: loop exit
PB: predicated region body
PF: predicated region fallthrough
CT: control target
= control target key end

     0   :  { %s4514_s12 = smov 0   ;;  %s4516_s13 = smov 0   ;;  %s7711_s0 = inlined_call_operand.vmem [shape: f32[8,8,128], index: 0, kind: input, shape index: {}]   ;;  %s7712_s1 = inlined_call_operand.vmem [shape: f32[2,256,512], index: 1, kind: input, shape index: {}]   ;;  %s7713_s2 = inlined_call_operand.vmem [shape: f32[2,1,512], index: 2, kind: input, shape index: {}]   ;;  %s7714_s3 = inlined_call_operand.vmem [shape: f32[8,8,128], index: 3, kind: output, shape index: {}]  }
   0x1   :  { %s4518_s14 = smov 0  }
   0x2 LB: > { %s22_s15 = sadd.s32 1, %s4487_s13  ;;  %p2741_p0 = scmp.ge.s32.totalorder %s4491_s14, 1  ;;  %s4491_s14 = sphi %s4518_s14, %s13_s14   ;;  %s4487_s13 = sphi %s4516_s13, %s7716_s13   ;;  %s4483_s12 = sphi %s4514_s12, %s7715_s12  }
   0x3   : > { %p23_p1 = scmp.ge.s32.totalorder %s22_s15, 2  ;;  %p157_p2 = scmp.lt.s32.totalorder %s4491_s14, 3 }
   0x5   : > { %s7718_s15 = smov (%p23_p1, %s22_s15), 0  ;;  %p158_p3 = pnand %p2741_p0, %p157_p2 }
   0x6   : > { %s2742_s16 = sshll.u32 (!%p158_p3), %s4483_s12, 2  ;;  %p2746_p5 = scmp.ne.s32.totalorder (!%p158_p3), %s4483_s12, 0 }
   0x7   : > { %161 = sbr.rel (%p158_p3) target bundleno = 1572 (0x624), region = 32  ;;  %p188_p4 = scmp.lt.s32.totalorder (!%p158_p3), %s2742_s16, 7 }
   0xe   : > { %s7720_s16 = smov (!%p188_p4, %s2742_s16), 7  ;;  %208 = sbr.rel (%p2746_p5) target bundleno = 21 (0x15), region = 36 }
   0xf   : > { %s2743_s17 = sshll.u32 %s7720_s16, 3  ;;  %v4493_v0 = vmov (!%p2746_p5), 0.0  }
  0x10   : > { %s4535_s20 = scalar_lea.vmem %s7711_s0, %s2743_s17  ;;  %s4540_s23 = scalar_lea.vmem %s7714_s3, %s2743_s17  ;;  %209 = vst [vmem:[#allocation2] sm:$0xff] (!%p2746_p5), %v4493_v0  ;;  %210 = vst [vmem:[#allocation2 + $0x8] sm:$0xff] (!%p2746_p5), %v4493_v0 }
  0x11   : > { %211 = vst [vmem:[#allocation3] sm:$0xff] (!%p2746_p5), %v4493_v0  ;;  %212 = vst [vmem:[#allocation3 + $0x8] sm:$0xff] (!%p2746_p5), %v4493_v0 }
  0x15 PF: > { %v260_v1 = vld [vmem:[%s7712_s1 + $0x8] sm:$0xff]  ;;  %v259_v3 = vld [vmem:[%s7712_s1] sm:$0xff]  ;;  %v262_v19 = vld [vmem:[%s7712_s1 + $0x18] sm:$0xff] }
  0x16   : > { %v264_v2 = vld [vmem:[%s7712_s1 + $0x28] sm:$0xff]  ;;  %v263_v5 = vld [vmem:[%s7712_s1 + $0x20] sm:$0xff]  ;;  %v266_v20 = vld [vmem:[%s7712_s1 + $0x38] sm:$0xff] }
  0x17   : > { %v3292_v4 = vpack.c.bf16 %v264_v2, %v260_v1  ;;  %v268_v6 = vld [vmem:[%s7712_s1 + $0x48] sm:$0xff]  ;;  %v3294_v8 = vpack.c.bf16 %v263_v5, %v259_v3  ;;  %v267_v10 = vld [vmem:[%s7712_s1 + $0x40] sm:$0xff]  ;;  %v3356_v22 = vpack.c.bf16 %v266_v20, %v262_v19  ;;  %v261_v23 = vld [vmem:[%s7712_s1 + $0x10] sm:$0xff] }
  0x18   : > { %v272_v7 = vld [vmem:[%s7712_s1 + $0x68] sm:$0xff]  ;;  %v271_v11 = vld [vmem:[%s7712_s1 + $0x60] sm:$0xff]  ;;  %v265_v24 = vld [vmem:[%s7712_s1 + $0x30] sm:$0xff] }
  0x19   : > { %v3296_v9 = vpack.c.bf16 %v272_v7, %v268_v6  ;;  %v276_v12 = vld [vmem:[%s7712_s1 + $0x88] sm:$0xff]  ;;  %3293 = vmatprep.subr.bf16.mxu0 %v3292_v4  ;;  %v3298_v14 = vpack.c.bf16 %v271_v11, %v267_v10  ;;  %v275_v15 = vld [vmem:[%s7712_s1 + $0x80] sm:$0xff]  ;;  %v3358_v25 = vpack.c.bf16 %v265_v24, %v261_v23  ;;  %3357 = vmatprep.subr.bf16.mxu1 %v3356_v22  ;;  %v270_v27 = vld [vmem:[%s7712_s1 + $0x58] sm:$0xff] }
  0x1a   : > { %v280_v13 = vld [vmem:[%s7712_s1 + $0xa8] sm:$0xff]  ;;  %3295 = vmatpush1.bf16.msra.mxu0 %v3294_v8  ;;  %v279_v16 = vld [vmem:[%s7712_s1 + $0xa0] sm:$0xff]  ;;  %v274_v28 = vld [vmem:[%s7712_s1 + $0x78] sm:$0xff] }
  0x1b   : > { %3297 = vmatprep.subr.bf16.mxu0 %v3296_v9  ;;  %v3300_v17 = vpack.c.bf16 %v280_v13, %v276_v12  ;;  %v284_v18 = vld [vmem:[%s7712_s1 + $0xc8] sm:$0xff]  ;;  %v3302_v26 = vpack.c.bf16 %v279_v16, %v275_v15  ;;  %v269_v29 = vld [vmem:[%s7712_s1 + $0x50] sm:$0xff]  ;;  %v283_v31 = vld [vmem:[%s7712_s1 + $0xc0] sm:$0xff]  ;;  %3359 = vmatpush1.bf16.msra.mxu1 %v3358_v25  ;;  %v3360_v33 = vpack.c.bf16 %v274_v28, %v270_v27 }
  0x1c   : > { %v288_v21 = vld [vmem:[%s7712_s1 + $0xe8] sm:$0xff]  ;;  %v287_v32 = vld [vmem:[%s7712_s1 + $0xe0] sm:$0xff]  ;;  %v273_v34 = vld [vmem:[%s7712_s1 + $0x70] sm:$0xff] }
  0x1d   : > { %v3304_v30 = vpack.c.bf16 %v288_v21, %v284_v18  ;;  %v292_v35 = vld [vmem:[%s7712_s1 + $0x108] sm:$0xff]  ;;  %v3362_v37 = vpack.c.bf16 %v273_v34, %v269_v29  ;;  %v278_v38 = vld [vmem:[%s7712_s1 + $0x98] sm:$0xff]  ;;  %3361 = vmatprep.subr.bf16.mxu1 %v3360_v33  ;;  %v277_v40 = vld [vmem:[%s7712_s1 + $0x90] sm:$0xff]  ;;  %v3306_v42 = vpack.c.bf16 %v287_v32, %v283_v31 }
  0x1e   : > { %3299 = vmatpush1.bf16.msra.mxu0 %v3298_v14  ;;  %v296_v36 = vld [vmem:[%s7712_s1 + $0x128] sm:$0xff]  ;;  %v282_v39 = vld [vmem:[%s7712_s1 + $0xb8] sm:$0xff]  ;;  %v281_v41 = vld [vmem:[%s7712_s1 + $0xb0] sm:$0xff] }
  0x1f   : > { %3301 = vmatprep.subr.bf16.mxu0 %v3300_v17  ;;  %v291_v43 = vld [vmem:[%s7712_s1 + $0x100] sm:$0xff]  ;;  %v3364_v45 = vpack.c.bf16 %v282_v39, %v278_v38  ;;  %v3308_v46 = vpack.c.bf16 %v296_v36, %v292_v35  ;;  %3363 = vmatpush1.bf16.msra.mxu1 %v3362_v37  ;;  %v300_v47 = vld [vmem:[%s7712_s1 + $0x148] sm:$0xff]  ;;  %v3366_v48 = vpack.c.bf16 %v281_v41, %v277_v40  ;;  %v286_v49 = vld [vmem:[%s7712_s1 + $0xd8] sm:$0xff] }
  0x20   : > { %v295_v44 = vld [vmem:[%s7712_s1 + $0x120] sm:$0xff]  ;;  %v290_v50 = vld [vmem:[%s7712_s1 + $0xf8] sm:$0xff]  ;;  %v304_v51 = vld [vmem:[%s7712_s1 + $0x168] sm:$0xff] }
  0x21   : > { %3365 = vmatprep.subr.bf16.mxu1 %v3364_v45  ;;  %v3368_v52 = vpack.c.bf16 %v290_v50, %v286_v49  ;;  %v285_v53 = vld [vmem:[%s7712_s1 + $0xd0] sm:$0xff]  ;;  %v3310_v55 = vpack.c.bf16 %v295_v44, %v291_v43  ;;  %v294_v56 = vld [vmem:[%s7712_s1 + $0x118] sm:$0xff]  ;;  %v3312_v58 = vpack.c.bf16 %v304_v51, %v300_v47  ;;  %v299_v59 = vld [vmem:[%s7712_s1 + $0x140] sm:$0xff] }
  0x22   : > { %3303 = vmatpush1.bf16.msra.mxu0 %v3302_v26  ;;  %v289_v54 = vld [vmem:[%s7712_s1 + $0xf0] sm:$0xff]  ;;  %v298_v57 = vld [vmem:[%s7712_s1 + $0x138] sm:$0xff]  ;;  %v303_v60 = vld [vmem:[%s7712_s1 + $0x160] sm:$0xff] }
  0x23   : > { %3305 = vmatprep.subr.bf16.mxu0 %v3304_v30  ;;  %3367 = vmatpush1.bf16.msra.mxu1 %v3366_v48  ;;  %v308_v61 = vld [vmem:[%s7712_s1 + $0x188] sm:$0xff]  ;;  %v3370_v62 = vpack.c.bf16 %v289_v54, %v285_v53  ;;  %v3372_v0 = vpack.c.bf16 %v298_v57, %v294_v56  ;;  %v293_v1 = vld [vmem:[%s7712_s1 + $0x110] sm:$0xff]  ;;  %v302_v3 = vld [vmem:[%s7712_s1 + $0x158] sm:$0xff]  ;;  %v3314_v5 = vpack.c.bf16 %v303_v60, %v299_v59 }
  0x24   : > { %v312_v63 = vld [vmem:[%s7712_s1 + $0x1a8] sm:$0xff]  ;;  %3369 = vmatprep.subr.bf16.mxu1 %v3368_v52  ;;  %v297_v2 = vld [vmem:[%s7712_s1 + $0x130] sm:$0xff]  ;;  %v306_v4 = vld [vmem:[%s7712_s1 + $0x178] sm:$0xff] }
  0x25   : > { %v3316_v6 = vpack.c.bf16 %v312_v63, %v308_v61  ;;  %v307_v7 = vld [vmem:[%s7712_s1 + $0x180] sm:$0xff]  ;;  %v316_v9 = vld [vmem:[%s7712_s1 + $0x1c8] sm:$0xff]  ;;  %v3374_v10 = vpack.c.bf16 %v297_v2, %v293_v1  ;;  %v3376_v12 = vpack.c.bf16 %v306_v4, %v302_v3  ;;  %v301_v13 = vld [vmem:[%s7712_s1 + $0x150] sm:$0xff] }
  0x26   : > { %3307 = vmatpush1.bf16.msra.mxu0 %v3306_v42  ;;  %v311_v8 = vld [vmem:[%s7712_s1 + $0x1a0] sm:$0xff]  ;;  %v320_v11 = vld [vmem:[%s7712_s1 + $0x1e8] sm:$0xff]  ;;  %v305_v14 = vld [vmem:[%s7712_s1 + $0x170] sm:$0xff] }
  0x27   : > { %3309 = vmatprep.subr.bf16.mxu0 %v3308_v46  ;;  %3371 = vmatpush1.bf16.msra.mxu1 %v3370_v62  ;;  %v310_v15 = vld [vmem:[%s7712_s1 + $0x198] sm:$0xff]  ;;  %v3318_v17 = vpack.c.bf16 %v311_v8, %v307_v7  ;;  %v3320_v18 = vpack.c.bf16 %v320_v11, %v316_v9  ;;  %v315_v19 = vld [vmem:[%s7712_s1 + $0x1c0] sm:$0xff]  ;;  %v324_v21 = vld [vmem:[%s7712_s1 + $0x208] sm:$0xff]  ;;  %v3378_v22 = vpack.c.bf16 %v305_v14, %v301_v13 }
  0x28   : > { %3373 = vmatprep.subr.bf16.mxu1 %v3372_v0  ;;  %v314_v16 = vld [vmem:[%s7712_s1 + $0x1b8] sm:$0xff]  ;;  %v319_v20 = vld [vmem:[%s7712_s1 + $0x1e0] sm:$0xff]  ;;  %v328_v23 = vld [vmem:[%s7712_s1 + $0x228] sm:$0xff] }
  0x29   : > { %v3380_v24 = vpack.c.bf16 %v314_v16, %v310_v15  ;;  %v309_v25 = vld [vmem:[%s7712_s1 + $0x190] sm:$0xff]  ;;  %v318_v27 = vld [vmem:[%s7712_s1 + $0x1d8] sm:$0xff]  ;;  %v3322_v29 = vpack.c.bf16 %v319_v20, %v315_v19  ;;  %v3324_v30 = vpack.c.bf16 %v328_v23, %v324_v21  ;;  %v323_v31 = vld [vmem:[%s7712_s1 + $0x200] sm:$0xff] }
  0x2a   : > { %3311 = vmatpush1.bf16.msra.mxu0 %v3310_v55  ;;  %v313_v26 = vld [vmem:[%s7712_s1 + $0x1b0] sm:$0xff]  ;;  %v322_v28 = vld [vmem:[%s7712_s1 + $0x1f8] sm:$0xff]  ;;  %v327_v32 = vld [vmem:[%s7712_s1 + $0x220] sm:$0xff] }
  0x2b   : > { %3313 = vmatprep.subr.bf16.mxu0 %v3312_v58  ;;  %3375 = vmatpush1.bf16.msra.mxu1 %v3374_v10  ;;  %v332_v33 = vld [vmem:[%s7712_s1 + $0x248] sm:$0xff]  ;;  %v3382_v34 = vpack.c.bf16 %v313_v26, %v309_v25  ;;  %v3384_v36 = vpack.c.bf16 %v322_v28, %v318_v27  ;;  %v317_v37 = vld [vmem:[%s7712_s1 + $0x1d0] sm:$0xff]  ;;  %v326_v39 = vld [vmem:[%s7712_s1 + $0x218] sm:$0xff]  ;;  %v3326_v41 = vpack.c.bf16 %v327_v32, %v323_v31 }
  0x2c   : > { %3377 = vmatprep.subr.bf16.mxu1 %v3376_v12  ;;  %v336_v35 = vld [vmem:[%s7712_s1 + $0x268] sm:$0xff]  ;;  %v321_v38 = vld [vmem:[%s7712_s1 + $0x1f0] sm:$0xff]  ;;  %v330_v40 = vld [vmem:[%s7712_s1 + $0x238] sm:$0xff] }
  0x2d   : > { %v3328_v42 = vpack.c.bf16 %v336_v35, %v332_v33  ;;  %v331_v43 = vld [vmem:[%s7712_s1 + $0x240] sm:$0xff]  ;;  %v340_v45 = vld [vmem:[%s7712_s1 + $0x288] sm:$0xff]  ;;  %v3386_v46 = vpack.c.bf16 %v321_v38, %v317_v37  ;;  %v3388_v48 = vpack.c.bf16 %v330_v40, %v326_v39  ;;  %v325_v49 = vld [vmem:[%s7712_s1 + $0x210] sm:$0xff] }
  0x2e   : > { %3315 = vmatpush1.bf16.msra.mxu0 %v3314_v5  ;;  %v335_v44 = vld [vmem:[%s7712_s1 + $0x260] sm:$0xff]  ;;  %v344_v47 = vld [vmem:[%s7712_s1 + $0x2a8] sm:$0xff]  ;;  %v329_v50 = vld [vmem:[%s7712_s1 + $0x230] sm:$0xff] }
  0x2f   : > { %3317 = vmatprep.subr.bf16.mxu0 %v3316_v6  ;;  %3379 = vmatpush1.bf16.msra.mxu1 %v3378_v22  ;;  %v334_v51 = vld [vmem:[%s7712_s1 + $0x258] sm:$0xff]  ;;  %v3330_v53 = vpack.c.bf16 %v335_v44, %v331_v43  ;;  %v339_v54 = vld [vmem:[%s7712_s1 + $0x280] sm:$0xff]  ;;  %v3332_v55 = vpack.c.bf16 %v344_v47, %v340_v45  ;;  %v348_v57 = vld [vmem:[%s7712_s1 + $0x2c8] sm:$0xff]  ;;  %v3390_v59 = vpack.c.bf16 %v329_v50, %v325_v49 }
  0x30   : > { %3381 = vmatprep.subr.bf16.mxu1 %v3380_v24  ;;  %v338_v52 = vld [vmem:[%s7712_s1 + $0x278] sm:$0xff]  ;;  %v343_v56 = vld [vmem:[%s7712_s1 + $0x2a0] sm:$0xff]  ;;  %v352_v58 = vld [vmem:[%s7712_s1 + $0x2e8] sm:$0xff] }
  0x31   : > { %v3392_v60 = vpack.c.bf16 %v338_v52, %v334_v51  ;;  %v333_v61 = vld [vmem:[%s7712_s1 + $0x250] sm:$0xff]  ;;  %v387_v63 = vld [vmem:[#allocation2] sm:$0xff]  ;;  %v342_v0 = vld [vmem:[%s7712_s1 + $0x298] sm:$0xff]  ;;  %v3334_v2 = vpack.c.bf16 %v343_v56, %v339_v54  ;;  %v3336_v3 = vpack.c.bf16 %v352_v58, %v348_v57 }
  0x32   : > { %3319 = vmatpush1.bf16.msra.mxu0 %v3318_v17  ;;  %v337_v62 = vld [vmem:[%s7712_s1 + $0x270] sm:$0xff]  ;;  %v346_v1 = vld [vmem:[%s7712_s1 + $0x2b8] sm:$0xff]  ;;  %452 = vmatprep.mubr.f32.mxu0 %v387_v63  ;;  %v347_v4 = vld [vmem:[%s7712_s1 + $0x2c0] sm:$0xff] }
  0x33   : > { %3321 = vmatprep.subr.bf16.mxu0 %v3320_v18  ;;  %3383 = vmatpush1.bf16.msra.mxu1 %v3382_v34  ;;  %v351_v5 = vld [vmem:[%s7712_s1 + $0x2e0] sm:$0xff]  ;;  %v356_v6 = vld [vmem:[%s7712_s1 + $0x308] sm:$0xff]  ;;  %v3394_v7 = vpack.c.bf16 %v337_v62, %v333_v61  ;;  %v3396_v9 = vpack.c.bf16 %v346_v1, %v342_v0  ;;  %v341_v10 = vld [vmem:[%s7712_s1 + $0x290] sm:$0xff] }
  0x34   : > { %3385 = vmatprep.subr.bf16.mxu1 %v3384_v36  ;;  %523 = vmatprep.mubr.f32.mxu1 %v387_v63  ;;  %v360_v8 = vld [vmem:[%s7712_s1 + $0x328] sm:$0xff]  ;;  %v345_v11 = vld [vmem:[%s7712_s1 + $0x2b0] sm:$0xff]  ;;  %v350_v12 = vld [vmem:[%s7712_s1 + $0x2d8] sm:$0xff]  ;;  %v3338_v14 = vpack.c.bf16 %v351_v5, %v347_v4 }
  0x35   : > { %v354_v13 = vld [vmem:[%s7712_s1 + $0x2f8] sm:$0xff]  ;;  %v3340_v15 = vpack.c.bf16 %v360_v8, %v356_v6  ;;  %v355_v16 = vld [vmem:[%s7712_s1 + $0x300] sm:$0xff]  ;;  %v364_v18 = vld [vmem:[%s7712_s1 + $0x348] sm:$0xff]  ;;  %v3398_v19 = vpack.c.bf16 %v345_v11, %v341_v10 }
  0x36   : > { %3323 = vmatpush1.bf16.msra.mxu0 %v3322_v29  ;;  %v359_v17 = vld [vmem:[%s7712_s1 + $0x320] sm:$0xff]  ;;  %v368_v20 = vld [vmem:[%s7712_s1 + $0x368] sm:$0xff]  ;;  %v3400_v21 = vpack.c.bf16 %v354_v13, %v350_v12  ;;  %v349_v22 = vld [vmem:[%s7712_s1 + $0x2d0] sm:$0xff] }
  0x37   : > { %3325 = vmatprep.subr.bf16.mxu0 %v3324_v30  ;;  %3387 = vmatpush1.bf16.msra.mxu1 %v3386_v46  ;;  %v353_v23 = vld [vmem:[%s7712_s1 + $0x2f0] sm:$0xff]  ;;  %v358_v24 = vld [vmem:[%s7712_s1 + $0x318] sm:$0xff]  ;;  %v3342_v26 = vpack.c.bf16 %v359_v17, %v355_v16  ;;  %v3344_v27 = vpack.c.bf16 %v368_v20, %v364_v18  ;;  %v363_v28 = vld [vmem:[%s7712_s1 + $0x340] sm:$0xff] }
  0x38   : > { %3389 = vmatprep.subr.bf16.mxu1 %v3388_v48  ;;  %v362_v25 = vld [vmem:[%s7712_s1 + $0x338] sm:$0xff]  ;;  %v367_v29 = vld [vmem:[%s7712_s1 + $0x360] sm:$0xff]  ;;  %v372_v30 = vld [vmem:[%s7712_s1 + $0x388] sm:$0xff]  ;;  %v3402_v31 = vpack.c.bf16 %v353_v23, %v349_v22 }
  0x39   : > { %v376_v32 = vld [vmem:[%s7712_s1 + $0x3a8] sm:$0xff]  ;;  %v3404_v33 = vpack.c.bf16 %v362_v25, %v358_v24  ;;  %v357_v34 = vld [vmem:[%s7712_s1 + $0x310] sm:$0xff]  ;;  %v366_v36 = vld [vmem:[%s7712_s1 + $0x358] sm:$0xff]  ;;  %v3346_v38 = vpack.c.bf16 %v367_v29, %v363_v28 }
  0x3a   : > { %3327 = vmatpush1.bf16.msra.mxu0 %v3326_v41  ;;  %v361_v35 = vld [vmem:[%s7712_s1 + $0x330] sm:$0xff]  ;;  %v370_v37 = vld [vmem:[%s7712_s1 + $0x378] sm:$0xff]  ;;  %v3348_v39 = vpack.c.bf16 %v376_v32, %v372_v30  ;;  %v371_v40 = vld [vmem:[%s7712_s1 + $0x380] sm:$0xff] }
  0x3b   : > { %3329 = vmatprep.subr.bf16.mxu0 %v3328_v42  ;;  %3391 = vmatpush1.bf16.msra.mxu1 %v3390_v59  ;;  %v375_v41 = vld [vmem:[%s7712_s1 + $0x3a0] sm:$0xff]  ;;  %v380_v42 = vld [vmem:[%s7712_s1 + $0x3c8] sm:$0xff]  ;;  %v3406_v43 = vpack.c.bf16 %v361_v35, %v357_v34  ;;  %v3408_v45 = vpack.c.bf16 %v370_v37, %v366_v36  ;;  %v365_v46 = vld [vmem:[%s7712_s1 + $0x350] sm:$0xff] }
  0x3c   : > { %3393 = vmatprep.subr.bf16.mxu1 %v3392_v60  ;;  %v384_v44 = vld [vmem:[%s7712_s1 + $0x3e8] sm:$0xff]  ;;  %v369_v47 = vld [vmem:[%s7712_s1 + $0x370] sm:$0xff]  ;;  %v374_v48 = vld [vmem:[%s7712_s1 + $0x398] sm:$0xff]  ;;  %v3350_v50 = vpack.c.bf16 %v375_v41, %v371_v40 }
  0x3d   : > { %v378_v49 = vld [vmem:[%s7712_s1 + $0x3b8] sm:$0xff]  ;;  %v3352_v51 = vpack.c.bf16 %v384_v44, %v380_v42  ;;  %v379_v52 = vld [vmem:[%s7712_s1 + $0x3c0] sm:$0xff]  ;;  %v3410_v54 = vpack.c.bf16 %v369_v47, %v365_v46  ;;  %v377_v57 = vld [vmem:[%s7712_s1 + $0x3b0] sm:$0xff] }
  0x3e   : > { %3331 = vmatpush1.bf16.msra.mxu0 %v3330_v53  ;;  %v383_v53 = vld [vmem:[%s7712_s1 + $0x3e0] sm:$0xff]  ;;  %v3412_v56 = vpack.c.bf16 %v378_v49, %v374_v48  ;;  %v2752_v58 = vld [vmem:[%s7712_s1 + $0x408] sm:$0xff]  ;;  %v382_v60 = vld [vmem:[%s7712_s1 + $0x3d8] sm:$0xff] }
  0x3f   : > { %3333 = vmatprep.subr.bf16.mxu0 %v3332_v55  ;;  %3395 = vmatpush1.bf16.msra.mxu1 %v3394_v7  ;;  %v373_v55 = vld [vmem:[%s7712_s1 + $0x390] sm:$0xff]  ;;  %v2756_v59 = vld [vmem:[%s7712_s1 + $0x428] sm:$0xff]  ;;  %v386_v61 = vld [vmem:[%s7712_s1 + $0x3f8] sm:$0xff]  ;;  %v3354_v62 = vpack.c.bf16 %v383_v53, %v379_v52 }
  0x40   : > { %3397 = vmatprep.subr.bf16.mxu1 %v3396_v9  ;;  %v3414_v63 = vpack.c.bf16 %v377_v57, %v373_v55  ;;  %v381_v0 = vld [vmem:[%s7712_s1 + $0x3d0] sm:$0xff]  ;;  %v3420_v1 = vpack.c.bf16 %v2756_v59, %v2752_v58  ;;  %v3416_v4 = vpack.c.bf16 %v386_v61, %v382_v60  ;;  %v2760_v6 = vld [vmem:[%s7712_s1 + $0x448] sm:$0xff]  ;;  %v2754_v8 = vld [vmem:[%s7712_s1 + $0x418] sm:$0xff] }
  0x41   : > { %v385_v5 = vld [vmem:[%s7712_s1 + $0x3f0] sm:$0xff]  ;;  %v2764_v7 = vld [vmem:[%s7712_s1 + $0x468] sm:$0xff]  ;;  %v2758_v9 = vld [vmem:[%s7712_s1 + $0x438] sm:$0xff] }
  0x42   : > { %3335 = vmatpush1.bf16.msra.mxu0 %v3334_v2  ;;  %v2751_v2 = vld [vmem:[%s7712_s1 + $0x400] sm:$0xff]  ;;  %v3418_v12 = vpack.c.bf16 %v385_v5, %v381_v0  ;;  %v2753_v13 = vld [vmem:[%s7712_s1 + $0x410] sm:$0xff]  ;;  %v3484_v17 = vpack.c.bf16 %v2758_v9, %v2754_v8  ;;  %v2772_v20 = vld [vmem:[%s7712_s1 + $0x4a8] sm:$0xff] }
  0x43   : > { %3337 = vmatprep.subr.bf16.mxu0 %v3336_v3  ;;  %3399 = vmatpush1.bf16.msra.mxu1 %v3398_v19  ;;  %v2755_v3 = vld [vmem:[%s7712_s1 + $0x420] sm:$0xff]  ;;  %v2757_v18 = vld [vmem:[%s7712_s1 + $0x430] sm:$0xff]  ;;  %v2768_v19 = vld [vmem:[%s7712_s1 + $0x488] sm:$0xff] }
  0x44   : > { %3401 = vmatprep.subr.bf16.mxu1 %v3400_v21  ;;  %v258_v10 = vld [vmem:[%s4535_s20] sm:$0xff]  ;;  %v3422_v11 = vpack.c.bf16 %v2755_v3, %v2751_v2  ;;  %v2762_v21 = vld [vmem:[%s7712_s1 + $0x458] sm:$0xff]  ;;  %v3486_v24 = vpack.c.bf16 %v2757_v18, %v2753_v13  ;;  %v2761_v25 = vld [vmem:[%s7712_s1 + $0x450] sm:$0xff] }
  0x45   : > { %v2763_v16 = vld [vmem:[%s7712_s1 + $0x460] sm:$0xff]  ;;  %v2766_v22 = vld [vmem:[%s7712_s1 + $0x478] sm:$0xff]  ;;  %v2765_v30 = vld [vmem:[%s7712_s1 + $0x470] sm:$0xff] }
  0x46   : > { %3339 = vmatpush1.bf16.msra.mxu0 %v3338_v14  ;;  %v3424_v14 = vpack.c.bf16 %v2764_v7, %v2760_v6  ;;  %v2771_v28 = vld [vmem:[%s7712_s1 + $0x4a0] sm:$0xff]  ;;  %v3488_v29 = vpack.c.bf16 %v2766_v22, %v2762_v21  ;;  %v2780_v32 = vld [vmem:[%s7712_s1 + $0x4e8] sm:$0xff]  ;;  %v2774_v34 = vld [vmem:[%s7712_s1 + $0x4b8] sm:$0xff]  ;;  %v3490_v36 = vpack.c.bf16 %v2765_v30, %v2761_v25 }
  0x47   : > { %3341 = vmatprep.subr.bf16.mxu0 %v3340_v15  ;;  %3403 = vmatpush1.bf16.msra.mxu1 %v3402_v31  ;;  %v2759_v15 = vld [vmem:[%s7712_s1 + $0x440] sm:$0xff]  ;;  %v2776_v31 = vld [vmem:[%s7712_s1 + $0x4c8] sm:$0xff]  ;;  %v2769_v37 = vld [vmem:[%s7712_s1 + $0x490] sm:$0xff] }
  0x48   : > { %3405 = vmatprep.subr.bf16.mxu1 %v3404_v33  ;;  %v3426_v23 = vpack.c.bf16 %v2763_v16, %v2759_v15  ;;  %v2770_v33 = vld [vmem:[%s7712_s1 + $0x498] sm:$0xff]  ;;  %v2779_v40 = vld [vmem:[%s7712_s1 + $0x4e0] sm:$0xff]  ;;  %v2773_v42 = vld [vmem:[%s7712_s1 + $0x4b0] sm:$0xff] }
  0x49   : > { %v3492_v41 = vpack.c.bf16 %v2774_v34, %v2770_v33  ;;  %v2788_v44 = vld [vmem:[%s7712_s1 + $0x528] sm:$0xff]  ;;  %v2782_v46 = vld [vmem:[%s7712_s1 + $0x4f8] sm:$0xff]  ;;  %v3494_v48 = vpack.c.bf16 %v2773_v42, %v2769_v37  ;;  %v2777_v53 = vld [vmem:[%s7712_s1 + $0x4d0] sm:$0xff] }
  0x4a   : > { %3343 = vmatpush1.bf16.msra.mxu0 %v3342_v26  ;;  %v3428_v26 = vpack.c.bf16 %v2772_v20, %v2768_v19  ;;  %v2786_v55 = vld [vmem:[%s7712_s1 + $0x518] sm:$0xff]  ;;  %v2785_v60 = vld [vmem:[%s7712_s1 + $0x510] sm:$0xff]  ;;  %v2796_v0 = vld [vmem:[%s7712_s1 + $0x568] sm:$0xff] }
  0x4b   : > { %3345 = vmatprep.subr.bf16.mxu0 %v3344_v27  ;;  %3407 = vmatpush1.bf16.msra.mxu1 %v3406_v43  ;;  %v2767_v27 = vld [vmem:[%s7712_s1 + $0x480] sm:$0xff]  ;;  %v2784_v43 = vld [vmem:[%s7712_s1 + $0x508] sm:$0xff]  ;;  %v2789_v61 = vld [vmem:[%s7712_s1 + $0x530] sm:$0xff] }
  0x4c   : > { %3409 = vmatprep.subr.bf16.mxu1 %v3408_v45  ;;  %v3430_v35 = vpack.c.bf16 %v2771_v28, %v2767_v27  ;;  %v2778_v45 = vld [vmem:[%s7712_s1 + $0x4d8] sm:$0xff]  ;;  %v3436_v49 = vpack.c.bf16 %v2788_v44, %v2784_v43  ;;  %v2791_v2 = vld [vmem:[%s7712_s1 + $0x540] sm:$0xff]  ;;  %v2793_v7 = vld [vmem:[%s7712_s1 + $0x550] sm:$0xff] }
  0x4d   : > { %v3496_v52 = vpack.c.bf16 %v2782_v46, %v2778_v45  ;;  %v2795_v3 = vld [vmem:[%s7712_s1 + $0x560] sm:$0xff]  ;;  %v2798_v6 = vld [vmem:[%s7712_s1 + $0x578] sm:$0xff]  ;;  %v2797_v8 = vld [vmem:[%s7712_s1 + $0x570] sm:$0xff] }
  0x4e   : > { %3347 = vmatpush1.bf16.msra.mxu0 %v3346_v38  ;;  %v3432_v38 = vpack.c.bf16 %v2780_v32, %v2776_v31  ;;  %v3442_v5 = vpack.c.bf16 %v2795_v3, %v2791_v2  ;;  %v2803_v15 = vld [vmem:[%s7712_s1 + $0x5a0] sm:$0xff]  ;;  %v2802_v16 = vld [vmem:[%s7712_s1 + $0x598] sm:$0xff]  ;;  %v2801_v19 = vld [vmem:[%s7712_s1 + $0x590] sm:$0xff] }
  0x4f   : > { %3349 = vmatprep.subr.bf16.mxu0 %v3348_v39  ;;  %3411 = vmatpush1.bf16.msra.mxu1 %v3410_v54  ;;  %v2775_v39 = vld [vmem:[%s7712_s1 + $0x4c0] sm:$0xff]  ;;  %v2781_v54 = vld [vmem:[%s7712_s1 + $0x4f0] sm:$0xff]  ;;  %v2806_v18 = vld [vmem:[%s7712_s1 + $0x5b8] sm:$0xff] }
  0x50   : > { %3413 = vmatprep.subr.bf16.mxu1 %v3412_v56  ;;  %v3434_v47 = vpack.c.bf16 %v2779_v40, %v2775_v39  ;;  %v2790_v56 = vld [vmem:[%s7712_s1 + $0x538] sm:$0xff]  ;;  %v3498_v58 = vpack.c.bf16 %v2781_v54, %v2777_v53  ;;  %v2805_v20 = vld [vmem:[%s7712_s1 + $0x5b0] sm:$0xff]  ;;  %v3508_v21 = vpack.c.bf16 %v2806_v18, %v2802_v16  ;;  %v2811_v27 = vld [vmem:[%s7712_s1 + $0x5e0] sm:$0xff] }
  0x51   : > { %v3500_v59 = vpack.c.bf16 %v2790_v56, %v2786_v55  ;;  %v3510_v22 = vpack.c.bf16 %v2805_v20, %v2801_v19  ;;  %v2810_v28 = vld [vmem:[%s7712_s1 + $0x5d8] sm:$0xff]  ;;  %v2809_v31 = vld [vmem:[%s7712_s1 + $0x5d0] sm:$0xff]  ;;  %v2819_v39 = vld [vmem:[%s7712_s1 + $0x620] sm:$0xff] }
  0x52   : > { %3351 = vmatpush1.bf16.msra.mxu0 %v3350_v50  ;;  %v2783_v50 = vld [vmem:[%s7712_s1 + $0x500] sm:$0xff]  ;;  %v2814_v30 = vld [vmem:[%s7712_s1 + $0x5f8] sm:$0xff]  ;;  %v2813_v32 = vld [vmem:[%s7712_s1 + $0x5f0] sm:$0xff] }
  0x53   : > { %3353 = vmatprep.subr.bf16.mxu0 %v3352_v51  ;;  %3415 = vmatpush1.bf16.msra.mxu1 %v3414_v63  ;;  %v2787_v51 = vld [vmem:[%s7712_s1 + $0x520] sm:$0xff]  ;;  %v2792_v63 = vld [vmem:[%s7712_s1 + $0x548] sm:$0xff]  ;;  %v3512_v33 = vpack.c.bf16 %v2814_v30, %v2810_v28  ;;  %v3514_v34 = vpack.c.bf16 %v2813_v32, %v2809_v31  ;;  %v2818_v40 = vld [vmem:[%s7712_s1 + $0x618] sm:$0xff] }
  0x54   : > { %3417 = vmatprep.subr.bf16.mxu1 %v3416_v4  ;;  %v3438_v57 = vpack.c.bf16 %v2787_v51, %v2783_v50  ;;  %v2794_v4 = vld [vmem:[%s7712_s1 + $0x558] sm:$0xff]  ;;  %v2817_v43 = vld [vmem:[%s7712_s1 + $0x610] sm:$0xff]  ;;  %v2823_v50 = vld [vmem:[%s7712_s1 + $0x640] sm:$0xff] }
  0x55   : > { %v3504_v9 = vpack.c.bf16 %v2798_v6, %v2794_v4  ;;  %v2822_v42 = vld [vmem:[%s7712_s1 + $0x638] sm:$0xff]  ;;  %v2821_v44 = vld [vmem:[%s7712_s1 + $0x630] sm:$0xff]  ;;  %v2827_v51 = vld [vmem:[%s7712_s1 + $0x660] sm:$0xff] }
  0x56   : > { %3355 = vmatpush1.bf16.msra.mxu0 %v3354_v62  ;;  %v3502_v62 = vpack.c.bf16 %v2789_v61, %v2785_v60  ;;  %v3516_v45 = vpack.c.bf16 %v2822_v42, %v2818_v40  ;;  %v3518_v46 = vpack.c.bf16 %v2821_v44, %v2817_v43  ;;  %v3458_v53 = vpack.c.bf16 %v2827_v51, %v2823_v50  ;;  %v2830_v54 = vld [vmem:[%s7712_s1 + $0x678] sm:$0xff]  ;;  %v2825_v55 = vld [vmem:[%s7712_s1 + $0x650] sm:$0xff]  ;;  %v2836_v60 = vld [vmem:[%s7712_s1 + $0x6a8] sm:$0xff] }
  0x57   : > { %3421 = vmatprep.subr.bf16.mxu0 %v3420_v1  ;;  %3419 = vmatpush1.bf16.msra.mxu1 %v3418_v12  ;;  %v3440_v1 = vpack.c.bf16 %v2796_v0, %v2792_v63  ;;  %v2804_v12 = vld [vmem:[%s7712_s1 + $0x5a8] sm:$0xff]  ;;  %v2829_v56 = vld [vmem:[%s7712_s1 + $0x670] sm:$0xff]  ;;  %v2835_v63 = vld [vmem:[%s7712_s1 + $0x6a0] sm:$0xff] }
  0x58   : > { %3485 = vmatprep.subr.bf16.mxu1 %v3484_v17  ;;  %v2834_v0 = vld [vmem:[%s7712_s1 + $0x698] sm:$0xff]  ;;  %v2833_v3 = vld [vmem:[%s7712_s1 + $0x690] sm:$0xff]  ;;  %v2848_v19 = vld [vmem:[%s7712_s1 + $0x708] sm:$0xff] }
  0x59   : > { %453 = vmatmul.mubr.f32.vlgmr.msra.gmra.mrb[0].mxu0 %v258_v10  ;;  %v2838_v2 = vld [vmem:[%s7712_s1 + $0x6b8] sm:$0xff]  ;;  %v2837_v4 = vld [vmem:[%s7712_s1 + $0x6b0] sm:$0xff]  ;;  %v2852_v20 = vld [vmem:[%s7712_s1 + $0x728] sm:$0xff] }
  0x5a   : > { %3423 = vmatpush1.bf16.msra.mxu0 %v3422_v11  ;;  %524 = vmatmul.mubr.f32.vlgmr.msra.gmra.mrb[0].mxu1 %v258_v10  ;;  %v3506_v10 = vpack.c.bf16 %v2797_v8, %v2793_v7  ;;  %v2800_v11 = vld [vmem:[%s7712_s1 + $0x588] sm:$0xff]  ;;  %v3526_v6 = vpack.c.bf16 %v2837_v4, %v2833_v3  ;;  %v2845_v16 = vld [vmem:[%s7712_s1 + $0x6f0] sm:$0xff] }
  0x5b   : > { %3425 = vmatprep.subr.bf16.mxu0 %v3424_v14  ;;  %3487 = vmatpush1.bf16.msra.mxu1 %v3486_v24  ;;  %v3444_v13 = vpack.c.bf16 %v2804_v12, %v2800_v11  ;;  %v2799_v14 = vld [vmem:[%s7712_s1 + $0x580] sm:$0xff]  ;;  %v2812_v24 = vld [vmem:[%s7712_s1 + $0x5e8] sm:$0xff]  ;;  %v2842_v12 = vld [vmem:[%s7712_s1 + $0x6d8] sm:$0xff] }
  0x5c   : > { %3489 = vmatprep.subr.bf16.mxu1 %v3488_v29  ;;  %v3446_v17 = vpack.c.bf16 %v2803_v15, %v2799_v14  ;;  %v2840_v7 = vld [vmem:[%s7712_s1 + $0x6c8] sm:$0xff]  ;;  %v2843_v11 = vld [vmem:[%s7712_s1 + $0x6e0] sm:$0xff]  ;;  %v2846_v14 = vld [vmem:[%s7712_s1 + $0x6f8] sm:$0xff] }
  0x5d   : > { %v2844_v8 = vld [vmem:[%s7712_s1 + $0x6e8] sm:$0xff]  ;;  %v2841_v15 = vld [vmem:[%s7712_s1 + $0x6d0] sm:$0xff] }
  0x5e   : > { %3427 = vmatpush1.bf16.msra.mxu0 %v3426_v23  ;;  %v2808_v23 = vld [vmem:[%s7712_s1 + $0x5c8] sm:$0xff]  ;;  %v3530_v18 = vpack.c.bf16 %v2845_v16, %v2841_v15  ;;  %v2853_v28 = vld [vmem:[%s7712_s1 + $0x730] sm:$0xff] }
  0x5f   : > { %3429 = vmatprep.subr.bf16.mxu0 %v3428_v26  ;;  %3491 = vmatpush1.bf16.msra.mxu1 %v3490_v36  ;;  %v3448_v25 = vpack.c.bf16 %v2812_v24, %v2808_v23  ;;  %v2807_v26 = vld [vmem:[%s7712_s1 + $0x5c0] sm:$0xff]  ;;  %v2820_v36 = vld [vmem:[%s7712_s1 + $0x628] sm:$0xff]  ;;  %v2850_v24 = vld [vmem:[%s7712_s1 + $0x718] sm:$0xff] }
  0x60   : > { %3493 = vmatprep.subr.bf16.mxu1 %v3492_v41  ;;  %v3450_v29 = vpack.c.bf16 %v2811_v27, %v2807_v26  ;;  %v2851_v23 = vld [vmem:[%s7712_s1 + $0x720] sm:$0xff]  ;;  %v2854_v26 = vld [vmem:[%s7712_s1 + $0x738] sm:$0xff]  ;;  %v2849_v27 = vld [vmem:[%s7712_s1 + $0x710] sm:$0xff] }
  0x61   : > { %v3534_v30 = vpack.c.bf16 %v2853_v28, %v2849_v27  ;;  %v2856_v31 = vld [vmem:[%s7712_s1 + $0x748] sm:$0xff]  ;;  %v2861_v40 = vld [vmem:[%s7712_s1 + $0x770] sm:$0xff] }
  0x62   : > { %3431 = vmatpush1.bf16.msra.mxu0 %v3430_v35  ;;  %v2816_v35 = vld [vmem:[%s7712_s1 + $0x608] sm:$0xff] }
  0x63   : > { %3433 = vmatprep.subr.bf16.mxu0 %v3432_v38  ;;  %3495 = vmatpush1.bf16.msra.mxu1 %v3494_v48  ;;  %v3452_v37 = vpack.c.bf16 %v2820_v36, %v2816_v35  ;;  %v2815_v38 = vld [vmem:[%s7712_s1 + $0x600] sm:$0xff]  ;;  %v2828_v48 = vld [vmem:[%s7712_s1 + $0x668] sm:$0xff]  ;;  %v2858_v36 = vld [vmem:[%s7712_s1 + $0x758] sm:$0xff] }
  0x64   : > { %3497 = vmatprep.subr.bf16.mxu1 %v3496_v52  ;;  %v3454_v41 = vpack.c.bf16 %v2819_v39, %v2815_v38  ;;  %v2826_v52 = vld [vmem:[%s7712_s1 + $0x658] sm:$0xff]  ;;  %v2860_v32 = vld [vmem:[%s7712_s1 + $0x768] sm:$0xff]  ;;  %v2859_v35 = vld [vmem:[%s7712_s1 + $0x760] sm:$0xff] }
  0x65   : > { %v2862_v38 = vld [vmem:[%s7712_s1 + $0x778] sm:$0xff]  ;;  %v2857_v39 = vld [vmem:[%s7712_s1 + $0x750] sm:$0xff]  ;;  %v2864_v43 = vld [vmem:[%s7712_s1 + $0x788] sm:$0xff] }
  0x66   : > { %3435 = vmatpush1.bf16.msra.mxu0 %v3434_v47  ;;  %v2824_v47 = vld [vmem:[%s7712_s1 + $0x648] sm:$0xff]  ;;  %v3538_v42 = vpack.c.bf16 %v2861_v40, %v2857_v39 }
  0x67   : > { %3437 = vmatprep.subr.bf16.mxu0 %v3436_v49  ;;  %3499 = vmatpush1.bf16.msra.mxu1 %v3498_v58  ;;  %v3456_v49 = vpack.c.bf16 %v2828_v48, %v2824_v47  ;;  %v3522_v58 = vpack.c.bf16 %v2829_v56, %v2825_v55  ;;  %v2868_v44 = vld [vmem:[%s7712_s1 + $0x7a8] sm:$0xff]  ;;  %v2867_v47 = vld [vmem:[%s7712_s1 + $0x7a0] sm:$0xff]  ;;  %v2866_v48 = vld [vmem:[%s7712_s1 + $0x798] sm:$0xff] }
  0x68   : > { %3501 = vmatprep.subr.bf16.mxu1 %v3500_v59  ;;  %v2832_v59 = vld [vmem:[%s7712_s1 + $0x688] sm:$0xff] }
  0x69   : > { %v3460_v61 = vpack.c.bf16 %v2836_v60, %v2832_v59  ;;  %v2876_v56 = vld [vmem:[%s7712_s1 + $0x7e8] sm:$0xff]  ;;  %v2874_v60 = vld [vmem:[%s7712_s1 + $0x7d8] sm:$0xff] }
  0x6a   : > { %3439 = vmatpush1.bf16.msra.mxu0 %v3438_v57  ;;  %v3520_v57 = vpack.c.bf16 %v2830_v54, %v2826_v52  ;;  %v2865_v52 = vld [vmem:[%s7712_s1 + $0x790] sm:$0xff]  ;;  %v2872_v54 = vld [vmem:[%s7712_s1 + $0x7c8] sm:$0xff] }
  0x6b   : > { %3503 = vmatpush1.bf16.msra.mxu1 %v3502_v62  ;;  %3441 = vmatprep.subr.bf16.mxu0 %v3440_v1  ;;  %v2831_v62 = vld [vmem:[%s7712_s1 + $0x680] sm:$0xff]  ;;  %v3480_v59 = vpack.c.bf16 %v2876_v56, %v2872_v54  ;;  %v862_v3 = vld [vmem:[%s7712_s1 + $0x8] sm:$0xff]  ;;  %v872_v54 = vld [vmem:[%s7712_s1 + $0x58] sm:$0xff] }
  0x6c   : > { %3505 = vmatprep.subr.bf16.mxu1 %v3504_v9  ;;  %v3462_v1 = vpack.c.bf16 %v2835_v63, %v2831_v62  ;;  %v3464_v9 = vpack.c.bf16 %v2844_v8, %v2840_v7  ;;  %v2873_v62 = vld [vmem:[%s7712_s1 + $0x7d0] sm:$0xff]  ;;  %v866_v4 = vld [vmem:[%s7712_s1 + $0x28] sm:$0xff]  ;;  %v864_v7 = vld [vmem:[%s7712_s1 + $0x18] sm:$0xff] }
  0x6d   : > { %v868_v8 = vld [vmem:[%s7712_s1 + $0x38] sm:$0xff] }
  0x6e   : > { %3443 = vmatpush1.bf16.msra.mxu0 %v3442_v5  ;;  %v3524_v5 = vpack.c.bf16 %v2838_v2, %v2834_v0  ;;  %v687_v2 = vld [vmem:[#allocation2 + $0x8] sm:$0xff] }
  0x6f   : > { %3507 = vmatpush1.bf16.msra.mxu1 %v3506_v10  ;;  %3445 = vmatprep.subr.bf16.mxu0 %v3444_v13  ;;  %v2839_v10 = vld [vmem:[%s7712_s1 + $0x6c0] sm:$0xff] }
  0x70   : > { %3509 = vmatprep.subr.bf16.mxu1 %v3508_v21  ;;  %v3466_v13 = vpack.c.bf16 %v2843_v11, %v2839_v10  ;;  %v3468_v21 = vpack.c.bf16 %v2852_v20, %v2848_v19  ;;  %752 = vmatprep.mubr.f32.mxu0 %v687_v2  ;;  %v215_v10 = vlaneseq }
  0x71   : > { %823 = vmatprep.mubr.f32.mxu1 %v687_v2 }
  0x72   : > { %3447 = vmatpush1.bf16.msra.mxu0 %v3446_v17  ;;  %v3528_v17 = vpack.c.bf16 %v2846_v14, %v2842_v12  ;;  %v5323_v11 = vshrl.u32 %v215_v10, 7 }
  0x73   : > { %3511 = vmatpush1.bf16.msra.mxu1 %v3510_v22  ;;  %3449 = vmatprep.subr.bf16.mxu0 %v3448_v25  ;;  %v2847_v22 = vld [vmem:[%s7712_s1 + $0x700] sm:$0xff] }
  0x74   : > { %3513 = vmatprep.subr.bf16.mxu1 %v3512_v33  ;;  %v3470_v25 = vpack.c.bf16 %v2851_v23, %v2847_v22  ;;  %v3472_v33 = vpack.c.bf16 %v2860_v32, %v2856_v31  ;;  %v217_v12 = vsub.s32 0, %v5323_v11  ;;  %v221_v14 = vsub.s32 1, %v5323_v11 }
  0x76   : > { %3451 = vmatpush1.bf16.msra.mxu0 %v3450_v29  ;;  %v3532_v29 = vpack.c.bf16 %v2854_v26, %v2850_v24 }
  0x77   : > { %3515 = vmatpush1.bf16.msra.mxu1 %v3514_v34  ;;  %3453 = vmatprep.subr.bf16.mxu0 %v3452_v37  ;;  %v2855_v34 = vld [vmem:[%s7712_s1 + $0x740] sm:$0xff] }
  0x78   : > { %3517 = vmatprep.subr.bf16.mxu1 %v3516_v45  ;;  %v3474_v37 = vpack.c.bf16 %v2859_v35, %v2855_v34  ;;  %v2863_v45 = vld [vmem:[%s7712_s1 + $0x780] sm:$0xff] }
  0x79   : > { %v3478_v50 = vpack.c.bf16 %v2867_v47, %v2863_v45  ;;  %v861_v45 = vld [vmem:[%s7712_s1] sm:$0xff] }
  0x7a   : > { %3455 = vmatpush1.bf16.msra.mxu0 %v3454_v41  ;;  %v3536_v41 = vpack.c.bf16 %v2862_v38, %v2858_v36  ;;  %v549_v38 = vld [vmem:[#allocation3] sm:$0xff] }
  0x7b   : > { %3519 = vmatpush1.bf16.msra.mxu1 %v3518_v46  ;;  %3457 = vmatprep.subr.bf16.mxu0 %v3456_v49  ;;  %v3476_v46 = vpack.c.bf16 %v2868_v44, %v2864_v43  ;;  %v2870_v49 = vld [vmem:[%s7712_s1 + $0x7b8] sm:$0xff] }
  0x7c   : > { %3521 = vmatprep.subr.bf16.mxu1 %v3520_v57  ;;  %v3540_v51 = vpack.c.bf16 %v2870_v49, %v2866_v48  ;;  %v2871_v57 = vld [vmem:[%s7712_s1 + $0x7c0] sm:$0xff]  ;;  %v870_v48 = vld [vmem:[%s7712_s1 + $0x48] sm:$0xff] }
  0x7d   : > { %v874_v49 = vld [vmem:[%s7712_s1 + $0x68] sm:$0xff] }
  0x7e   : > { %3459 = vmatpush1.bf16.msra.mxu0 %v3458_v53  ;;  %v2869_v53 = vld [vmem:[%s7712_s1 + $0x7b0] sm:$0xff] }
  0x7f   : > { %3523 = vmatpush1.bf16.msra.mxu1 %v3522_v58  ;;  %3461 = vmatprep.subr.bf16.mxu0 %v3460_v61  ;;  %v3542_v55 = vpack.c.bf16 %v2869_v53, %v2865_v52  ;;  %v2875_v58 = vld [vmem:[%s7712_s1 + $0x7e0] sm:$0xff]  ;;  %v2878_v61 = vld [vmem:[%s7712_s1 + $0x7f8] sm:$0xff] }
  0x80   : > { %3525 = vmatprep.subr.bf16.mxu1 %v3524_v5  ;;  %v3482_v63 = vpack.c.bf16 %v2875_v58, %v2871_v57  ;;  %v3544_v0 = vpack.c.bf16 %v2878_v61, %v2874_v60  ;;  %v3552_v57 = vpack.c.bf16 %v874_v49, %v870_v48  ;;  %v869_v58 = vld [vmem:[%s7712_s1 + $0x40] sm:$0xff]  ;;  %v878_v60 = vld [vmem:[%s7712_s1 + $0x88] sm:$0xff]  ;;  %v904_v48 = vld [vmem:[%s7712_s1 + $0x158] sm:$0xff] }
  0x81   : > { %v882_v61 = vld [vmem:[%s7712_s1 + $0xa8] sm:$0xff]  ;;  %v908_v49 = vld [vmem:[%s7712_s1 + $0x178] sm:$0xff] }
  0x82   : > { %3463 = vmatpush1.bf16.msra.mxu0 %v3462_v1  ;;  %v2877_v1 = vld [vmem:[%s7712_s1 + $0x7f0] sm:$0xff] }
  0x83   : > { %3527 = vmatpush1.bf16.msra.mxu1 %v3526_v6  ;;  %3465 = vmatprep.subr.bf16.mxu0 %v3464_v9  ;;  %v3546_v5 = vpack.c.bf16 %v2877_v1, %v2873_v62  ;;  %v3548_v6 = vpack.c.bf16 %v866_v4, %v862_v3  ;;  %v3612_v9 = vpack.c.bf16 %v868_v8, %v864_v7  ;;  %v875_v1 = vld [vmem:[%s7712_s1 + $0x70] sm:$0xff]  ;;  %v880_v3 = vld [vmem:[%s7712_s1 + $0x98] sm:$0xff]  ;;  %v881_v7 = vld [vmem:[%s7712_s1 + $0xa0] sm:$0xff] }
  0x84   : > { %3529 = vmatprep.subr.bf16.mxu1 %v3528_v17  ;;  %v229_v17 = vsub.s32 3, %v5323_v11  ;;  %v884_v4 = vld [vmem:[%s7712_s1 + $0xb8] sm:$0xff]  ;;  %v886_v8 = vld [vmem:[%s7712_s1 + $0xc8] sm:$0xff] }
  0x86   : > { %3467 = vmatpush1.bf16.msra.mxu0 %v3466_v13  ;;  %v213_v13 = vld [vmem:[%s7713_s2] sm:$0xf] }
  0x87   : > { %3531 = vmatpush1.bf16.msra.mxu1 %v3530_v18  ;;  %3469 = vmatprep.subr.bf16.mxu0 %v3468_v21  ;;  %v5332_v15 = vrot.slane %v213_v13, %v217_v12  ;;  %v5336_v16 = vrot.slane %v213_v13, %v221_v14  ;;  %v5343_v23 = vrot.slane %v213_v13, %v229_v17 }
  0x88   : > { %3533 = vmatprep.subr.bf16.mxu1 %v3532_v29 }
  0x8a   : > { %3471 = vmatpush1.bf16.msra.mxu0 %v3470_v25  ;;  %v225_v25 = vsub.s32 2, %v5323_v11 }
  0x8b   : > { %3535 = vmatpush1.bf16.msra.mxu1 %v3534_v30  ;;  %3473 = vmatprep.subr.bf16.mxu0 %v3472_v33 }
  0x8c   : > { %3537 = vmatprep.subr.bf16.mxu1 %v3536_v41  ;;  %v5349_v29 = vrot.slane %v213_v13, %v225_v25  ;;  %v3620_v13 = vpack.c.bf16 %v884_v4, %v880_v3 }
  0x8e   : > { %3475 = vmatpush1.bf16.msra.mxu0 %v3474_v37 }
  0x8f   : > { %3539 = vmatpush1.bf16.msra.mxu1 %v3538_v42  ;;  %3477 = vmatprep.subr.bf16.mxu0 %v3476_v46  ;;  %v865_v46 = vld [vmem:[%s7712_s1 + $0x20] sm:$0xff] }
  0x90   : > { %3541 = vmatprep.subr.bf16.mxu1 %v3540_v51  ;;  %v867_v51 = vld [vmem:[%s7712_s1 + $0x30] sm:$0xff]  ;;  %v3550_v53 = vpack.c.bf16 %v865_v46, %v861_v45 }
  0x91   : > { %v895_v45 = vld [vmem:[%s7712_s1 + $0x110] sm:$0xff] }
  0x92   : > { %3479 = vmatpush1.bf16.msra.mxu0 %v3478_v50  ;;  %v863_v50 = vld [vmem:[%s7712_s1 + $0x10] sm:$0xff] }
  0x93   : > { %3481 = vmatprep.subr.bf16.mxu0 %v3480_v59  ;;  %3543 = vmatpush1.bf16.msra.mxu1 %v3542_v55  ;;  %v876_v55 = vld [vmem:[%s7712_s1 + $0x78] sm:$0xff]  ;;  %v873_v59 = vld [vmem:[%s7712_s1 + $0x60] sm:$0xff]  ;;  %v3614_v62 = vpack.c.bf16 %v867_v51, %v863_v50  ;;  %v899_v46 = vld [vmem:[%s7712_s1 + $0x130] sm:$0xff] }
  0x94   : > { %3545 = vmatprep.subr.bf16.mxu1 %v3544_v0  ;;  %v871_v0 = vld [vmem:[%s7712_s1 + $0x50] sm:$0xff]  ;;  %v3554_v2 = vpack.c.bf16 %v873_v59, %v869_v58  ;;  %v901_v51 = vld [vmem:[%s7712_s1 + $0x140] sm:$0xff] }
  0x95   : > { %v3618_v10 = vpack.c.bf16 %v875_v1, %v871_v0  ;;  %v907_v58 = vld [vmem:[%s7712_s1 + $0x170] sm:$0xff]  ;;  %v913_v0 = vld [vmem:[%s7712_s1 + $0x1a0] sm:$0xff]  ;;  %v918_v1 = vld [vmem:[%s7712_s1 + $0x1c8] sm:$0xff] }
  0x96   : > { %3483 = vmatpush1.bf16.msra.mxu0 %v3482_v63  ;;  %v3616_v63 = vpack.c.bf16 %v876_v55, %v872_v54  ;;  %v914_v54 = vld [vmem:[%s7712_s1 + $0x1a8] sm:$0xff]  ;;  %v3630_v55 = vpack.c.bf16 %v899_v46, %v895_v45  ;;  %v937_v45 = vld [vmem:[%s7712_s1 + $0x260] sm:$0xff] }
  0x97   : > { %3549 = vmatprep.subr.bf16.mxu0 %v3548_v6  ;;  %3547 = vmatpush1.bf16.msra.mxu1 %v3546_v5  ;;  %v3556_v5 = vpack.c.bf16 %v882_v61, %v878_v60  ;;  %v877_v6 = vld [vmem:[%s7712_s1 + $0x80] sm:$0xff]  ;;  %v912_v60 = vld [vmem:[%s7712_s1 + $0x198] sm:$0xff]  ;;  %v942_v46 = vld [vmem:[%s7712_s1 + $0x288] sm:$0xff] }
  0x98   : > { %3613 = vmatprep.subr.bf16.mxu1 %v3612_v9  ;;  %v890_v9 = vld [vmem:[%s7712_s1 + $0xe8] sm:$0xff]  ;;  %v916_v61 = vld [vmem:[%s7712_s1 + $0x1b8] sm:$0xff] }
  0x99   : > { %v3636_v4 = vpack.c.bf16 %v916_v61, %v912_v60 }
 0x12c   : > { %v454_v18 = vpop.f32.mrb[0].mxu0 }
 0x12d   : > { %v455_v19 = vadd.f32 %v454_v18, %v5332_v15  ;;  %v456_v20 = vpop.f32.mrb[1].mxu0  ;;  %v525_v26 = vpop.f32.mrb[0].mxu1  ;;  %v879_v18 = vld [vmem:[%s7712_s1 + $0x90] sm:$0xff] }
 0x12e   : > { %v457_v21 = vadd.f32 %v456_v20, %v5336_v16  ;;  %v527_v27 = vpop.f32.mrb[1].mxu1  ;;  %v526_v31 = vadd.f32 %v525_v26, %v5349_v29  ;;  %v3558_v20 = vpack.c.bf16 %v881_v7, %v877_v6  ;;  %v885_v26 = vld [vmem:[%s7712_s1 + $0xc0] sm:$0xff]  ;;  %v915_v6 = vld [vmem:[%s7712_s1 + $0x1b0] sm:$0xff] }
 0x12f   : > { %v2748_v22 = vmul.f32 -1.442695, %v455_v19  ;;  %v528_v28 = vadd.f32 %v527_v27, %v5343_v23  ;;  %v883_v19 = vld [vmem:[%s7712_s1 + $0xb0] sm:$0xff]  ;;  %v889_v27 = vld [vmem:[%s7712_s1 + $0xe0] sm:$0xff] }
 0x130   : > { %v2749_v24 = vmul.f32 -1.442695, %v457_v21  ;;  %v888_v21 = vld [vmem:[%s7712_s1 + $0xd8] sm:$0xff] }
 0x131   : > { %4341 = vpow2.f32 %v2748_v22  ;;  %v2750_v30 = vmul.f32 -1.442695, %v528_v28  ;;  %v892_v22 = vld [vmem:[%s7712_s1 + $0xf8] sm:$0xff]  ;;  %v894_v28 = vld [vmem:[%s7712_s1 + $0x108] sm:$0xff] }
 0x132   : > { %4343 = vpow2.f32 %v2749_v24  ;;  %v3560_v24 = vpack.c.bf16 %v890_v9, %v886_v8  ;;  %v920_v8 = vld [vmem:[%s7712_s1 + $0x1d8] sm:$0xff] }
 0x133   : > { %4345 = vpow2.f32 %v2750_v30  ;;  %v898_v30 = vld [vmem:[%s7712_s1 + $0x128] sm:$0xff]  ;;  %v924_v9 = vld [vmem:[%s7712_s1 + $0x1f8] sm:$0xff] }
 0x134   : > { %4347 = vtanh.f32 %v526_v31  ;;  %v3622_v31 = vpack.c.bf16 %v883_v19, %v879_v18  ;;  %v921_v18 = vld [vmem:[%s7712_s1 + $0x1e0] sm:$0xff]  ;;  %v926_v19 = vld [vmem:[%s7712_s1 + $0x208] sm:$0xff] }
 0x13b   : > { %v4342_v32 = vpop.eup %4341 }
 0x13c   : > { %v4344_v33 = vpop.eup %4343  ;;  %v533_v34 = vadd.f32 1.0, %v4342_v32  ;;  %v3624_v32 = vpack.c.bf16 %v892_v22, %v888_v21  ;;  %v3640_v22 = vpack.c.bf16 %v924_v9, %v920_v8 }
 0x13d   : > { %v539_v35 = vadd.f32 1.0, %v4344_v33  ;;  %v4346_v36 = vpop.eup %4345  ;;  %v887_v33 = vld [vmem:[%s7712_s1 + $0xd0] sm:$0xff] }
 0x13e   : > { %4349 = vrcp.f32 %v533_v34  ;;  %v4348_v37 = vpop.eup %4347  ;;  %v546_v40 = vadd.f32 1.0, %v4346_v36  ;;  %v891_v34 = vld [vmem:[%s7712_s1 + $0xf0] sm:$0xff]  ;;  %v896_v36 = vld [vmem:[%s7712_s1 + $0x118] sm:$0xff] }
 0x13f   : > { %4351 = vrcp.f32 %v539_v35  ;;  %v3562_v35 = vpack.c.bf16 %v889_v27, %v885_v26  ;;  %v923_v26 = vld [vmem:[%s7712_s1 + $0x1f0] sm:$0xff] }
 0x140   : > { %4353 = vrcp.f32 %v546_v40  ;;  %v897_v40 = vld [vmem:[%s7712_s1 + $0x120] sm:$0xff] }
 0x148   : > { %v4350_v39 = vpop.eup %4349 }
 0x149   : > { %v4352_v41 = vpop.eup %4351  ;;  %v551_v42 = vmul.f32 %v4350_v39, %v4348_v37  ;;  %v900_v37 = vld [vmem:[%s7712_s1 + $0x138] sm:$0xff]  ;;  %v893_v39 = vld [vmem:[%s7712_s1 + $0x100] sm:$0xff] }
 0x14a   : > { %v550_v43 = vmul.f32 %v4352_v41, %v549_v38  ;;  %v4354_v47 = vpop.eup %4353  ;;  %v3564_v38 = vpack.c.bf16 %v898_v30, %v894_v28  ;;  %v902_v41 = vld [vmem:[%s7712_s1 + $0x148] sm:$0xff]  ;;  %v928_v28 = vld [vmem:[%s7712_s1 + $0x218] sm:$0xff] }
 0x14b   : > { %v932_v30 = vld [vmem:[%s7712_s1 + $0x238] sm:$0xff] }
 0x14c   : > { %v552_v44 = vadd.f32 %v551_v42, %v550_v43  ;;  %v906_v42 = vld [vmem:[%s7712_s1 + $0x168] sm:$0xff]  ;;  %v3626_v43 = vpack.c.bf16 %v891_v34, %v887_v33  ;;  %v929_v33 = vld [vmem:[%s7712_s1 + $0x220] sm:$0xff] }
 0x14d   : > { %v3568_v50 = vpack.c.bf16 %v906_v42, %v902_v41  ;;  %v934_v34 = vld [vmem:[%s7712_s1 + $0x248] sm:$0xff]  ;;  %v936_v41 = vld [vmem:[%s7712_s1 + $0x258] sm:$0xff] }
 0x14e   : > { %4355 = vtanh.f32 %v552_v44  ;;  %555 = vst [vmem:[#allocation3] sm:$0xff] %v552_v44  ;;  %v3628_v44 = vpack.c.bf16 %v900_v37, %v896_v36  ;;  %v3644_v37 = vpack.c.bf16 %v932_v30, %v928_v28  ;;  %v940_v42 = vld [vmem:[%s7712_s1 + $0x278] sm:$0xff] }
 0x158   : > { %v4356_v52 = vpop.eup %4355 }
 0x159   : > { %v554_v56 = vmul.f32 %v4356_v52, %v4354_v47  ;;  %v3566_v47 = vpack.c.bf16 %v897_v40, %v893_v39  ;;  %v905_v52 = vld [vmem:[%s7712_s1 + $0x160] sm:$0xff]  ;;  %v931_v39 = vld [vmem:[%s7712_s1 + $0x230] sm:$0xff] }
 0x15a   : > { %v3570_v59 = vpack.c.bf16 %v905_v52, %v901_v51  ;;  %v939_v51 = vld [vmem:[%s7712_s1 + $0x270] sm:$0xff] }
 0x15b   : > { %753 = vmatmul.mubr.f32.vlgmr.msra.gmra.mrb[2].mxu0 %v554_v56  ;;  %824 = vmatmul.mubr.f32.vlgmr.msra.gmra.mrb[2].mxu1 %v554_v56 }
 0x15c   : > { %3551 = vmatpush1.bf16.msra.mxu0 %v3550_v53  ;;  %1054 = vmatprep.mubr.f32.mxu0 %v554_v56  ;;  %v910_v53 = vld [vmem:[%s7712_s1 + $0x188] sm:$0xff] }
 0x15d   : > { %3553 = vmatprep.subr.bf16.mxu0 %v3552_v57  ;;  %1125 = vmatprep.mubr.f32.mxu1 %v554_v56  ;;  %v3632_v56 = vpack.c.bf16 %v908_v49, %v904_v48  ;;  %v903_v57 = vld [vmem:[%s7712_s1 + $0x150] sm:$0xff]  ;;  %v3648_v49 = vpack.c.bf16 %v940_v42, %v936_v41 }
 0x15e   : > { %3615 = vmatpush1.bf16.msra.mxu1 %v3614_v62  ;;  %v3572_v62 = vpack.c.bf16 %v914_v54, %v910_v53  ;;  %v3634_v3 = vpack.c.bf16 %v907_v58, %v903_v57  ;;  %v944_v53 = vld [vmem:[%s7712_s1 + $0x298] sm:$0xff]  ;;  %v945_v57 = vld [vmem:[%s7712_s1 + $0x2a0] sm:$0xff]  ;;  %v950_v58 = vld [vmem:[%s7712_s1 + $0x2c8] sm:$0xff] }
 0x15f   : > { %3617 = vmatprep.subr.bf16.mxu1 %v3616_v63  ;;  %v909_v63 = vld [vmem:[%s7712_s1 + $0x180] sm:$0xff]  ;;  %v948_v54 = vld [vmem:[%s7712_s1 + $0x2b8] sm:$0xff] }
 0x160   : > { %3555 = vmatpush1.bf16.msra.mxu0 %v3554_v2  ;;  %v922_v2 = vld [vmem:[%s7712_s1 + $0x1e8] sm:$0xff]  ;;  %v3574_v7 = vpack.c.bf16 %v913_v0, %v909_v63  ;;  %v3652_v61 = vpack.c.bf16 %v948_v54, %v944_v53  ;;  %v947_v63 = vld [vmem:[%s7712_s1 + $0x2b0] sm:$0xff] }
 0x161   : > { %3557 = vmatprep.subr.bf16.mxu0 %v3556_v5  ;;  %v911_v5 = vld [vmem:[%s7712_s1 + $0x190] sm:$0xff] }
 0x162   : > { %3619 = vmatpush1.bf16.msra.mxu1 %v3618_v10  ;;  %v3576_v10 = vpack.c.bf16 %v922_v2, %v918_v1  ;;  %v3638_v21 = vpack.c.bf16 %v915_v6, %v911_v5  ;;  %v952_v1 = vld [vmem:[%s7712_s1 + $0x2d8] sm:$0xff]  ;;  %v953_v5 = vld [vmem:[%s7712_s1 + $0x2e0] sm:$0xff]  ;;  %v958_v6 = vld [vmem:[%s7712_s1 + $0x308] sm:$0xff] }
 0x163   : > { %3621 = vmatprep.subr.bf16.mxu1 %v3620_v13  ;;  %v917_v13 = vld [vmem:[%s7712_s1 + $0x1c0] sm:$0xff]  ;;  %v956_v2 = vld [vmem:[%s7712_s1 + $0x2f8] sm:$0xff] }
 0x164   : > { %3559 = vmatpush1.bf16.msra.mxu0 %v3558_v20  ;;  %v930_v20 = vld [vmem:[%s7712_s1 + $0x228] sm:$0xff]  ;;  %v3578_v27 = vpack.c.bf16 %v921_v18, %v917_v13  ;;  %v3656_v9 = vpack.c.bf16 %v956_v2, %v952_v1  ;;  %v955_v13 = vld [vmem:[%s7712_s1 + $0x2f0] sm:$0xff] }
 0x165   : > { %3561 = vmatprep.subr.bf16.mxu0 %v3560_v24  ;;  %v919_v24 = vld [vmem:[%s7712_s1 + $0x1d0] sm:$0xff] }
 0x166   : > { %3623 = vmatpush1.bf16.msra.mxu1 %v3622_v31  ;;  %v3580_v31 = vpack.c.bf16 %v930_v20, %v926_v19  ;;  %v3642_v36 = vpack.c.bf16 %v923_v26, %v919_v24  ;;  %v960_v19 = vld [vmem:[%s7712_s1 + $0x318] sm:$0xff]  ;;  %v961_v24 = vld [vmem:[%s7712_s1 + $0x320] sm:$0xff]  ;;  %v966_v26 = vld [vmem:[%s7712_s1 + $0x348] sm:$0xff] }
 0x167   : > { %3625 = vmatprep.subr.bf16.mxu1 %v3624_v32  ;;  %v925_v32 = vld [vmem:[%s7712_s1 + $0x200] sm:$0xff]  ;;  %v964_v20 = vld [vmem:[%s7712_s1 + $0x338] sm:$0xff]  ;;  %v983_v1 = vld [vmem:[%s7712_s1 + $0x3d0] sm:$0xff] }
 0x168   : > { %3563 = vmatpush1.bf16.msra.mxu0 %v3562_v35  ;;  %v938_v35 = vld [vmem:[%s7712_s1 + $0x268] sm:$0xff]  ;;  %v3582_v40 = vpack.c.bf16 %v929_v33, %v925_v32  ;;  %v3660_v30 = vpack.c.bf16 %v964_v20, %v960_v19  ;;  %v963_v32 = vld [vmem:[%s7712_s1 + $0x330] sm:$0xff]  ;;  %v2893_v19 = vld [vmem:[%s7712_s1 + $0x438] sm:$0xff] }
 0x169   : > { %3565 = vmatprep.subr.bf16.mxu0 %v3564_v38  ;;  %v927_v38 = vld [vmem:[%s7712_s1 + $0x210] sm:$0xff] }
 0x16a   : > { %3627 = vmatpush1.bf16.msra.mxu1 %v3626_v43  ;;  %v3584_v43 = vpack.c.bf16 %v938_v35, %v934_v34  ;;  %v3646_v48 = vpack.c.bf16 %v931_v39, %v927_v38  ;;  %v968_v34 = vld [vmem:[%s7712_s1 + $0x358] sm:$0xff]  ;;  %v969_v38 = vld [vmem:[%s7712_s1 + $0x360] sm:$0xff]  ;;  %v974_v39 = vld [vmem:[%s7712_s1 + $0x388] sm:$0xff] }
 0x16b   : > { %3629 = vmatprep.subr.bf16.mxu1 %v3628_v44  ;;  %v933_v44 = vld [vmem:[%s7712_s1 + $0x240] sm:$0xff]  ;;  %v972_v35 = vld [vmem:[%s7712_s1 + $0x378] sm:$0xff]  ;;  %v987_v2 = vld [vmem:[%s7712_s1 + $0x3f0] sm:$0xff] }
 0x16c   : > { %3567 = vmatpush1.bf16.msra.mxu0 %v3566_v47  ;;  %v946_v47 = vld [vmem:[%s7712_s1 + $0x2a8] sm:$0xff]  ;;  %v3586_v52 = vpack.c.bf16 %v937_v45, %v933_v44  ;;  %v3664_v42 = vpack.c.bf16 %v972_v35, %v968_v34  ;;  %v971_v44 = vld [vmem:[%s7712_s1 + $0x370] sm:$0xff] }
 0x16d   : > { %3569 = vmatprep.subr.bf16.mxu0 %v3568_v50  ;;  %v935_v50 = vld [vmem:[%s7712_s1 + $0x250] sm:$0xff] }
 0x16e   : > { %3631 = vmatpush1.bf16.msra.mxu1 %v3630_v55  ;;  %v3588_v55 = vpack.c.bf16 %v946_v47, %v942_v46  ;;  %v3650_v60 = vpack.c.bf16 %v939_v51, %v935_v50  ;;  %v976_v46 = vld [vmem:[%s7712_s1 + $0x398] sm:$0xff]  ;;  %v977_v50 = vld [vmem:[%s7712_s1 + $0x3a0] sm:$0xff]  ;;  %v982_v51 = vld [vmem:[%s7712_s1 + $0x3c8] sm:$0xff] }
 0x16f   : > { %3633 = vmatprep.subr.bf16.mxu1 %v3632_v56  ;;  %v941_v56 = vld [vmem:[%s7712_s1 + $0x280] sm:$0xff]  ;;  %v980_v47 = vld [vmem:[%s7712_s1 + $0x3b8] sm:$0xff]  ;;  %v2888_v20 = vld [vmem:[%s7712_s1 + $0x410] sm:$0xff] }
 0x170   : > { %3571 = vmatpush1.bf16.msra.mxu0 %v3570_v59  ;;  %v954_v59 = vld [vmem:[%s7712_s1 + $0x2e8] sm:$0xff]  ;;  %v3590_v0 = vpack.c.bf16 %v945_v57, %v941_v56  ;;  %v3668_v54 = vpack.c.bf16 %v980_v47, %v976_v46  ;;  %v979_v56 = vld [vmem:[%s7712_s1 + $0x3b0] sm:$0xff]  ;;  %v2909_v46 = vld [vmem:[%s7712_s1 + $0x4b8] sm:$0xff] }
 0x171   : > { %3573 = vmatprep.subr.bf16.mxu0 %v3572_v62  ;;  %v943_v62 = vld [vmem:[%s7712_s1 + $0x290] sm:$0xff] }
 0x172   : > { %3635 = vmatpush1.bf16.msra.mxu1 %v3634_v3  ;;  %v3592_v3 = vpack.c.bf16 %v954_v59, %v950_v58  ;;  %v3654_v8 = vpack.c.bf16 %v947_v63, %v943_v62  ;;  %v984_v58 = vld [vmem:[%s7712_s1 + $0x3d8] sm:$0xff]  ;;  %v985_v62 = vld [vmem:[%s7712_s1 + $0x3e0] sm:$0xff]  ;;  %v2904_v47 = vld [vmem:[%s7712_s1 + $0x490] sm:$0xff] }
 0x173   : > { %3637 = vmatprep.subr.bf16.mxu1 %v3636_v4  ;;  %v949_v4 = vld [vmem:[%s7712_s1 + $0x2c0] sm:$0xff]  ;;  %v988_v59 = vld [vmem:[%s7712_s1 + $0x3f8] sm:$0xff] }
 0x174   : > { %3575 = vmatpush1.bf16.msra.mxu0 %v3574_v7  ;;  %v962_v7 = vld [vmem:[%s7712_s1 + $0x328] sm:$0xff]  ;;  %v3594_v18 = vpack.c.bf16 %v953_v5, %v949_v4  ;;  %v3674_v4 = vpack.c.bf16 %v987_v2, %v983_v1  ;;  %v2922_v2 = vld [vmem:[%s7712_s1 + $0x520] sm:$0xff] }
 0x175   : > { %3577 = vmatprep.subr.bf16.mxu0 %v3576_v10  ;;  %v951_v10 = vld [vmem:[%s7712_s1 + $0x2d0] sm:$0xff]  ;;  %v2882_v5 = vld [vmem:[%s4535_s20 + $0x8] sm:$0xff] }
 0x176   : > { %3639 = vmatpush1.bf16.msra.mxu1 %v3638_v21  ;;  %v3596_v21 = vpack.c.bf16 %v962_v7, %v958_v6  ;;  %v3658_v28 = vpack.c.bf16 %v955_v13, %v951_v10  ;;  %v2887_v6 = vld [vmem:[%s7712_s1 + $0x408] sm:$0xff]  ;;  %v2890_v10 = vld [vmem:[%s7712_s1 + $0x420] sm:$0xff]  ;;  %v2889_v13 = vld [vmem:[%s7712_s1 + $0x418] sm:$0xff] }
 0x177   : > { %3641 = vmatprep.subr.bf16.mxu1 %v3640_v22  ;;  %v957_v22 = vld [vmem:[%s7712_s1 + $0x300] sm:$0xff]  ;;  %v2891_v7 = vld [vmem:[%s7712_s1 + $0x428] sm:$0xff] }
 0x178   : > { %3579 = vmatpush1.bf16.msra.mxu0 %v3578_v27  ;;  %v970_v27 = vld [vmem:[%s7712_s1 + $0x368] sm:$0xff]  ;;  %v3598_v33 = vpack.c.bf16 %v961_v24, %v957_v22  ;;  %v3740_v22 = vpack.c.bf16 %v2893_v19, %v2889_v13 }
 0x179   : > { %3581 = vmatprep.subr.bf16.mxu0 %v3580_v31  ;;  %v959_v31 = vld [vmem:[%s7712_s1 + $0x310] sm:$0xff]  ;;  %v2927_v13 = vld [vmem:[%s7712_s1 + $0x548] sm:$0xff] }
 0x17a   : > { %3643 = vmatpush1.bf16.msra.mxu1 %v3642_v36  ;;  %v3600_v36 = vpack.c.bf16 %v970_v27, %v966_v26  ;;  %v3662_v41 = vpack.c.bf16 %v963_v32, %v959_v31  ;;  %v2895_v26 = vld [vmem:[%s7712_s1 + $0x448] sm:$0xff]  ;;  %v2898_v31 = vld [vmem:[%s7712_s1 + $0x460] sm:$0xff]  ;;  %v2897_v32 = vld [vmem:[%s7712_s1 + $0x458] sm:$0xff] }
 0x17b   : > { %3645 = vmatprep.subr.bf16.mxu1 %v3644_v37  ;;  %v965_v37 = vld [vmem:[%s7712_s1 + $0x340] sm:$0xff]  ;;  %v2899_v27 = vld [vmem:[%s7712_s1 + $0x468] sm:$0xff] }
 0x17c   : > { %3583 = vmatpush1.bf16.msra.mxu0 %v3582_v40  ;;  %v978_v40 = vld [vmem:[%s7712_s1 + $0x3a8] sm:$0xff]  ;;  %v3602_v45 = vpack.c.bf16 %v969_v38, %v965_v37  ;;  %v2900_v37 = vld [vmem:[%s7712_s1 + $0x470] sm:$0xff] }
 0x17d   : > { %3585 = vmatprep.subr.bf16.mxu0 %v3584_v43  ;;  %v967_v43 = vld [vmem:[%s7712_s1 + $0x350] sm:$0xff]  ;;  %v2903_v38 = vld [vmem:[%s7712_s1 + $0x488] sm:$0xff] }
 0x17e   : > { %3647 = vmatpush1.bf16.msra.mxu1 %v3646_v48  ;;  %v3604_v48 = vpack.c.bf16 %v978_v40, %v974_v39  ;;  %v3666_v53 = vpack.c.bf16 %v971_v44, %v967_v43  ;;  %v2907_v40 = vld [vmem:[%s7712_s1 + $0x4a8] sm:$0xff] }
 0x17f   : > { %3649 = vmatprep.subr.bf16.mxu1 %v3648_v49  ;;  %v973_v49 = vld [vmem:[%s7712_s1 + $0x380] sm:$0xff]  ;;  %v3684_v43 = vpack.c.bf16 %v2907_v40, %v2903_v38  ;;  %v2936_v40 = vld [vmem:[%s7712_s1 + $0x590] sm:$0xff] }
 0x180   : > { %3587 = vmatpush1.bf16.msra.mxu0 %v3586_v52  ;;  %v986_v52 = vld [vmem:[%s7712_s1 + $0x3e8] sm:$0xff]  ;;  %v3606_v57 = vpack.c.bf16 %v977_v50, %v973_v49  ;;  %v2908_v49 = vld [vmem:[%s7712_s1 + $0x4b0] sm:$0xff] }
 0x181   : > { %3589 = vmatprep.subr.bf16.mxu0 %v3588_v55  ;;  %v975_v55 = vld [vmem:[%s7712_s1 + $0x390] sm:$0xff]  ;;  %v2911_v50 = vld [vmem:[%s7712_s1 + $0x4c8] sm:$0xff] }
 0x182   : > { %3651 = vmatpush1.bf16.msra.mxu1 %v3650_v60  ;;  %v3608_v60 = vpack.c.bf16 %v986_v52, %v982_v51  ;;  %v3670_v63 = vpack.c.bf16 %v979_v56, %v975_v55  ;;  %v2915_v51 = vld [vmem:[%s7712_s1 + $0x4e8] sm:$0xff]  ;;  %v3750_v52 = vpack.c.bf16 %v2908_v49, %v2904_v47  ;;  %v2914_v55 = vld [vmem:[%s7712_s1 + $0x4e0] sm:$0xff]  ;;  %v2913_v56 = vld [vmem:[%s7712_s1 + $0x4d8] sm:$0xff] }
 0x183   : > { %3653 = vmatprep.subr.bf16.mxu1 %v3652_v61  ;;  %v981_v61 = vld [vmem:[%s7712_s1 + $0x3c0] sm:$0xff]  ;;  %v2945_v49 = vld [vmem:[%s7712_s1 + $0x5d8] sm:$0xff] }
 0x184   : > { %3591 = vmatpush1.bf16.msra.mxu0 %v3590_v0  ;;  %v3672_v0 = vpack.c.bf16 %v988_v59, %v984_v58  ;;  %v2912_v58 = vld [vmem:[%s7712_s1 + $0x4d0] sm:$0xff]  ;;  %v2942_v47 = vld [vmem:[%s7712_s1 + $0x5c0] sm:$0xff] }
 0x185   : > { %3593 = vmatprep.subr.bf16.mxu0 %v3592_v3  ;;  %v3610_v3 = vpack.c.bf16 %v985_v62, %v981_v61  ;;  %v2916_v59 = vld [vmem:[%s7712_s1 + $0x4f0] sm:$0xff]  ;;  %v2919_v62 = vld [vmem:[%s7712_s1 + $0x508] sm:$0xff] }
 0x186   : > { %3655 = vmatpush1.bf16.msra.mxu1 %v3654_v8  ;;  %v3676_v8 = vpack.c.bf16 %v2891_v7, %v2887_v6 }
 0x187   : > { %3657 = vmatprep.subr.bf16.mxu1 %v3656_v9  ;;  %v2886_v9 = vld [vmem:[%s7712_s1 + $0x400] sm:$0xff] }
 0x188   : > { %3595 = vmatpush1.bf16.msra.mxu0 %v3594_v18  ;;  %v3678_v18 = vpack.c.bf16 %v2890_v10, %v2886_v9  ;;  %v2924_v9 = vld [vmem:[%s7712_s1 + $0x530] sm:$0xff] }
 0x189   : > { %3597 = vmatprep.subr.bf16.mxu0 %v3596_v21  ;;  %v2892_v21 = vld [vmem:[%s7712_s1 + $0x430] sm:$0xff] }
 0x18a   : > { %3659 = vmatpush1.bf16.msra.mxu1 %v3658_v28  ;;  %v3742_v24 = vpack.c.bf16 %v2892_v21, %v2888_v20  ;;  %v2894_v28 = vld [vmem:[%s7712_s1 + $0x440] sm:$0xff] }
 0x18b   : > { %3661 = vmatprep.subr.bf16.mxu1 %v3660_v30  ;;  %v3680_v30 = vpack.c.bf16 %v2899_v27, %v2895_v26  ;;  %v3682_v34 = vpack.c.bf16 %v2898_v31, %v2894_v28  ;;  %v2926_v20 = vld [vmem:[%s7712_s1 + $0x540] sm:$0xff]  ;;  %v2933_v26 = vld [vmem:[%s7712_s1 + $0x578] sm:$0xff]  ;;  %v2928_v27 = vld [vmem:[%s7712_s1 + $0x550] sm:$0xff] }
 0x18c   : > { %3599 = vmatpush1.bf16.msra.mxu0 %v3598_v33  ;;  %v2901_v33 = vld [vmem:[%s7712_s1 + $0x478] sm:$0xff]  ;;  %v2930_v21 = vld [vmem:[%s7712_s1 + $0x560] sm:$0xff]  ;;  %v2932_v28 = vld [vmem:[%s7712_s1 + $0x570] sm:$0xff] }
 0x18d   : > { %3601 = vmatprep.subr.bf16.mxu0 %v3600_v36  ;;  %v3744_v35 = vpack.c.bf16 %v2901_v33, %v2897_v32  ;;  %v2896_v36 = vld [vmem:[%s7712_s1 + $0x450] sm:$0xff]  ;;  %v3762_v31 = vpack.c.bf16 %v2932_v28, %v2928_v27  ;;  %v2935_v32 = vld [vmem:[%s7712_s1 + $0x588] sm:$0xff]  ;;  %v2966_v27 = vld [vmem:[%s7712_s1 + $0x680] sm:$0xff] }
 0x18e   : > { %3663 = vmatpush1.bf16.msra.mxu1 %v3662_v41  ;;  %v3746_v39 = vpack.c.bf16 %v2900_v37, %v2896_v36  ;;  %v2902_v41 = vld [vmem:[%s7712_s1 + $0x480] sm:$0xff]  ;;  %v2939_v33 = vld [vmem:[%s7712_s1 + $0x5a8] sm:$0xff]  ;;  %v2937_v37 = vld [vmem:[%s7712_s1 + $0x598] sm:$0xff] }
 0x18f   : > { %3665 = vmatprep.subr.bf16.mxu1 %v3664_v42  ;;  %v2906_v42 = vld [vmem:[%s7712_s1 + $0x4a0] sm:$0xff] }
 0x190   : > { %3603 = vmatpush1.bf16.msra.mxu0 %v3602_v45  ;;  %v3686_v44 = vpack.c.bf16 %v2906_v42, %v2902_v41  ;;  %v2905_v45 = vld [vmem:[%s7712_s1 + $0x498] sm:$0xff]  ;;  %v2938_v36 = vld [vmem:[%s7712_s1 + $0x5a0] sm:$0xff]  ;;  %v2940_v41 = vld [vmem:[%s7712_s1 + $0x5b0] sm:$0xff] }
 0x191   : > { %3605 = vmatprep.subr.bf16.mxu0 %v3604_v48  ;;  %v3748_v48 = vpack.c.bf16 %v2909_v46, %v2905_v45  ;;  %v2947_v45 = vld [vmem:[%s7712_s1 + $0x5e8] sm:$0xff]  ;;  %v2970_v28 = vld [vmem:[%s7712_s1 + $0x6a0] sm:$0xff] }
 0x192   : > { %3667 = vmatpush1.bf16.msra.mxu1 %v3666_v53  ;;  %v3688_v53 = vpack.c.bf16 %v2915_v51, %v2911_v50  ;;  %v2949_v51 = vld [vmem:[%s7712_s1 + $0x5f8] sm:$0xff] }
 0x193   : > { %3669 = vmatprep.subr.bf16.mxu1 %v3668_v54  ;;  %v2910_v54 = vld [vmem:[%s7712_s1 + $0x4c0] sm:$0xff] }
 0x194   : > { %3607 = vmatpush1.bf16.msra.mxu0 %v3606_v57  ;;  %v2917_v57 = vld [vmem:[%s7712_s1 + $0x4f8] sm:$0xff] }
 0x195   : > { %3609 = vmatprep.subr.bf16.mxu0 %v3608_v60  ;;  %v3690_v60 = vpack.c.bf16 %v2914_v55, %v2910_v54  ;;  %v3752_v61 = vpack.c.bf16 %v2917_v57, %v2913_v56  ;;  %v3768_v54 = vpack.c.bf16 %v2949_v51, %v2945_v49  ;;  %v2951_v56 = vld [vmem:[%s7712_s1 + $0x608] sm:$0xff] }
 0x196   : > { %3671 = vmatpush1.bf16.msra.mxu1 %v3670_v63  ;;  %v2923_v63 = vld [vmem:[%s7712_s1 + $0x528] sm:$0xff] }
 0x197   : > { %3673 = vmatprep.subr.bf16.mxu1 %v3672_v0  ;;  %v2918_v0 = vld [vmem:[%s7712_s1 + $0x500] sm:$0xff]  ;;  %v3692_v1 = vpack.c.bf16 %v2923_v63, %v2919_v62  ;;  %v2955_v57 = vld [vmem:[%s7712_s1 + $0x628] sm:$0xff]  ;;  %v2957_v63 = vld [vmem:[%s7712_s1 + $0x638] sm:$0xff] }
 0x198   : > { %3611 = vmatpush1.bf16.msra.mxu0 %v3610_v3  ;;  %v2921_v3 = vld [vmem:[%s7712_s1 + $0x518] sm:$0xff]  ;;  %v3694_v7 = vpack.c.bf16 %v2922_v2, %v2918_v0  ;;  %v2952_v0 = vld [vmem:[%s7712_s1 + $0x610] sm:$0xff]  ;;  %v2983_v49 = vld [vmem:[%s7712_s1 + $0x708] sm:$0xff] }
 0x199   : > { %3677 = vmatprep.subr.bf16.mxu0 %v3676_v8  ;;  %v2920_v8 = vld [vmem:[%s7712_s1 + $0x510] sm:$0xff] }
 0x19a   : > { %3675 = vmatpush1.bf16.msra.mxu1 %v3674_v4  ;;  %v2925_v4 = vld [vmem:[%s7712_s1 + $0x538] sm:$0xff]  ;;  %v3758_v10 = vpack.c.bf16 %v2924_v9, %v2920_v8  ;;  %v2962_v8 = vld [vmem:[%s7712_s1 + $0x660] sm:$0xff] }
 0x19b   : > { %1055 = vmatmul.mubr.f32.vlgmr.msra.gmra.mrb[4].mxu0 %v2882_v5  ;;  %3741 = vmatprep.subr.bf16.mxu1 %v3740_v22  ;;  %v3756_v6 = vpack.c.bf16 %v2925_v4, %v2921_v3  ;;  %v2929_v22 = vld [vmem:[%s7712_s1 + $0x558] sm:$0xff]  ;;  %v2959_v4 = vld [vmem:[%s7712_s1 + $0x648] sm:$0xff] }
 0x19c   : > { %3679 = vmatpush1.bf16.msra.mxu0 %v3678_v18  ;;  %v2931_v18 = vld [vmem:[%s7712_s1 + $0x568] sm:$0xff]  ;;  %v2961_v9 = vld [vmem:[%s7712_s1 + $0x658] sm:$0xff] }
 0x19d   : > { %1126 = vmatmul.mubr.f32.vlgmr.msra.gmra.mrb[4].mxu1 %v2882_v5  ;;  %3681 = vmatprep.subr.bf16.mxu0 %v3680_v30  ;;  %v3754_v5 = vpack.c.bf16 %v2916_v59, %v2912_v58  ;;  %v3696_v19 = vpack.c.bf16 %v2931_v18, %v2927_v13  ;;  %v3760_v30 = vpack.c.bf16 %v2933_v26, %v2929_v22  ;;  %v2950_v59 = vld [vmem:[%s7712_s1 + $0x600] sm:$0xff]  ;;  %v2965_v13 = vld [vmem:[%s7712_s1 + $0x678] sm:$0xff]  ;;  %v2960_v18 = vld [vmem:[%s7712_s1 + $0x650] sm:$0xff] }
 0x19e   : > { %3743 = vmatpush1.bf16.msra.mxu1 %v3742_v24  ;;  %v3698_v24 = vpack.c.bf16 %v2930_v21, %v2926_v20  ;;  %v3708_v58 = vpack.c.bf16 %v2955_v57, %v2951_v56  ;;  %v3776_v20 = vpack.c.bf16 %v2965_v13, %v2961_v9  ;;  %v2967_v22 = vld [vmem:[%s7712_s1 + $0x688] sm:$0xff]  ;;  %v2989_v56 = vld [vmem:[%s7712_s1 + $0x738] sm:$0xff]  ;;  %v2984_v57 = vld [vmem:[%s7712_s1 + $0x710] sm:$0xff] }
 0x19f   : > { %3745 = vmatprep.subr.bf16.mxu1 %v3744_v35  ;;  %v2934_v35 = vld [vmem:[%s7712_s1 + $0x580] sm:$0xff]  ;;  %v2999_v9 = vld [vmem:[%s7712_s1 + $0x788] sm:$0xff] }
 0x1a0   : > { %3683 = vmatpush1.bf16.msra.mxu0 %v3682_v34  ;;  %v3700_v34 = vpack.c.bf16 %v2939_v33, %v2935_v32  ;;  %v3702_v38 = vpack.c.bf16 %v2938_v36, %v2934_v35  ;;  %v2973_v32 = vld [vmem:[%s7712_s1 + $0x6b8] sm:$0xff]  ;;  %v2968_v33 = vld [vmem:[%s7712_s1 + $0x690] sm:$0xff]  ;;  %v2998_v13 = vld [vmem:[%s7712_s1 + $0x780] sm:$0xff] }
 0x1a1   : > { %3685 = vmatprep.subr.bf16.mxu0 %v3684_v43  ;;  %v3766_v43 = vpack.c.bf16 %v2940_v41, %v2936_v40  ;;  %v2974_v40 = vld [vmem:[%s7712_s1 + $0x6c0] sm:$0xff] }
 0x1a2   : > { %3747 = vmatpush1.bf16.msra.mxu1 %v3746_v39  ;;  %v2941_v39 = vld [vmem:[%s7712_s1 + $0x5b8] sm:$0xff]  ;;  %v2978_v41 = vld [vmem:[%s7712_s1 + $0x6e0] sm:$0xff] }
 0x1a3   : > { %3749 = vmatprep.subr.bf16.mxu1 %v3748_v48  ;;  %v3764_v42 = vpack.c.bf16 %v2941_v39, %v2937_v37  ;;  %v2946_v48 = vld [vmem:[%s7712_s1 + $0x5e0] sm:$0xff]  ;;  %v2975_v37 = vld [vmem:[%s7712_s1 + $0x6c8] sm:$0xff] }
 0x1a4   : > { %3687 = vmatpush1.bf16.msra.mxu0 %v3686_v44  ;;  %v2943_v44 = vld [vmem:[%s7712_s1 + $0x5c8] sm:$0xff]  ;;  %v3706_v50 = vpack.c.bf16 %v2946_v48, %v2942_v47 }
 0x1a5   : > { %3689 = vmatprep.subr.bf16.mxu0 %v3688_v53  ;;  %v3704_v46 = vpack.c.bf16 %v2947_v45, %v2943_v44  ;;  %v2948_v53 = vld [vmem:[%s7712_s1 + $0x5f0] sm:$0xff]  ;;  %v2981_v44 = vld [vmem:[%s7712_s1 + $0x6f8] sm:$0xff] }
 0x1a6   : > { %3751 = vmatpush1.bf16.msra.mxu1 %v3750_v52  ;;  %v2944_v52 = vld [vmem:[%s7712_s1 + $0x5d0] sm:$0xff] }
 0x1a7   : > { %3753 = vmatprep.subr.bf16.mxu1 %v3752_v61  ;;  %v3770_v55 = vpack.c.bf16 %v2948_v53, %v2944_v52  ;;  %v2953_v61 = vld [vmem:[%s7712_s1 + $0x618] sm:$0xff]  ;;  %v2976_v45 = vld [vmem:[%s7712_s1 + $0x6d0] sm:$0xff]  ;;  %v2982_v52 = vld [vmem:[%s7712_s1 + $0x700] sm:$0xff] }
 0x1a8   : > { %3691 = vmatpush1.bf16.msra.mxu0 %v3690_v60  ;;  %v2954_v60 = vld [vmem:[%s7712_s1 + $0x620] sm:$0xff]  ;;  %v3772_v2 = vpack.c.bf16 %v2957_v63, %v2953_v61  ;;  %v2991_v61 = vld [vmem:[%s7712_s1 + $0x748] sm:$0xff] }
 0x1a9   : > { %3693 = vmatprep.subr.bf16.mxu0 %v3692_v1  ;;  %v3710_v62 = vpack.c.bf16 %v2954_v60, %v2950_v59  ;;  %v2956_v1 = vld [vmem:[%s7712_s1 + $0x630] sm:$0xff]  ;;  %v2986_v53 = vld [vmem:[%s7712_s1 + $0x720] sm:$0xff] }
 0x1aa   : > { %3755 = vmatpush1.bf16.msra.mxu1 %v3754_v5  ;;  %v3774_v3 = vpack.c.bf16 %v2956_v1, %v2952_v0  ;;  %v2963_v5 = vld [vmem:[%s7712_s1 + $0x668] sm:$0xff]  ;;  %v2990_v0 = vld [vmem:[%s7712_s1 + $0x740] sm:$0xff] }
 0x1ab   : > { %3757 = vmatprep.subr.bf16.mxu1 %v3756_v6  ;;  %v3712_v6 = vpack.c.bf16 %v2963_v5, %v2959_v4  ;;  %v2994_v1 = vld [vmem:[%s7712_s1 + $0x760] sm:$0xff]  ;;  %v2997_v4 = vld [vmem:[%s7712_s1 + $0x778] sm:$0xff]  ;;  %v2992_v5 = vld [vmem:[%s7712_s1 + $0x750] sm:$0xff] }
 0x1ac   : > { %3695 = vmatpush1.bf16.msra.mxu0 %v3694_v7  ;;  %v2958_v7 = vld [vmem:[%s7712_s1 + $0x640] sm:$0xff] }
 0x1ad   : > { %3697 = vmatprep.subr.bf16.mxu0 %v3696_v19  ;;  %v2964_v19 = vld [vmem:[%s7712_s1 + $0x670] sm:$0xff] }
 0x1ae   : > { %3759 = vmatpush1.bf16.msra.mxu1 %v3758_v10  ;;  %v3714_v10 = vpack.c.bf16 %v2962_v8, %v2958_v7  ;;  %v3778_v21 = vpack.c.bf16 %v2964_v19, %v2960_v18  ;;  %v3002_v19 = vld [vmem:[%s7712_s1 + $0x7a0] sm:$0xff] }
 0x1af   : > { %3761 = vmatprep.subr.bf16.mxu1 %v3760_v30  ;;  %v2969_v30 = vld [vmem:[%s7712_s1 + $0x698] sm:$0xff] }
 0x1b0   : > { %3699 = vmatpush1.bf16.msra.mxu0 %v3698_v24  ;;  %v2971_v24 = vld [vmem:[%s7712_s1 + $0x6a8] sm:$0xff]  ;;  %v3780_v35 = vpack.c.bf16 %v2973_v32, %v2969_v30  ;;  %v3006_v32 = vld [vmem:[%s7712_s1 + $0x7c0] sm:$0xff] }
 0x1b1   : > { %3701 = vmatprep.subr.bf16.mxu0 %v3700_v34  ;;  %v3716_v26 = vpack.c.bf16 %v2971_v24, %v2967_v22  ;;  %v2972_v34 = vld [vmem:[%s7712_s1 + $0x6b0] sm:$0xff]  ;;  %v3734_v22 = vpack.c.bf16 %v3002_v19, %v2998_v13 }
 0x1b2   : > { %3763 = vmatpush1.bf16.msra.mxu1 %v3762_v31  ;;  %v3718_v31 = vpack.c.bf16 %v2970_v28, %v2966_v27  ;;  %v3782_v36 = vpack.c.bf16 %v2972_v34, %v2968_v33  ;;  %v3004_v27 = vld [vmem:[%s7712_s1 + $0x7b0] sm:$0xff]  ;;  %v3007_v28 = vld [vmem:[%s7712_s1 + $0x7c8] sm:$0xff]  ;;  %v3010_v33 = vld [vmem:[%s7712_s1 + $0x7e0] sm:$0xff] }
 0x1b3   : > { %3765 = vmatprep.subr.bf16.mxu1 %v3764_v42  ;;  %v2977_v42 = vld [vmem:[%s7712_s1 + $0x6d8] sm:$0xff] }
 0x1b4   : > { %3703 = vmatpush1.bf16.msra.mxu0 %v3702_v38  ;;  %v2979_v38 = vld [vmem:[%s7712_s1 + $0x6e8] sm:$0xff]  ;;  %v3784_v47 = vpack.c.bf16 %v2981_v44, %v2977_v42 }
 0x1b5   : > { %3705 = vmatprep.subr.bf16.mxu0 %v3704_v46  ;;  %v3720_v39 = vpack.c.bf16 %v2979_v38, %v2975_v37  ;;  %v2980_v46 = vld [vmem:[%s7712_s1 + $0x6f0] sm:$0xff]  ;;  %v3738_v38 = vpack.c.bf16 %v3010_v33, %v3006_v32  ;;  %v1466_v42 = vld [vmem:[%s7712_s1 + $0x28] sm:$0xff] }
 0x1b6   : > { %3767 = vmatpush1.bf16.msra.mxu1 %v3766_v43  ;;  %v3722_v43 = vpack.c.bf16 %v2978_v41, %v2974_v40  ;;  %v3786_v48 = vpack.c.bf16 %v2980_v46, %v2976_v45  ;;  %v3008_v37 = vld [vmem:[%s7712_s1 + $0x7d0] sm:$0xff]  ;;  %v1462_v41 = vld [vmem:[%s7712_s1 + $0x8] sm:$0xff]  ;;  %v2747_v45 = vld [vmem:[%s7713_s2 + $0x4] sm:$0xf] }
 0x1b7   : > { %3769 = vmatprep.subr.bf16.mxu1 %v3768_v54  ;;  %v2985_v54 = vld [vmem:[%s7712_s1 + $0x718] sm:$0xff]  ;;  %v3012_v40 = vld [vmem:[%s7712_s1 + $0x7f0] sm:$0xff] }
 0x1b8   : > { %3707 = vmatpush1.bf16.msra.mxu0 %v3706_v50  ;;  %v2987_v50 = vld [vmem:[%s7712_s1 + $0x728] sm:$0xff]  ;;  %v3788_v59 = vpack.c.bf16 %v2989_v56, %v2985_v54  ;;  %v3802_v44 = vpack.c.bf16 %v3012_v40, %v3008_v37  ;;  %v1464_v46 = vld [vmem:[%s7712_s1 + $0x18] sm:$0xff]  ;;  %v1151_v40 = vld [vmem:[#allocation3] sm:$0xff] }
 0x1b9   : > { %3709 = vmatprep.subr.bf16.mxu0 %v3708_v58  ;;  %v3724_v51 = vpack.c.bf16 %v2987_v50, %v2983_v49  ;;  %v2988_v58 = vld [vmem:[%s7712_s1 + $0x730] sm:$0xff]  ;;  %v6126_v49 = vrot.slane %v2747_v45, %v217_v12  ;;  %v6130_v50 = vrot.slane %v2747_v45, %v221_v14  ;;  %v6141_v14 = vrot.slane %v2747_v45, %v225_v25 }
 0x1ba   : > { %3771 = vmatpush1.bf16.msra.mxu1 %v3770_v55  ;;  %v3726_v55 = vpack.c.bf16 %v2986_v53, %v2982_v52  ;;  %v3790_v60 = vpack.c.bf16 %v2988_v58, %v2984_v57 }
 0x1bb   : > { %3773 = vmatprep.subr.bf16.mxu1 %v3772_v2  ;;  %v2993_v2 = vld [vmem:[%s7712_s1 + $0x758] sm:$0xff] }
 0x1bc   : > { %3711 = vmatpush1.bf16.msra.mxu0 %v3710_v62  ;;  %v2995_v62 = vld [vmem:[%s7712_s1 + $0x768] sm:$0xff]  ;;  %v3792_v7 = vpack.c.bf16 %v2997_v4, %v2993_v2 }
 0x1bd   : > { %3713 = vmatprep.subr.bf16.mxu0 %v3712_v6  ;;  %v3728_v63 = vpack.c.bf16 %v2995_v62, %v2991_v61  ;;  %v2996_v6 = vld [vmem:[%s7712_s1 + $0x770] sm:$0xff] }
 0x1be   : > { %3775 = vmatpush1.bf16.msra.mxu1 %v3774_v3  ;;  %v3730_v3 = vpack.c.bf16 %v2994_v1, %v2990_v0  ;;  %v3794_v8 = vpack.c.bf16 %v2996_v6, %v2992_v5 }
 0x1bf   : > { %3777 = vmatprep.subr.bf16.mxu1 %v3776_v20  ;;  %v3001_v20 = vld [vmem:[%s7712_s1 + $0x798] sm:$0xff] }
 0x1c0   : > { %3715 = vmatpush1.bf16.msra.mxu0 %v3714_v10  ;;  %v3003_v10 = vld [vmem:[%s7712_s1 + $0x7a8] sm:$0xff] }
 0x1c1   : > { %3717 = vmatprep.subr.bf16.mxu0 %v3716_v26  ;;  %v3732_v18 = vpack.c.bf16 %v3003_v10, %v2999_v9  ;;  %v3000_v26 = vld [vmem:[%s7712_s1 + $0x790] sm:$0xff] }
 0x1c2   : > { %3779 = vmatpush1.bf16.msra.mxu1 %v3778_v21  ;;  %v3005_v21 = vld [vmem:[%s7712_s1 + $0x7b8] sm:$0xff]  ;;  %v3798_v30 = vpack.c.bf16 %v3004_v27, %v3000_v26 }
 0x1c3   : > { %3781 = vmatprep.subr.bf16.mxu1 %v3780_v35  ;;  %v3796_v24 = vpack.c.bf16 %v3005_v21, %v3001_v20  ;;  %v3009_v35 = vld [vmem:[%s7712_s1 + $0x7d8] sm:$0xff] }
 0x1c4   : > { %3719 = vmatpush1.bf16.msra.mxu0 %v3718_v31  ;;  %v3011_v31 = vld [vmem:[%s7712_s1 + $0x7e8] sm:$0xff] }
 0x1c5   : > { %3721 = vmatprep.subr.bf16.mxu0 %v3720_v39  ;;  %v3736_v34 = vpack.c.bf16 %v3011_v31, %v3007_v28 }
 0x1c6   : > { %3783 = vmatpush1.bf16.msra.mxu1 %v3782_v36  ;;  %v3013_v36 = vld [vmem:[%s7712_s1 + $0x7f8] sm:$0xff] }
 0x1c7   : > { %3785 = vmatprep.subr.bf16.mxu1 %v3784_v47  ;;  %v3800_v39 = vpack.c.bf16 %v3013_v36, %v3009_v35  ;;  %v1468_v47 = vld [vmem:[%s7712_s1 + $0x38] sm:$0xff] }
 0x1c8   : > { %3723 = vmatpush1.bf16.msra.mxu0 %v3722_v43  ;;  %v3804_v43 = vpack.c.bf16 %v1466_v42, %v1462_v41 }
 0x1c9   : > { %3725 = vmatprep.subr.bf16.mxu0 %v3724_v51 }
 0x1ca   : > { %3787 = vmatpush1.bf16.msra.mxu1 %v3786_v48  ;;  %v3868_v48 = vpack.c.bf16 %v1468_v47, %v1464_v46  ;;  %v1470_v47 = vld [vmem:[%s7712_s1 + $0x48] sm:$0xff] }
 0x1cb   : > { %3789 = vmatprep.subr.bf16.mxu1 %v3788_v59  ;;  %v6136_v59 = vrot.slane %v2747_v45, %v229_v17  ;;  %v1465_v45 = vld [vmem:[%s7712_s1 + $0x20] sm:$0xff] }
 0x1cc   : > { %3727 = vmatpush1.bf16.msra.mxu0 %v3726_v55 }
 0x1cd   : > { %3729 = vmatprep.subr.bf16.mxu0 %v3728_v63 }
 0x1ce   : > { %3791 = vmatpush1.bf16.msra.mxu1 %v3790_v60 }
 0x1cf   : > { %3793 = vmatprep.subr.bf16.mxu1 %v3792_v7 }
 0x1d0   : > { %3731 = vmatpush1.bf16.msra.mxu0 %v3730_v3  ;;  %v850_v3 = vld [vmem:[#allocation3 + $0x8] sm:$0xff] }
 0x1d1   : > { %3733 = vmatprep.subr.bf16.mxu0 %v3732_v18 }
 0x1d2   : > { %3795 = vmatpush1.bf16.msra.mxu1 %v3794_v8 }
 0x1d3   : > { %3797 = vmatprep.subr.bf16.mxu1 %v3796_v24 }
 0x1d4   : > { %3735 = vmatpush1.bf16.msra.mxu0 %v3734_v22 }
 0x1d5   : > { %3737 = vmatprep.subr.bf16.mxu0 %v3736_v34 }
 0x1d6   : > { %3799 = vmatpush1.bf16.msra.mxu1 %v3798_v30 }
 0x1d7   : > { %3801 = vmatprep.subr.bf16.mxu1 %v3800_v39 }
 0x1d8   : > { %3739 = vmatpush1.bf16.msra.mxu0 %v3738_v38 }
 0x1d9   : > { %3805 = vmatprep.subr.bf16.mxu0 %v3804_v43 }
 0x1da   : > { %3803 = vmatpush1.bf16.msra.mxu1 %v3802_v44  ;;  %v1461_v44 = vld [vmem:[%s7712_s1] sm:$0xff] }
 0x1db   : > { %3869 = vmatprep.subr.bf16.mxu1 %v3868_v48  ;;  %v1474_v48 = vld [vmem:[%s7712_s1 + $0x68] sm:$0xff] }
 0x22e   : > { %v754_v51 = vpop.f32.mrb[2].mxu0  ;;  %v825_v52 = vpop.f32.mrb[2].mxu1 }
 0x22f   : > { %v755_v53 = vadd.f32 %v754_v51, %v6126_v49  ;;  %v756_v54 = vpop.f32.mrb[3].mxu0  ;;  %v827_v55 = vpop.f32.mrb[3].mxu1  ;;  %v826_v61 = vadd.f32 %v825_v52, %v6141_v14  ;;  %v1463_v51 = vld [vmem:[%s7712_s1 + $0x10] sm:$0xff] }
 0x230   : > { %v757_v56 = vadd.f32 %v756_v54, %v6130_v50  ;;  %v828_v12 = vadd.f32 %v827_v55, %v6136_v59  ;;  %v1467_v52 = vld [vmem:[%s7712_s1 + $0x30] sm:$0xff]  ;;  %v3806_v54 = vpack.c.bf16 %v1465_v45, %v1461_v44  ;;  %v1472_v55 = vld [vmem:[%s7712_s1 + $0x58] sm:$0xff] }
 0x231   : > { %v2879_v57 = vmul.f32 -1.442695, %v755_v53  ;;  %v1499_v44 = vld [vmem:[%s7712_s1 + $0x130] sm:$0xff] }
 0x232   : > { %v2880_v58 = vmul.f32 -1.442695, %v757_v56  ;;  %v2881_v60 = vmul.f32 -1.442695, %v828_v12  ;;  %v1476_v56 = vld [vmem:[%s7712_s1 + $0x78] sm:$0xff]  ;;  %v1469_v12 = vld [vmem:[%s7712_s1 + $0x40] sm:$0xff] }
 0x233   : > { %4357 = vpow2.f32 %v2879_v57 }
 0x234   : > { %4359 = vpow2.f32 %v2880_v58  ;;  %v3808_v58 = vpack.c.bf16 %v1474_v48, %v1470_v47  ;;  %v1508_v47 = vld [vmem:[%s7712_s1 + $0x178] sm:$0xff] }
 0x235   : > { %4361 = vpow2.f32 %v2881_v60  ;;  %v1473_v60 = vld [vmem:[%s7712_s1 + $0x60] sm:$0xff] }
 0x236   : > { %4363 = vtanh.f32 %v826_v61  ;;  %v1478_v61 = vld [vmem:[%s7712_s1 + $0x88] sm:$0xff] }
 0x23d   : > { %v4358_v62 = vpop.eup %4357 }
 0x23e   : > { %v4360_v63 = vpop.eup %4359  ;;  %v833_v0 = vadd.f32 1.0, %v4358_v62  ;;  %v1482_v62 = vld [vmem:[%s7712_s1 + $0xa8] sm:$0xff] }
 0x23f   : > { %v839_v1 = vadd.f32 1.0, %v4360_v63  ;;  %v4362_v17 = vpop.eup %4361  ;;  %v3870_v63 = vpack.c.bf16 %v1467_v52, %v1463_v51  ;;  %v1501_v51 = vld [vmem:[%s7712_s1 + $0x140] sm:$0xff] }
 0x240   : > { %4365 = vrcp.f32 %v833_v0  ;;  %v4364_v2 = vpop.eup %4363  ;;  %v846_v25 = vadd.f32 1.0, %v4362_v17  ;;  %v3872_v0 = vpack.c.bf16 %v1476_v56, %v1472_v55  ;;  %v1475_v17 = vld [vmem:[%s7712_s1 + $0x70] sm:$0xff]  ;;  %v1505_v52 = vld [vmem:[%s7712_s1 + $0x160] sm:$0xff] }
 0x241   : > { %4367 = vrcp.f32 %v839_v1  ;;  %v1471_v1 = vld [vmem:[%s7712_s1 + $0x50] sm:$0xff] }
 0x242   : > { %4369 = vrcp.f32 %v846_v25  ;;  %v1481_v25 = vld [vmem:[%s7712_s1 + $0xa0] sm:$0xff] }
 0x24a   : > { %v4366_v4 = vpop.eup %4365 }
 0x24b   : > { %v4368_v5 = vpop.eup %4367  ;;  %v852_v11 = vmul.f32 %v4366_v4, %v4364_v2  ;;  %v3810_v2 = vpack.c.bf16 %v1473_v60, %v1469_v12  ;;  %v1484_v4 = vld [vmem:[%s7712_s1 + $0xb8] sm:$0xff]  ;;  %v3826_v12 = vpack.c.bf16 %v1505_v52, %v1501_v51 }
 0x24c   : > { %v851_v6 = vmul.f32 %v4368_v5, %v850_v3  ;;  %v4370_v8 = vpop.eup %4369  ;;  %v1480_v3 = vld [vmem:[%s7712_s1 + $0x98] sm:$0xff]  ;;  %v3812_v5 = vpack.c.bf16 %v1482_v62, %v1478_v61 }
 0x24d   : > { %v1512_v60 = vld [vmem:[%s7712_s1 + $0x198] sm:$0xff] }
 0x24e   : > { %v853_v7 = vadd.f32 %v852_v11, %v851_v6  ;;  %v1477_v11 = vld [vmem:[%s7712_s1 + $0x80] sm:$0xff]  ;;  %v1486_v6 = vld [vmem:[%s7712_s1 + $0xc8] sm:$0xff]  ;;  %v1516_v61 = vld [vmem:[%s7712_s1 + $0x1b8] sm:$0xff] }
 0x24f   : > { %v1544_v52 = vld [vmem:[%s7712_s1 + $0x298] sm:$0xff] }
 0x250   : > { %4371 = vtanh.f32 %v853_v7  ;;  %856 = vst [vmem:[#allocation3 + $0x8] sm:$0xff] %v853_v7  ;;  %v1490_v7 = vld [vmem:[%s7712_s1 + $0xe8] sm:$0xff] }
 0x25a   : > { %v4372_v9 = vpop.eup %4371 }
 0x25b   : > { %v855_v10 = vmul.f32 %v4372_v9, %v4370_v8  ;;  %v3874_v8 = vpack.c.bf16 %v1475_v17, %v1471_v1  ;;  %v3876_v9 = vpack.c.bf16 %v1484_v4, %v1480_v3  ;;  %v1518_v1 = vld [vmem:[%s7712_s1 + $0x1c8] sm:$0xff]  ;;  %v3892_v3 = vpack.c.bf16 %v1516_v61, %v1512_v60  ;;  %v1511_v4 = vld [vmem:[%s7712_s1 + $0x190] sm:$0xff] }
 0x25c   : > { %v1522_v17 = vld [vmem:[%s7712_s1 + $0x1e8] sm:$0xff]  ;;  %v1543_v61 = vld [vmem:[%s7712_s1 + $0x290] sm:$0xff] }
 0x25d   : > { %858 = vst [vmem:[%s4540_s23] sm:$0xff] %v855_v10  ;;  %1352 = vmatprep.mubr.f32.mxu0 %v855_v10  ;;  %1423 = vmatprep.mubr.f32.mxu1 %v855_v10  ;;  %v1479_v10 = vld [vmem:[%s7712_s1 + $0x90] sm:$0xff] }
 0x26e   : > { %v1056_v13 = vpop.f32.mrb[4].mxu0 }
 0x26f   : > { %v1057_v18 = vadd.f32 %v1056_v13, %v5332_v15  ;;  %v1058_v19 = vpop.f32.mrb[5].mxu0  ;;  %v1483_v13 = vld [vmem:[%s7712_s1 + $0xb0] sm:$0xff] }
 0x270   : > { %v1059_v20 = vadd.f32 %v1058_v19, %v5336_v16  ;;  %v1127_v21 = vpop.f32.mrb[4].mxu1  ;;  %v1488_v19 = vld [vmem:[%s7712_s1 + $0xd8] sm:$0xff] }
 0x271   : > { %v2883_v22 = vmul.f32 -1.442695, %v1057_v18  ;;  %v1129_v24 = vpop.f32.mrb[5].mxu1  ;;  %v1128_v30 = vadd.f32 %v1127_v21, %v5349_v29  ;;  %v3814_v18 = vpack.c.bf16 %v1481_v25, %v1477_v11  ;;  %v3816_v21 = vpack.c.bf16 %v1490_v7, %v1486_v6  ;;  %v1520_v25 = vld [vmem:[%s7712_s1 + $0x1d8] sm:$0xff] }
 0x272   : > { %v2884_v26 = vmul.f32 -1.442695, %v1059_v20  ;;  %v1130_v27 = vadd.f32 %v1129_v24, %v5343_v23  ;;  %v1492_v20 = vld [vmem:[%s7712_s1 + $0xf8] sm:$0xff]  ;;  %v1489_v24 = vld [vmem:[%s7712_s1 + $0xe0] sm:$0xff]  ;;  %v3832_v7 = vpack.c.bf16 %v1522_v17, %v1518_v1 }
 0x273   : > { %4373 = vpow2.f32 %v2883_v22  ;;  %v1485_v22 = vld [vmem:[%s7712_s1 + $0xc0] sm:$0xff]  ;;  %v1524_v6 = vld [vmem:[%s7712_s1 + $0x1f8] sm:$0xff] }
 0x274   : > { %4375 = vpow2.f32 %v2884_v26  ;;  %v2885_v28 = vmul.f32 -1.442695, %v1130_v27  ;;  %v1494_v26 = vld [vmem:[%s7712_s1 + $0x108] sm:$0xff]  ;;  %v1556_v1 = vld [vmem:[%s7712_s1 + $0x2f8] sm:$0xff] }
 0x275   : > { %v1498_v27 = vld [vmem:[%s7712_s1 + $0x128] sm:$0xff] }
 0x276   : > { %4377 = vpow2.f32 %v2885_v28  ;;  %v3878_v28 = vpack.c.bf16 %v1483_v13, %v1479_v10  ;;  %v1526_v10 = vld [vmem:[%s7712_s1 + $0x208] sm:$0xff] }
 0x277   : > { %4379 = vtanh.f32 %v1128_v30  ;;  %v3880_v30 = vpack.c.bf16 %v1492_v20, %v1488_v19  ;;  %v1530_v13 = vld [vmem:[%s7712_s1 + $0x228] sm:$0xff]  ;;  %v3896_v19 = vpack.c.bf16 %v1524_v6, %v1520_v25  ;;  %v1519_v20 = vld [vmem:[%s7712_s1 + $0x1d0] sm:$0xff] }
 0x278   : > { %v1551_v6 = vld [vmem:[%s7712_s1 + $0x2d0] sm:$0xff] }
 0x27d   : > { %v4374_v31 = vpop.eup %4373 }
 0x27e   : > { %v4376_v32 = vpop.eup %4375  ;;  %v1135_v33 = vadd.f32 1.0, %v4374_v31  ;;  %v1487_v31 = vld [vmem:[%s7712_s1 + $0xd0] sm:$0xff] }
 0x27f   : > { %v1141_v34 = vadd.f32 1.0, %v4376_v32  ;;  %v1491_v32 = vld [vmem:[%s7712_s1 + $0xf0] sm:$0xff] }
 0x280   : > { %4381 = vrcp.f32 %v1135_v33  ;;  %v4378_v35 = vpop.eup %4377  ;;  %v3818_v33 = vpack.c.bf16 %v1489_v24, %v1485_v22  ;;  %v1528_v24 = vld [vmem:[%s7712_s1 + $0x218] sm:$0xff] }
 0x281   : > { %4383 = vrcp.f32 %v1141_v34  ;;  %v4380_v36 = vpop.eup %4379  ;;  %v1148_v38 = vadd.f32 1.0, %v4378_v35  ;;  %v1496_v34 = vld [vmem:[%s7712_s1 + $0x118] sm:$0xff] }
 0x282   : > { %v1500_v35 = vld [vmem:[%s7712_s1 + $0x138] sm:$0xff] }
 0x283   : > { %4385 = vrcp.f32 %v1148_v38  ;;  %v1497_v38 = vld [vmem:[%s7712_s1 + $0x120] sm:$0xff] }
 0x28a   : > { %v4382_v37 = vpop.eup %4381 }
 0x28b   : > { %v4384_v39 = vpop.eup %4383  ;;  %v1153_v41 = vmul.f32 %v4382_v37, %v4380_v36  ;;  %v3820_v36 = vpack.c.bf16 %v1498_v27, %v1494_v26  ;;  %v1493_v37 = vld [vmem:[%s7712_s1 + $0x100] sm:$0xff]  ;;  %v1532_v26 = vld [vmem:[%s7712_s1 + $0x238] sm:$0xff]  ;;  %v3836_v27 = vpack.c.bf16 %v1530_v13, %v1526_v10 }
 0x28c   : > { %v1152_v42 = vmul.f32 %v4384_v39, %v1151_v40  ;;  %v1502_v39 = vld [vmem:[%s7712_s1 + $0x148] sm:$0xff]  ;;  %v3822_v45 = vpack.c.bf16 %v1497_v38, %v1493_v37  ;;  %v1536_v38 = vld [vmem:[%s7712_s1 + $0x258] sm:$0xff] }
 0x28d   : > { %v4386_v46 = vpop.eup %4385  ;;  %v1506_v40 = vld [vmem:[%s7712_s1 + $0x168] sm:$0xff]  ;;  %v1564_v10 = vld [vmem:[%s7712_s1 + $0x338] sm:$0xff] }
 0x28e   : > { %v1154_v43 = vadd.f32 %v1153_v41, %v1152_v42  ;;  %v3882_v41 = vpack.c.bf16 %v1491_v32, %v1487_v31  ;;  %v3884_v42 = vpack.c.bf16 %v1500_v35, %v1496_v34  ;;  %v3824_v48 = vpack.c.bf16 %v1506_v40, %v1502_v39  ;;  %v1534_v31 = vld [vmem:[%s7712_s1 + $0x248] sm:$0xff]  ;;  %v1527_v35 = vld [vmem:[%s7712_s1 + $0x210] sm:$0xff]  ;;  %v1540_v39 = vld [vmem:[%s7712_s1 + $0x278] sm:$0xff] }
 0x28f   : > { %v1538_v32 = vld [vmem:[%s7712_s1 + $0x268] sm:$0xff]  ;;  %v3900_v34 = vpack.c.bf16 %v1532_v26, %v1528_v24  ;;  %v1559_v26 = vld [vmem:[%s7712_s1 + $0x310] sm:$0xff] }
 0x290   : > { %4387 = vtanh.f32 %v1154_v43  ;;  %1157 = vst [vmem:[#allocation3] sm:$0xff] %v1154_v43  ;;  %v1495_v43 = vld [vmem:[%s7712_s1 + $0x110] sm:$0xff]  ;;  %v3840_v40 = vpack.c.bf16 %v1538_v32, %v1534_v31  ;;  %v1572_v31 = vld [vmem:[%s7712_s1 + $0x378] sm:$0xff] }
 0x291   : > { %v3886_v55 = vpack.c.bf16 %v1499_v44, %v1495_v43  ;;  %v1542_v43 = vld [vmem:[%s7712_s1 + $0x288] sm:$0xff] }
 0x292   : > { %v1546_v44 = vld [vmem:[%s7712_s1 + $0x2a8] sm:$0xff] }
 0x29a   : > { %v4388_v53 = vpop.eup %4387 }
 0x29b   : > { %v1156_v57 = vmul.f32 %v4388_v53, %v4386_v46  ;;  %v1504_v46 = vld [vmem:[%s7712_s1 + $0x158] sm:$0xff]  ;;  %v1510_v53 = vld [vmem:[%s7712_s1 + $0x188] sm:$0xff] }
 0x29c   : > { %v3888_v56 = vpack.c.bf16 %v1508_v47, %v1504_v46  ;;  %v3904_v46 = vpack.c.bf16 %v1540_v39, %v1536_v38  ;;  %v1535_v47 = vld [vmem:[%s7712_s1 + $0x250] sm:$0xff] }
 0x29d   : > { %1353 = vmatmul.mubr.f32.vlgmr.msra.gmra.mrb[6].mxu0 %v1156_v57  ;;  %1424 = vmatmul.mubr.f32.vlgmr.msra.gmra.mrb[6].mxu1 %v1156_v57  ;;  %v1567_v39 = vld [vmem:[%s7712_s1 + $0x350] sm:$0xff] }
 0x29e   : > { %3807 = vmatpush1.bf16.msra.mxu0 %v3806_v54  ;;  %1654 = vmatprep.mubr.f32.mxu0 %v1156_v57  ;;  %v1514_v54 = vld [vmem:[%s7712_s1 + $0x1a8] sm:$0xff] }
 0x29f   : > { %3809 = vmatprep.subr.bf16.mxu0 %v3808_v58  ;;  %1725 = vmatprep.mubr.f32.mxu1 %v1156_v57  ;;  %v1503_v57 = vld [vmem:[%s7712_s1 + $0x150] sm:$0xff]  ;;  %v3828_v62 = vpack.c.bf16 %v1514_v54, %v1510_v53  ;;  %v1548_v53 = vld [vmem:[%s7712_s1 + $0x2b8] sm:$0xff]  ;;  %v3844_v54 = vpack.c.bf16 %v1546_v44, %v1542_v43 }
 0x2a0   : > { %3871 = vmatpush1.bf16.msra.mxu1 %v3870_v63  ;;  %v1507_v58 = vld [vmem:[%s7712_s1 + $0x170] sm:$0xff]  ;;  %v1509_v63 = vld [vmem:[%s7712_s1 + $0x180] sm:$0xff]  ;;  %v3908_v60 = vpack.c.bf16 %v1548_v53, %v1544_v52  ;;  %v1580_v43 = vld [vmem:[%s7712_s1 + $0x3b8] sm:$0xff] }
 0x2a1   : > { %3873 = vmatprep.subr.bf16.mxu1 %v3872_v0  ;;  %v1513_v0 = vld [vmem:[%s7712_s1 + $0x1a0] sm:$0xff]  ;;  %v1575_v53 = vld [vmem:[%s7712_s1 + $0x390] sm:$0xff] }
 0x2a2   : > { %3811 = vmatpush1.bf16.msra.mxu0 %v3810_v2  ;;  %v3890_v2 = vpack.c.bf16 %v1507_v58, %v1503_v57  ;;  %v3830_v11 = vpack.c.bf16 %v1513_v0, %v1509_v63  ;;  %v1550_v57 = vld [vmem:[%s7712_s1 + $0x2c8] sm:$0xff]  ;;  %v1552_v0 = vld [vmem:[%s7712_s1 + $0x2d8] sm:$0xff] }
 0x2a3   : > { %3813 = vmatprep.subr.bf16.mxu0 %v3812_v5  ;;  %v1515_v5 = vld [vmem:[%s7712_s1 + $0x1b0] sm:$0xff]  ;;  %v1554_v58 = vld [vmem:[%s7712_s1 + $0x2e8] sm:$0xff]  ;;  %v3912_v25 = vpack.c.bf16 %v1556_v1, %v1552_v0 }
 0x2a4   : > { %3875 = vmatpush1.bf16.msra.mxu1 %v3874_v8  ;;  %v1517_v8 = vld [vmem:[%s7712_s1 + $0x1c0] sm:$0xff]  ;;  %v3848_v17 = vpack.c.bf16 %v1554_v58, %v1550_v57  ;;  %v1588_v57 = vld [vmem:[%s7712_s1 + $0x3f8] sm:$0xff]  ;;  %v1587_v0 = vld [vmem:[%s7712_s1 + $0x3f0] sm:$0xff] }
 0x2a5   : > { %3877 = vmatprep.subr.bf16.mxu1 %v3876_v9  ;;  %v1521_v9 = vld [vmem:[%s7712_s1 + $0x1e0] sm:$0xff] }
 0x2a6   : > { %3815 = vmatpush1.bf16.msra.mxu0 %v3814_v18  ;;  %v3894_v18 = vpack.c.bf16 %v1515_v5, %v1511_v4  ;;  %v3834_v22 = vpack.c.bf16 %v1521_v9, %v1517_v8  ;;  %v1558_v4 = vld [vmem:[%s7712_s1 + $0x308] sm:$0xff]  ;;  %v1560_v9 = vld [vmem:[%s7712_s1 + $0x318] sm:$0xff] }
 0x2a7   : > { %3817 = vmatprep.subr.bf16.mxu0 %v3816_v21  ;;  %v1523_v21 = vld [vmem:[%s7712_s1 + $0x1f0] sm:$0xff]  ;;  %v1562_v5 = vld [vmem:[%s7712_s1 + $0x328] sm:$0xff]  ;;  %v3916_v24 = vpack.c.bf16 %v1564_v10, %v1560_v9 }
 0x2a8   : > { %3879 = vmatpush1.bf16.msra.mxu1 %v3878_v28  ;;  %v1525_v28 = vld [vmem:[%s7712_s1 + $0x200] sm:$0xff]  ;;  %v3852_v13 = vpack.c.bf16 %v1562_v5, %v1558_v4  ;;  %v3027_v4 = vld [vmem:[%s7712_s1 + $0x428] sm:$0xff]  ;;  %v3024_v9 = vld [vmem:[%s7712_s1 + $0x410] sm:$0xff] }
 0x2a9   : > { %3881 = vmatprep.subr.bf16.mxu1 %v3880_v30  ;;  %v1529_v30 = vld [vmem:[%s7712_s1 + $0x220] sm:$0xff]  ;;  %v3028_v10 = vld [vmem:[%s7712_s1 + $0x430] sm:$0xff] }
 0x2aa   : > { %3819 = vmatpush1.bf16.msra.mxu0 %v3818_v33  ;;  %v3898_v33 = vpack.c.bf16 %v1523_v21, %v1519_v20  ;;  %v3838_v37 = vpack.c.bf16 %v1529_v30, %v1525_v28  ;;  %v1566_v20 = vld [vmem:[%s7712_s1 + $0x348] sm:$0xff]  ;;  %v1568_v30 = vld [vmem:[%s7712_s1 + $0x358] sm:$0xff] }
 0x2ab   : > { %3821 = vmatprep.subr.bf16.mxu0 %v3820_v36  ;;  %v1531_v36 = vld [vmem:[%s7712_s1 + $0x230] sm:$0xff]  ;;  %v1570_v21 = vld [vmem:[%s7712_s1 + $0x368] sm:$0xff]  ;;  %v3920_v38 = vpack.c.bf16 %v1572_v31, %v1568_v30 }
 0x2ac   : > { %3883 = vmatpush1.bf16.msra.mxu1 %v3882_v41  ;;  %v1533_v41 = vld [vmem:[%s7712_s1 + $0x240] sm:$0xff]  ;;  %v3856_v32 = vpack.c.bf16 %v1570_v21, %v1566_v20  ;;  %v3035_v20 = vld [vmem:[%s7712_s1 + $0x468] sm:$0xff]  ;;  %v3032_v31 = vld [vmem:[%s7712_s1 + $0x450] sm:$0xff] }
 0x2ad   : > { %3885 = vmatprep.subr.bf16.mxu1 %v3884_v42  ;;  %v1537_v42 = vld [vmem:[%s7712_s1 + $0x260] sm:$0xff] }
 0x2ae   : > { %3823 = vmatpush1.bf16.msra.mxu0 %v3822_v45  ;;  %v3902_v45 = vpack.c.bf16 %v1531_v36, %v1527_v35  ;;  %v3842_v51 = vpack.c.bf16 %v1537_v42, %v1533_v41  ;;  %v1574_v35 = vld [vmem:[%s7712_s1 + $0x388] sm:$0xff]  ;;  %v1576_v42 = vld [vmem:[%s7712_s1 + $0x398] sm:$0xff]  ;;  %v3030_v21 = vld [vmem:[%s7712_s1 + $0x440] sm:$0xff] }
 0x2af   : > { %3825 = vmatprep.subr.bf16.mxu0 %v3824_v48  ;;  %v1539_v48 = vld [vmem:[%s7712_s1 + $0x270] sm:$0xff]  ;;  %v1578_v36 = vld [vmem:[%s7712_s1 + $0x3a8] sm:$0xff]  ;;  %v3924_v52 = vpack.c.bf16 %v1580_v43, %v1576_v42 }
 0x2b0   : > { %3887 = vmatpush1.bf16.msra.mxu1 %v3886_v55  ;;  %v1541_v55 = vld [vmem:[%s7712_s1 + $0x280] sm:$0xff]  ;;  %v3860_v44 = vpack.c.bf16 %v1578_v36, %v1574_v35  ;;  %v3043_v35 = vld [vmem:[%s7712_s1 + $0x4a8] sm:$0xff]  ;;  %v3040_v42 = vld [vmem:[%s7712_s1 + $0x490] sm:$0xff] }
 0x2b1   : > { %3889 = vmatprep.subr.bf16.mxu1 %v3888_v56  ;;  %v1545_v56 = vld [vmem:[%s7712_s1 + $0x2a0] sm:$0xff] }
 0x2b2   : > { %3827 = vmatpush1.bf16.msra.mxu0 %v3826_v12  ;;  %v3906_v12 = vpack.c.bf16 %v1539_v48, %v1535_v47  ;;  %v3846_v63 = vpack.c.bf16 %v1545_v56, %v1541_v55  ;;  %v1582_v47 = vld [vmem:[%s7712_s1 + $0x3c8] sm:$0xff]  ;;  %v1584_v56 = vld [vmem:[%s7712_s1 + $0x3d8] sm:$0xff]  ;;  %v3038_v36 = vld [vmem:[%s7712_s1 + $0x480] sm:$0xff] }
 0x2b3   : > { %3829 = vmatprep.subr.bf16.mxu0 %v3828_v62  ;;  %v1547_v62 = vld [vmem:[%s7712_s1 + $0x2b0] sm:$0xff]  ;;  %v1586_v48 = vld [vmem:[%s7712_s1 + $0x3e8] sm:$0xff] }
 0x2b4   : > { %3891 = vmatpush1.bf16.msra.mxu1 %v3890_v2  ;;  %v1549_v2 = vld [vmem:[%s7712_s1 + $0x2c0] sm:$0xff]  ;;  %v3864_v58 = vpack.c.bf16 %v1586_v48, %v1582_v47 }
 0x2b5   : > { %3893 = vmatprep.subr.bf16.mxu1 %v3892_v3  ;;  %v1553_v3 = vld [vmem:[%s7712_s1 + $0x2e0] sm:$0xff] }
 0x2b6   : > { %3831 = vmatpush1.bf16.msra.mxu0 %v3830_v11  ;;  %v3910_v11 = vpack.c.bf16 %v1547_v62, %v1543_v61  ;;  %v3850_v8 = vpack.c.bf16 %v1553_v3, %v1549_v2  ;;  %v3928_v62 = vpack.c.bf16 %v1588_v57, %v1584_v56  ;;  %v3018_v2 = vld [vmem:[%s4535_s20 + $0x10] sm:$0xff]  ;;  %v3023_v3 = vld [vmem:[%s7712_s1 + $0x408] sm:$0xff] }
 0x2b7   : > { %3833 = vmatprep.subr.bf16.mxu0 %v3832_v7  ;;  %v1555_v7 = vld [vmem:[%s7712_s1 + $0x2f0] sm:$0xff]  ;;  %v3932_v5 = vpack.c.bf16 %v3027_v4, %v3023_v3 }
 0x2b8   : > { %3895 = vmatpush1.bf16.msra.mxu1 %v3894_v18  ;;  %v1557_v18 = vld [vmem:[%s7712_s1 + $0x300] sm:$0xff]  ;;  %v3052_v56 = vld [vmem:[%s7712_s1 + $0x4f0] sm:$0xff] }
 0x2b9   : > { %3897 = vmatprep.subr.bf16.mxu1 %v3896_v19  ;;  %v1561_v19 = vld [vmem:[%s7712_s1 + $0x320] sm:$0xff]  ;;  %v3056_v4 = vld [vmem:[%s7712_s1 + $0x510] sm:$0xff] }
 0x2ba   : > { %3835 = vmatpush1.bf16.msra.mxu0 %v3834_v22  ;;  %v3914_v22 = vpack.c.bf16 %v1555_v7, %v1551_v6  ;;  %v3854_v28 = vpack.c.bf16 %v1561_v19, %v1557_v18  ;;  %v3025_v6 = vld [vmem:[%s7712_s1 + $0x418] sm:$0xff]  ;;  %v3998_v18 = vpack.c.bf16 %v3028_v10, %v3024_v9  ;;  %v3031_v19 = vld [vmem:[%s7712_s1 + $0x448] sm:$0xff]  ;;  %v3066_v9 = vld [vmem:[%s7712_s1 + $0x560] sm:$0xff] }
 0x2bb   : > { %3837 = vmatprep.subr.bf16.mxu0 %v3836_v27  ;;  %v1563_v27 = vld [vmem:[%s7712_s1 + $0x330] sm:$0xff]  ;;  %v3065_v10 = vld [vmem:[%s7712_s1 + $0x558] sm:$0xff] }
 0x2bc   : > { %3899 = vmatpush1.bf16.msra.mxu1 %v3898_v33  ;;  %v1565_v33 = vld [vmem:[%s7712_s1 + $0x340] sm:$0xff] }
 0x2bd   : > { %3901 = vmatprep.subr.bf16.mxu1 %v3900_v34  ;;  %v1569_v34 = vld [vmem:[%s7712_s1 + $0x360] sm:$0xff] }
 0x2be   : > { %3839 = vmatpush1.bf16.msra.mxu0 %v3838_v37  ;;  %v3918_v37 = vpack.c.bf16 %v1563_v27, %v1559_v26  ;;  %v3858_v41 = vpack.c.bf16 %v1569_v34, %v1565_v33  ;;  %v3033_v26 = vld [vmem:[%s7712_s1 + $0x458] sm:$0xff]  ;;  %v3039_v33 = vld [vmem:[%s7712_s1 + $0x488] sm:$0xff] }
 0x2bf   : > { %3841 = vmatprep.subr.bf16.mxu0 %v3840_v40  ;;  %v1571_v40 = vld [vmem:[%s7712_s1 + $0x370] sm:$0xff]  ;;  %v3037_v27 = vld [vmem:[%s7712_s1 + $0x478] sm:$0xff] }
 0x2c0   : > { %3903 = vmatpush1.bf16.msra.mxu1 %v3902_v45  ;;  %v1573_v45 = vld [vmem:[%s7712_s1 + $0x380] sm:$0xff]  ;;  %v4000_v30 = vpack.c.bf16 %v3037_v27, %v3033_v26  ;;  %v3075_v26 = vld [vmem:[%s7712_s1 + $0x5a8] sm:$0xff] }
 0x2c1   : > { %3905 = vmatprep.subr.bf16.mxu1 %v3904_v46  ;;  %v1577_v46 = vld [vmem:[%s7712_s1 + $0x3a0] sm:$0xff] }
 0x2c2   : > { %3843 = vmatpush1.bf16.msra.mxu0 %v3842_v51  ;;  %v3922_v51 = vpack.c.bf16 %v1571_v40, %v1567_v39  ;;  %v3862_v55 = vpack.c.bf16 %v1577_v46, %v1573_v45  ;;  %v3041_v40 = vld [vmem:[%s7712_s1 + $0x498] sm:$0xff]  ;;  %v3047_v45 = vld [vmem:[%s7712_s1 + $0x4c8] sm:$0xff] }
 0x2c3   : > { %3845 = vmatprep.subr.bf16.mxu0 %v3844_v54  ;;  %v1579_v54 = vld [vmem:[%s7712_s1 + $0x3b0] sm:$0xff]  ;;  %v3051_v46 = vld [vmem:[%s7712_s1 + $0x4e8] sm:$0xff] }
 0x2c4   : > { %3907 = vmatpush1.bf16.msra.mxu1 %v3906_v12  ;;  %v1581_v12 = vld [vmem:[%s7712_s1 + $0x3c0] sm:$0xff]  ;;  %v3926_v61 = vpack.c.bf16 %v1579_v54, %v1575_v53  ;;  %v3944_v48 = vpack.c.bf16 %v3051_v46, %v3047_v45  ;;  %v3049_v53 = vld [vmem:[%s7712_s1 + $0x4d8] sm:$0xff]  ;;  %v3080_v46 = vld [vmem:[%s7712_s1 + $0x5d0] sm:$0xff] }
 0x2c5   : > { %3909 = vmatprep.subr.bf16.mxu1 %v3908_v60  ;;  %v1585_v60 = vld [vmem:[%s7712_s1 + $0x3e0] sm:$0xff]  ;;  %v3053_v54 = vld [vmem:[%s7712_s1 + $0x4f8] sm:$0xff] }
 0x2c6   : > { %3847 = vmatpush1.bf16.msra.mxu0 %v3846_v63  ;;  %v1583_v63 = vld [vmem:[%s7712_s1 + $0x3d0] sm:$0xff]  ;;  %v3866_v1 = vpack.c.bf16 %v1585_v60, %v1581_v12  ;;  %v3055_v12 = vld [vmem:[%s7712_s1 + $0x508] sm:$0xff]  ;;  %v3085_v45 = vld [vmem:[%s7712_s1 + $0x5f8] sm:$0xff] }
 0x2c7   : > { %3849 = vmatprep.subr.bf16.mxu0 %v3848_v17  ;;  %v3930_v17 = vpack.c.bf16 %v1587_v0, %v1583_v63  ;;  %v3059_v60 = vld [vmem:[%s7712_s1 + $0x528] sm:$0xff]  ;;  %v3058_v63 = vld [vmem:[%s7712_s1 + $0x520] sm:$0xff]  ;;  %v3057_v0 = vld [vmem:[%s7712_s1 + $0x518] sm:$0xff] }
 0x2c8   : > { %3911 = vmatpush1.bf16.msra.mxu1 %v3910_v11  ;;  %v3022_v11 = vld [vmem:[%s7712_s1 + $0x400] sm:$0xff] }
 0x2c9   : > { %3913 = vmatprep.subr.bf16.mxu1 %v3912_v25  ;;  %v3026_v25 = vld [vmem:[%s7712_s1 + $0x420] sm:$0xff] }
 0x2ca   : > { %3851 = vmatpush1.bf16.msra.mxu0 %v3850_v8  ;;  %v3934_v7 = vpack.c.bf16 %v3026_v25, %v3022_v11  ;;  %v3029_v8 = vld [vmem:[%s7712_s1 + $0x438] sm:$0xff]  ;;  %v3063_v25 = vld [vmem:[%s7712_s1 + $0x548] sm:$0xff] }
 0x2cb   : > { %3853 = vmatprep.subr.bf16.mxu0 %v3852_v13  ;;  %v3996_v13 = vpack.c.bf16 %v3029_v8, %v3025_v6  ;;  %v3067_v6 = vld [vmem:[%s7712_s1 + $0x568] sm:$0xff]  ;;  %v3062_v8 = vld [vmem:[%s7712_s1 + $0x540] sm:$0xff] }
 0x2cc   : > { %3915 = vmatpush1.bf16.msra.mxu1 %v3914_v22  ;;  %v3936_v22 = vpack.c.bf16 %v3035_v20, %v3031_v19  ;;  %v3064_v19 = vld [vmem:[%s7712_s1 + $0x550] sm:$0xff] }
 0x2cd   : > { %3917 = vmatprep.subr.bf16.mxu1 %v3916_v24  ;;  %v3034_v24 = vld [vmem:[%s7712_s1 + $0x460] sm:$0xff]  ;;  %v3068_v20 = vld [vmem:[%s7712_s1 + $0x570] sm:$0xff] }
 0x2ce   : > { %3855 = vmatpush1.bf16.msra.mxu0 %v3854_v28  ;;  %v3938_v28 = vpack.c.bf16 %v3034_v24, %v3030_v21  ;;  %v3071_v24 = vld [vmem:[%s7712_s1 + $0x588] sm:$0xff] }
 0x2cf   : > { %3857 = vmatprep.subr.bf16.mxu0 %v3856_v32  ;;  %v3036_v32 = vld [vmem:[%s7712_s1 + $0x470] sm:$0xff]  ;;  %v3956_v27 = vpack.c.bf16 %v3075_v26, %v3071_v24 }
 0x2d0   : > { %3919 = vmatpush1.bf16.msra.mxu1 %v3918_v37  ;;  %v4002_v34 = vpack.c.bf16 %v3036_v32, %v3032_v31  ;;  %v3042_v37 = vld [vmem:[%s7712_s1 + $0x4a0] sm:$0xff]  ;;  %v3073_v31 = vld [vmem:[%s7712_s1 + $0x598] sm:$0xff]  ;;  %v3104_v24 = vld [vmem:[%s7712_s1 + $0x690] sm:$0xff] }
 0x2d1   : > { %3921 = vmatprep.subr.bf16.mxu1 %v3920_v38  ;;  %v3940_v38 = vpack.c.bf16 %v3043_v35, %v3039_v33  ;;  %v3942_v39 = vpack.c.bf16 %v3042_v37, %v3038_v36  ;;  %v3077_v33 = vld [vmem:[%s7712_s1 + $0x5b8] sm:$0xff]  ;;  %v3076_v35 = vld [vmem:[%s7712_s1 + $0x5b0] sm:$0xff] }
 0x2d2   : > { %3859 = vmatpush1.bf16.msra.mxu0 %v3858_v41  ;;  %v3045_v41 = vld [vmem:[%s7712_s1 + $0x4b8] sm:$0xff]  ;;  %v4020_v36 = vpack.c.bf16 %v3077_v33, %v3073_v31  ;;  %v3108_v26 = vld [vmem:[%s7712_s1 + $0x6b0] sm:$0xff]  ;;  %v3115_v31 = vld [vmem:[%s7712_s1 + $0x6e8] sm:$0xff] }
 0x2d3   : > { %3861 = vmatprep.subr.bf16.mxu0 %v3860_v44  ;;  %v4004_v43 = vpack.c.bf16 %v3045_v41, %v3041_v40  ;;  %v3044_v44 = vld [vmem:[%s7712_s1 + $0x4b0] sm:$0xff]  ;;  %v3078_v41 = vld [vmem:[%s7712_s1 + $0x5c0] sm:$0xff] }
 0x2d4   : > { %3923 = vmatpush1.bf16.msra.mxu1 %v3922_v51  ;;  %v4006_v47 = vpack.c.bf16 %v3044_v44, %v3040_v42  ;;  %v3046_v51 = vld [vmem:[%s7712_s1 + $0x4c0] sm:$0xff] }
 0x2d5   : > { %3925 = vmatprep.subr.bf16.mxu1 %v3924_v52  ;;  %v3050_v52 = vld [vmem:[%s7712_s1 + $0x4e0] sm:$0xff] }
 0x2d6   : > { %3863 = vmatpush1.bf16.msra.mxu0 %v3862_v55  ;;  %v3048_v55 = vld [vmem:[%s7712_s1 + $0x4d0] sm:$0xff]  ;;  %v3946_v57 = vpack.c.bf16 %v3050_v52, %v3046_v51  ;;  %v3082_v42 = vld [vmem:[%s7712_s1 + $0x5e0] sm:$0xff]  ;;  %v3087_v52 = vld [vmem:[%s7712_s1 + $0x608] sm:$0xff] }
 0x2d7   : > { %3865 = vmatprep.subr.bf16.mxu0 %v3864_v58  ;;  %v4008_v58 = vpack.c.bf16 %v3053_v54, %v3049_v53  ;;  %v3962_v44 = vpack.c.bf16 %v3082_v42, %v3078_v41  ;;  %v3091_v53 = vld [vmem:[%s7712_s1 + $0x628] sm:$0xff]  ;;  %v3110_v33 = vld [vmem:[%s7712_s1 + $0x6c0] sm:$0xff] }
 0x2d8   : > { %3927 = vmatpush1.bf16.msra.mxu1 %v3926_v61  ;;  %v3054_v61 = vld [vmem:[%s7712_s1 + $0x500] sm:$0xff]  ;;  %v3964_v54 = vpack.c.bf16 %v3091_v53, %v3087_v52  ;;  %v3119_v42 = vld [vmem:[%s7712_s1 + $0x708] sm:$0xff]  ;;  %v3120_v52 = vld [vmem:[%s7712_s1 + $0x710] sm:$0xff] }
 0x2d9   : > { %3929 = vmatprep.subr.bf16.mxu1 %v3928_v62  ;;  %v3948_v62 = vpack.c.bf16 %v3059_v60, %v3055_v12  ;;  %v3950_v3 = vpack.c.bf16 %v3058_v63, %v3054_v61  ;;  %v3093_v12 = vld [vmem:[%s7712_s1 + $0x638] sm:$0xff]  ;;  %v3088_v60 = vld [vmem:[%s7712_s1 + $0x610] sm:$0xff] }
 0x2da   : > { %3867 = vmatpush1.bf16.msra.mxu0 %v3866_v1  ;;  %v3061_v1 = vld [vmem:[%s7712_s1 + $0x538] sm:$0xff]  ;;  %v3092_v61 = vld [vmem:[%s7712_s1 + $0x630] sm:$0xff] }
 0x2db   : > { %3933 = vmatprep.subr.bf16.mxu0 %v3932_v5  ;;  %v3060_v5 = vld [vmem:[%s7712_s1 + $0x530] sm:$0xff]  ;;  %v4030_v63 = vpack.c.bf16 %v3092_v61, %v3088_v60  ;;  %v3130_v60 = vld [vmem:[%s7712_s1 + $0x760] sm:$0xff]  ;;  %v3129_v61 = vld [vmem:[%s7712_s1 + $0x758] sm:$0xff] }
 0x2dc   : > { %3931 = vmatpush1.bf16.msra.mxu1 %v3930_v17  ;;  %v4010_v17 = vpack.c.bf16 %v3052_v56, %v3048_v55  ;;  %v4014_v11 = vpack.c.bf16 %v3060_v5, %v3056_v4  ;;  %v3086_v55 = vld [vmem:[%s7712_s1 + $0x600] sm:$0xff]  ;;  %v3097_v4 = vld [vmem:[%s7712_s1 + $0x658] sm:$0xff]  ;;  %v3124_v53 = vld [vmem:[%s7712_s1 + $0x730] sm:$0xff] }
 0x2dd   : > { %1655 = vmatmul.mubr.f32.vlgmr.msra.gmra.mrb[8].mxu0 %v3018_v2  ;;  %3997 = vmatprep.subr.bf16.mxu1 %v3996_v13  ;;  %v3954_v13 = vpack.c.bf16 %v3066_v9, %v3062_v8  ;;  %v3090_v56 = vld [vmem:[%s7712_s1 + $0x620] sm:$0xff]  ;;  %v3103_v9 = vld [vmem:[%s7712_s1 + $0x688] sm:$0xff] }
 0x2de   : > { %3935 = vmatpush1.bf16.msra.mxu0 %v3934_v7  ;;  %v3952_v7 = vpack.c.bf16 %v3067_v6, %v3063_v25  ;;  %v3096_v25 = vld [vmem:[%s7712_s1 + $0x650] sm:$0xff] }
 0x2df   : > { %1726 = vmatmul.mubr.f32.vlgmr.msra.gmra.mrb[8].mxu1 %v3018_v2  ;;  %3937 = vmatprep.subr.bf16.mxu0 %v3936_v22  ;;  %v4012_v2 = vpack.c.bf16 %v3061_v1, %v3057_v0  ;;  %v4018_v22 = vpack.c.bf16 %v3068_v20, %v3064_v19  ;;  %v3095_v0 = vld [vmem:[%s7712_s1 + $0x648] sm:$0xff]  ;;  %v3100_v6 = vld [vmem:[%s7712_s1 + $0x670] sm:$0xff]  ;;  %v3106_v19 = vld [vmem:[%s7712_s1 + $0x6a0] sm:$0xff] }
 0x2e0   : > { %3999 = vmatpush1.bf16.msra.mxu1 %v3998_v18  ;;  %v3069_v18 = vld [vmem:[%s7712_s1 + $0x578] sm:$0xff]  ;;  %v3099_v1 = vld [vmem:[%s7712_s1 + $0x668] sm:$0xff]  ;;  %v4034_v8 = vpack.c.bf16 %v3100_v6, %v3096_v25  ;;  %v3138_v25 = vld [vmem:[%s7712_s1 + $0x7a0] sm:$0xff] }
 0x2e1   : > { %4001 = vmatprep.subr.bf16.mxu1 %v4000_v30  ;;  %v4016_v21 = vpack.c.bf16 %v3069_v18, %v3065_v10  ;;  %v3074_v30 = vld [vmem:[%s7712_s1 + $0x5a0] sm:$0xff]  ;;  %v3107_v10 = vld [vmem:[%s7712_s1 + $0x6a8] sm:$0xff]  ;;  %v3105_v20 = vld [vmem:[%s7712_s1 + $0x698] sm:$0xff] }
 0x2e2   : > { %3939 = vmatpush1.bf16.msra.mxu0 %v3938_v28  ;;  %v3070_v28 = vld [vmem:[%s7712_s1 + $0x580] sm:$0xff]  ;;  %v3137_v6 = vld [vmem:[%s7712_s1 + $0x798] sm:$0xff] }
 0x2e3   : > { %3941 = vmatprep.subr.bf16.mxu0 %v3940_v38  ;;  %v3958_v32 = vpack.c.bf16 %v3074_v30, %v3070_v28  ;;  %v3079_v38 = vld [vmem:[%s7712_s1 + $0x5c8] sm:$0xff]  ;;  %v3102_v18 = vld [vmem:[%s7712_s1 + $0x680] sm:$0xff]  ;;  %v4038_v28 = vpack.c.bf16 %v3108_v26, %v3104_v24  ;;  %v3145_v26 = vld [vmem:[%s7712_s1 + $0x7d8] sm:$0xff] }
 0x2e4   : > { %4003 = vmatpush1.bf16.msra.mxu1 %v4002_v34  ;;  %v3072_v34 = vld [vmem:[%s7712_s1 + $0x590] sm:$0xff]  ;;  %v3111_v30 = vld [vmem:[%s7712_s1 + $0x6c8] sm:$0xff] }
 0x2e5   : > { %4005 = vmatprep.subr.bf16.mxu1 %v4004_v43  ;;  %v4022_v37 = vpack.c.bf16 %v3076_v35, %v3072_v34  ;;  %v3081_v43 = vld [vmem:[%s7712_s1 + $0x5d8] sm:$0xff]  ;;  %v3114_v34 = vld [vmem:[%s7712_s1 + $0x6e0] sm:$0xff] }
 0x2e6   : > { %3943 = vmatpush1.bf16.msra.mxu0 %v3942_v39  ;;  %v3083_v39 = vld [vmem:[%s7712_s1 + $0x5e8] sm:$0xff]  ;;  %v3113_v35 = vld [vmem:[%s7712_s1 + $0x6d8] sm:$0xff] }
 0x2e7   : > { %3945 = vmatprep.subr.bf16.mxu0 %v3944_v48  ;;  %v3960_v40 = vpack.c.bf16 %v3083_v39, %v3079_v38  ;;  %v4024_v48 = vpack.c.bf16 %v3085_v45, %v3081_v43  ;;  %v3112_v38 = vld [vmem:[%s7712_s1 + $0x6d0] sm:$0xff]  ;;  %v3123_v43 = vld [vmem:[%s7712_s1 + $0x728] sm:$0xff]  ;;  %v3118_v45 = vld [vmem:[%s7712_s1 + $0x700] sm:$0xff] }
 0x2e8   : > { %4007 = vmatpush1.bf16.msra.mxu1 %v4006_v47  ;;  %v3084_v47 = vld [vmem:[%s7712_s1 + $0x5f0] sm:$0xff] }
 0x2e9   : > { %4009 = vmatprep.subr.bf16.mxu1 %v4008_v58  ;;  %v4026_v51 = vpack.c.bf16 %v3084_v47, %v3080_v46  ;;  %v3966_v58 = vpack.c.bf16 %v3090_v56, %v3086_v55  ;;  %v3116_v39 = vld [vmem:[%s7712_s1 + $0x6f0] sm:$0xff]  ;;  %v3122_v46 = vld [vmem:[%s7712_s1 + $0x720] sm:$0xff]  ;;  %v3121_v47 = vld [vmem:[%s7712_s1 + $0x718] sm:$0xff]  ;;  %v4046_v55 = vpack.c.bf16 %v3124_v53, %v3120_v52 }
 0x2ea   : > { %3947 = vmatpush1.bf16.msra.mxu0 %v3946_v57  ;;  %v3089_v57 = vld [vmem:[%s7712_s1 + $0x618] sm:$0xff]  ;;  %v4042_v41 = vpack.c.bf16 %v3116_v39, %v3112_v38  ;;  %v3127_v56 = vld [vmem:[%s7712_s1 + $0x748] sm:$0xff] }
 0x2eb   : > { %3949 = vmatprep.subr.bf16.mxu0 %v3948_v62  ;;  %v4028_v62 = vpack.c.bf16 %v3093_v12, %v3089_v57  ;;  %v3131_v57 = vld [vmem:[%s7712_s1 + $0x768] sm:$0xff]  ;;  %v3126_v12 = vld [vmem:[%s7712_s1 + $0x740] sm:$0xff]  ;;  %v2068_v38 = vld [vmem:[%s7712_s1 + $0x38] sm:$0xff] }
 0x2ec   : > { %4011 = vmatpush1.bf16.msra.mxu1 %v4010_v17  ;;  %v3968_v17 = vpack.c.bf16 %v3099_v1, %v3095_v0  ;;  %v3128_v0 = vld [vmem:[%s7712_s1 + $0x750] sm:$0xff] }
 0x2ed   : > { %4013 = vmatprep.subr.bf16.mxu1 %v4012_v2  ;;  %v3094_v2 = vld [vmem:[%s7712_s1 + $0x640] sm:$0xff]  ;;  %v3132_v1 = vld [vmem:[%s7712_s1 + $0x770] sm:$0xff] }
 0x2ee   : > { %3951 = vmatpush1.bf16.msra.mxu0 %v3950_v3  ;;  %v3098_v3 = vld [vmem:[%s7712_s1 + $0x660] sm:$0xff] }
 0x2ef   : > { %3953 = vmatprep.subr.bf16.mxu0 %v3952_v7  ;;  %v3970_v5 = vpack.c.bf16 %v3098_v3, %v3094_v2  ;;  %v4050_v2 = vpack.c.bf16 %v3132_v1, %v3128_v0  ;;  %v3135_v3 = vld [vmem:[%s7712_s1 + $0x788] sm:$0xff] }
 0x2f0   : > { %4015 = vmatpush1.bf16.msra.mxu1 %v4014_v11  ;;  %v3101_v11 = vld [vmem:[%s7712_s1 + $0x678] sm:$0xff] }
 0x2f1   : > { %4017 = vmatprep.subr.bf16.mxu1 %v4016_v21  ;;  %v4032_v7 = vpack.c.bf16 %v3101_v11, %v3097_v4  ;;  %v3974_v21 = vpack.c.bf16 %v3106_v19, %v3102_v18  ;;  %v3139_v4 = vld [vmem:[%s7712_s1 + $0x7a8] sm:$0xff] }
 0x2f2   : > { %3955 = vmatpush1.bf16.msra.mxu0 %v3954_v13  ;;  %v3972_v13 = vpack.c.bf16 %v3107_v10, %v3103_v9  ;;  %v3988_v11 = vpack.c.bf16 %v3139_v4, %v3135_v3  ;;  %v3136_v10 = vld [vmem:[%s7712_s1 + $0x790] sm:$0xff]  ;;  %v3143_v18 = vld [vmem:[%s7712_s1 + $0x7c8] sm:$0xff] }
 0x2f3   : > { %3957 = vmatprep.subr.bf16.mxu0 %v3956_v27 }
 0x2f4   : > { %4019 = vmatpush1.bf16.msra.mxu1 %v4018_v22  ;;  %v3109_v22 = vld [vmem:[%s7712_s1 + $0x6b8] sm:$0xff] }
 0x2f5   : > { %4021 = vmatprep.subr.bf16.mxu1 %v4020_v36  ;;  %v4036_v27 = vpack.c.bf16 %v3109_v22, %v3105_v20  ;;  %v3978_v36 = vpack.c.bf16 %v3114_v34, %v3110_v33  ;;  %v3147_v20 = vld [vmem:[%s7712_s1 + $0x7e8] sm:$0xff]  ;;  %v3146_v22 = vld [vmem:[%s7712_s1 + $0x7e0] sm:$0xff] }
 0x2f6   : > { %3959 = vmatpush1.bf16.msra.mxu0 %v3958_v32  ;;  %v3976_v32 = vpack.c.bf16 %v3115_v31, %v3111_v30  ;;  %v3992_v24 = vpack.c.bf16 %v3147_v20, %v3143_v18  ;;  %v2062_v33 = vld [vmem:[%s7712_s1 + $0x8] sm:$0xff] }
 0x2f7   : > { %3961 = vmatprep.subr.bf16.mxu0 %v3960_v40  ;;  %v2066_v34 = vld [vmem:[%s7712_s1 + $0x28] sm:$0xff] }
 0x2f8   : > { %4023 = vmatpush1.bf16.msra.mxu1 %v4022_v37  ;;  %v3117_v37 = vld [vmem:[%s7712_s1 + $0x6f8] sm:$0xff] }
 0x2f9   : > { %4025 = vmatprep.subr.bf16.mxu1 %v4024_v48  ;;  %v4040_v40 = vpack.c.bf16 %v3117_v37, %v3113_v35  ;;  %v3982_v48 = vpack.c.bf16 %v3122_v46, %v3118_v45  ;;  %v4060_v35 = vpack.c.bf16 %v2066_v34, %v2062_v33  ;;  %v2064_v37 = vld [vmem:[%s7712_s1 + $0x18] sm:$0xff] }
 0x2fa   : > { %3963 = vmatpush1.bf16.msra.mxu0 %v3962_v44  ;;  %v3980_v44 = vpack.c.bf16 %v3123_v43, %v3119_v42  ;;  %v4124_v39 = vpack.c.bf16 %v2068_v38, %v2064_v37  ;;  %v2070_v38 = vld [vmem:[%s7712_s1 + $0x48] sm:$0xff] }
 0x2fb   : > { %3965 = vmatprep.subr.bf16.mxu0 %v3964_v54 }
 0x2fc   : > { %4027 = vmatpush1.bf16.msra.mxu1 %v4026_v51  ;;  %v3125_v51 = vld [vmem:[%s7712_s1 + $0x738] sm:$0xff] }
 0x2fd   : > { %4029 = vmatprep.subr.bf16.mxu1 %v4028_v62  ;;  %v4044_v54 = vpack.c.bf16 %v3125_v51, %v3121_v47  ;;  %v3986_v62 = vpack.c.bf16 %v3130_v60, %v3126_v12 }
 0x2fe   : > { %3967 = vmatpush1.bf16.msra.mxu0 %v3966_v58  ;;  %v3984_v58 = vpack.c.bf16 %v3131_v57, %v3127_v56 }
 0x2ff   : > { %3969 = vmatprep.subr.bf16.mxu0 %v3968_v17 }
 0x300   : > { %4031 = vmatpush1.bf16.msra.mxu1 %v4030_v63  ;;  %v3133_v63 = vld [vmem:[%s7712_s1 + $0x778] sm:$0xff] }
 0x301   : > { %4033 = vmatprep.subr.bf16.mxu1 %v4032_v7  ;;  %v4048_v17 = vpack.c.bf16 %v3133_v63, %v3129_v61  ;;  %v3141_v7 = vld [vmem:[%s7712_s1 + $0x7b8] sm:$0xff] }
 0x302   : > { %3971 = vmatpush1.bf16.msra.mxu0 %v3970_v5  ;;  %v3134_v5 = vld [vmem:[%s7712_s1 + $0x780] sm:$0xff]  ;;  %v4052_v9 = vpack.c.bf16 %v3141_v7, %v3137_v6 }
 0x303   : > { %3973 = vmatprep.subr.bf16.mxu0 %v3972_v13  ;;  %v3140_v13 = vld [vmem:[%s7712_s1 + $0x7b0] sm:$0xff] }
 0x304   : > { %4035 = vmatpush1.bf16.msra.mxu1 %v4034_v8  ;;  %v3990_v8 = vpack.c.bf16 %v3138_v25, %v3134_v5  ;;  %v4054_v19 = vpack.c.bf16 %v3140_v13, %v3136_v10 }
 0x305   : > { %4037 = vmatprep.subr.bf16.mxu1 %v4036_v27  ;;  %v3149_v27 = vld [vmem:[%s7712_s1 + $0x7f8] sm:$0xff] }
 0x306   : > { %3975 = vmatpush1.bf16.msra.mxu0 %v3974_v21  ;;  %v3142_v21 = vld [vmem:[%s7712_s1 + $0x7c0] sm:$0xff]  ;;  %v4056_v31 = vpack.c.bf16 %v3149_v27, %v3145_v26 }
 0x307   : > { %3977 = vmatprep.subr.bf16.mxu0 %v3976_v32  ;;  %v3994_v30 = vpack.c.bf16 %v3146_v22, %v3142_v21  ;;  %v3148_v32 = vld [vmem:[%s7712_s1 + $0x7f0] sm:$0xff] }
 0x308   : > { %4039 = vmatpush1.bf16.msra.mxu1 %v4038_v28  ;;  %v3144_v28 = vld [vmem:[%s7712_s1 + $0x7d0] sm:$0xff] }
 0x309   : > { %4041 = vmatprep.subr.bf16.mxu1 %v4040_v40 }
 0x30a   : > { %3979 = vmatpush1.bf16.msra.mxu0 %v3978_v36  ;;  %v4058_v36 = vpack.c.bf16 %v3148_v32, %v3144_v28 }
 0x30b   : > { %3981 = vmatprep.subr.bf16.mxu0 %v3980_v44 }
 0x30c   : > { %4043 = vmatpush1.bf16.msra.mxu1 %v4042_v41 }
 0x30d   : > { %4045 = vmatprep.subr.bf16.mxu1 %v4044_v54 }
 0x30e   : > { %3983 = vmatpush1.bf16.msra.mxu0 %v3982_v48 }
 0x30f   : > { %3985 = vmatprep.subr.bf16.mxu0 %v3984_v58 }
 0x310   : > { %4047 = vmatpush1.bf16.msra.mxu1 %v4046_v55 }
 0x311   : > { %4049 = vmatprep.subr.bf16.mxu1 %v4048_v17 }
 0x312   : > { %3987 = vmatpush1.bf16.msra.mxu0 %v3986_v62  ;;  %v1449_v62 = vld [vmem:[#allocation3 + $0x8] sm:$0xff] }
 0x313   : > { %3989 = vmatprep.subr.bf16.mxu0 %v3988_v11 }
 0x314   : > { %4051 = vmatpush1.bf16.msra.mxu1 %v4050_v2 }
 0x315   : > { %4053 = vmatprep.subr.bf16.mxu1 %v4052_v9 }
 0x316   : > { %3991 = vmatpush1.bf16.msra.mxu0 %v3990_v8 }
 0x317   : > { %3993 = vmatprep.subr.bf16.mxu0 %v3992_v24 }
 0x318   : > { %4055 = vmatpush1.bf16.msra.mxu1 %v4054_v19 }
 0x319   : > { %4057 = vmatprep.subr.bf16.mxu1 %v4056_v31  ;;  %v1751_v31 = vld [vmem:[#allocation3] sm:$0xff] }
 0x31a   : > { %3995 = vmatpush1.bf16.msra.mxu0 %v3994_v30 }
 0x31b   : > { %4061 = vmatprep.subr.bf16.mxu0 %v4060_v35  ;;  %v2061_v35 = vld [vmem:[%s7712_s1] sm:$0xff] }
 0x31c   : > { %4059 = vmatpush1.bf16.msra.mxu1 %v4058_v36  ;;  %v2065_v36 = vld [vmem:[%s7712_s1 + $0x20] sm:$0xff] }
 0x31d   : > { %4125 = vmatprep.subr.bf16.mxu1 %v4124_v39  ;;  %v2074_v39 = vld [vmem:[%s7712_s1 + $0x68] sm:$0xff] }
 0x370   : > { %v1354_v40 = vpop.f32.mrb[6].mxu0  ;;  %v1425_v41 = vpop.f32.mrb[6].mxu1 }
 0x371   : > { %v1355_v42 = vadd.f32 %v1354_v40, %v6126_v49  ;;  %v1356_v43 = vpop.f32.mrb[7].mxu0  ;;  %v1427_v44 = vpop.f32.mrb[7].mxu1  ;;  %v1426_v52 = vadd.f32 %v1425_v41, %v6141_v14  ;;  %v2063_v40 = vld [vmem:[%s7712_s1 + $0x10] sm:$0xff] }
 0x372   : > { %v1357_v45 = vadd.f32 %v1356_v43, %v6130_v50  ;;  %v1428_v48 = vadd.f32 %v1427_v44, %v6136_v59  ;;  %v2067_v41 = vld [vmem:[%s7712_s1 + $0x30] sm:$0xff]  ;;  %v4062_v43 = vpack.c.bf16 %v2065_v36, %v2061_v35  ;;  %v2072_v44 = vld [vmem:[%s7712_s1 + $0x58] sm:$0xff] }
 0x373   : > { %v3014_v46 = vmul.f32 -1.442695, %v1355_v42  ;;  %v2099_v35 = vld [vmem:[%s7712_s1 + $0x130] sm:$0xff] }
 0x374   : > { %v3015_v47 = vmul.f32 -1.442695, %v1357_v45  ;;  %v3016_v51 = vmul.f32 -1.442695, %v1428_v48  ;;  %v2076_v45 = vld [vmem:[%s7712_s1 + $0x78] sm:$0xff]  ;;  %v2069_v48 = vld [vmem:[%s7712_s1 + $0x40] sm:$0xff] }
 0x375   : > { %4389 = vpow2.f32 %v3014_v46 }
 0x376   : > { %4391 = vpow2.f32 %v3015_v47  ;;  %v4064_v47 = vpack.c.bf16 %v2074_v39, %v2070_v38  ;;  %v2108_v38 = vld [vmem:[%s7712_s1 + $0x178] sm:$0xff] }
 0x377   : > { %4393 = vpow2.f32 %v3016_v51  ;;  %v2073_v51 = vld [vmem:[%s7712_s1 + $0x60] sm:$0xff] }
 0x378   : > { %4395 = vtanh.f32 %v1426_v52  ;;  %v2078_v52 = vld [vmem:[%s7712_s1 + $0x88] sm:$0xff] }
 0x37f   : > { %v4390_v53 = vpop.eup %4389 }
 0x380   : > { %v4392_v54 = vpop.eup %4391  ;;  %v1433_v55 = vadd.f32 1.0, %v4390_v53  ;;  %v2082_v53 = vld [vmem:[%s7712_s1 + $0xa8] sm:$0xff] }
 0x381   : > { %v1439_v56 = vadd.f32 1.0, %v4392_v54  ;;  %v4394_v57 = vpop.eup %4393  ;;  %v4126_v54 = vpack.c.bf16 %v2067_v41, %v2063_v40  ;;  %v2101_v40 = vld [vmem:[%s7712_s1 + $0x140] sm:$0xff] }
 0x382   : > { %4397 = vrcp.f32 %v1433_v55  ;;  %v4396_v58 = vpop.eup %4395  ;;  %v1446_v63 = vadd.f32 1.0, %v4394_v57  ;;  %v4128_v55 = vpack.c.bf16 %v2076_v45, %v2072_v44  ;;  %v2075_v57 = vld [vmem:[%s7712_s1 + $0x70] sm:$0xff]  ;;  %v2105_v41 = vld [vmem:[%s7712_s1 + $0x160] sm:$0xff] }
 0x383   : > { %4399 = vrcp.f32 %v1439_v56  ;;  %v2071_v56 = vld [vmem:[%s7712_s1 + $0x50] sm:$0xff] }
 0x384   : > { %4401 = vrcp.f32 %v1446_v63  ;;  %v2081_v63 = vld [vmem:[%s7712_s1 + $0xa0] sm:$0xff] }
 0x38c   : > { %v4398_v12 = vpop.eup %4397 }
 0x38d   : > { %v4400_v60 = vpop.eup %4399  ;;  %v1451_v61 = vmul.f32 %v4398_v12, %v4396_v58  ;;  %v4066_v58 = vpack.c.bf16 %v2073_v51, %v2069_v48  ;;  %v2080_v12 = vld [vmem:[%s7712_s1 + $0x98] sm:$0xff]  ;;  %v4082_v48 = vpack.c.bf16 %v2105_v41, %v2101_v40 }
 0x38e   : > { %v1450_v0 = vmul.f32 %v4400_v60, %v1449_v62  ;;  %v4402_v17 = vpop.eup %4401  ;;  %v2084_v60 = vld [vmem:[%s7712_s1 + $0xb8] sm:$0xff]  ;;  %v2077_v62 = vld [vmem:[%s7712_s1 + $0x80] sm:$0xff] }
 0x38f   : > { %v2112_v51 = vld [vmem:[%s7712_s1 + $0x198] sm:$0xff] }
 0x390   : > { %v1452_v1 = vadd.f32 %v1451_v61, %v1450_v0  ;;  %v4068_v61 = vpack.c.bf16 %v2082_v53, %v2078_v52  ;;  %v2086_v0 = vld [vmem:[%s7712_s1 + $0xc8] sm:$0xff]  ;;  %v2116_v52 = vld [vmem:[%s7712_s1 + $0x1b8] sm:$0xff] }
 0x391   : > { %v2144_v41 = vld [vmem:[%s7712_s1 + $0x298] sm:$0xff] }
 0x392   : > { %4403 = vtanh.f32 %v1452_v1  ;;  %1455 = vst [vmem:[#allocation3 + $0x8] sm:$0xff] %v1452_v1  ;;  %v2090_v1 = vld [vmem:[%s7712_s1 + $0xe8] sm:$0xff] }
 0x39c   : > { %v4404_v2 = vpop.eup %4403 }
 0x39d   : > { %v1454_v3 = vmul.f32 %v4404_v2, %v4402_v17  ;;  %v4130_v17 = vpack.c.bf16 %v2075_v57, %v2071_v56  ;;  %v4132_v2 = vpack.c.bf16 %v2084_v60, %v2080_v12  ;;  %v2118_v56 = vld [vmem:[%s7712_s1 + $0x1c8] sm:$0xff]  ;;  %v4148_v12 = vpack.c.bf16 %v2116_v52, %v2112_v51  ;;  %v2111_v60 = vld [vmem:[%s7712_s1 + $0x190] sm:$0xff] }
 0x39e   : > { %v2122_v57 = vld [vmem:[%s7712_s1 + $0x1e8] sm:$0xff]  ;;  %v2143_v52 = vld [vmem:[%s7712_s1 + $0x290] sm:$0xff] }
 0x39f   : > { %3017 = vst [vmem:[%s4540_s23 + $0x8] sm:$0xff] %v1454_v3  ;;  %1952 = vmatprep.mubr.f32.mxu0 %v1454_v3  ;;  %2023 = vmatprep.mubr.f32.mxu1 %v1454_v3  ;;  %v2079_v3 = vld [vmem:[%s7712_s1 + $0x90] sm:$0xff] }
 0x3b0   : > { %v1656_v4 = vpop.f32.mrb[8].mxu0 }
 0x3b1   : > { %v1657_v5 = vadd.f32 %v1656_v4, %v5332_v15  ;;  %v1658_v11 = vpop.f32.mrb[9].mxu0  ;;  %v2083_v4 = vld [vmem:[%s7712_s1 + $0xb0] sm:$0xff] }
 0x3b2   : > { %v1659_v25 = vadd.f32 %v1658_v11, %v5336_v16  ;;  %v1727_v6 = vpop.f32.mrb[8].mxu1  ;;  %v2088_v11 = vld [vmem:[%s7712_s1 + $0xd8] sm:$0xff] }
 0x3b3   : > { %v3019_v7 = vmul.f32 -1.442695, %v1657_v5  ;;  %v1729_v8 = vpop.f32.mrb[9].mxu1  ;;  %v1728_v18 = vadd.f32 %v1727_v6, %v5349_v29  ;;  %v4070_v5 = vpack.c.bf16 %v2081_v63, %v2077_v62  ;;  %v4072_v6 = vpack.c.bf16 %v2090_v1, %v2086_v0  ;;  %v2120_v63 = vld [vmem:[%s7712_s1 + $0x1d8] sm:$0xff] }
 0x3b4   : > { %v3020_v9 = vmul.f32 -1.442695, %v1659_v25  ;;  %v1730_v10 = vadd.f32 %v1729_v8, %v5343_v23  ;;  %v2092_v25 = vld [vmem:[%s7712_s1 + $0xf8] sm:$0xff]  ;;  %v2089_v8 = vld [vmem:[%s7712_s1 + $0xe0] sm:$0xff]  ;;  %v4088_v1 = vpack.c.bf16 %v2122_v57, %v2118_v56 }
 0x3b5   : > { %4405 = vpow2.f32 %v3019_v7  ;;  %v2085_v7 = vld [vmem:[%s7712_s1 + $0xc0] sm:$0xff]  ;;  %v2124_v0 = vld [vmem:[%s7712_s1 + $0x1f8] sm:$0xff] }
 0x3b6   : > { %4407 = vpow2.f32 %v3020_v9  ;;  %v3021_v13 = vmul.f32 -1.442695, %v1730_v10  ;;  %v2094_v9 = vld [vmem:[%s7712_s1 + $0x108] sm:$0xff]  ;;  %v2156_v56 = vld [vmem:[%s7712_s1 + $0x2f8] sm:$0xff] }
 0x3b7   : > { %v2098_v10 = vld [vmem:[%s7712_s1 + $0x128] sm:$0xff] }
 0x3b8   : > { %4409 = vpow2.f32 %v3021_v13  ;;  %v4134_v13 = vpack.c.bf16 %v2083_v4, %v2079_v3  ;;  %v2126_v3 = vld [vmem:[%s7712_s1 + $0x208] sm:$0xff] }
 0x3b9   : > { %4411 = vtanh.f32 %v1728_v18  ;;  %v4136_v18 = vpack.c.bf16 %v2092_v25, %v2088_v11  ;;  %v2130_v4 = vld [vmem:[%s7712_s1 + $0x228] sm:$0xff]  ;;  %v4152_v11 = vpack.c.bf16 %v2124_v0, %v2120_v63  ;;  %v2119_v25 = vld [vmem:[%s7712_s1 + $0x1d0] sm:$0xff] }
 0x3ba   : > { %v2151_v0 = vld [vmem:[%s7712_s1 + $0x2d0] sm:$0xff] }
 0x3bf   : > { %v4406_v19 = vpop.eup %4405 }
 0x3c0   : > { %v4408_v20 = vpop.eup %4407  ;;  %v1735_v21 = vadd.f32 1.0, %v4406_v19  ;;  %v2087_v19 = vld [vmem:[%s7712_s1 + $0xd0] sm:$0xff] }
 0x3c1   : > { %v1741_v22 = vadd.f32 1.0, %v4408_v20  ;;  %v2091_v20 = vld [vmem:[%s7712_s1 + $0xf0] sm:$0xff] }
 0x3c2   : > { %4413 = vrcp.f32 %v1735_v21  ;;  %v4410_v24 = vpop.eup %4409  ;;  %v4074_v21 = vpack.c.bf16 %v2089_v8, %v2085_v7  ;;  %v2128_v8 = vld [vmem:[%s7712_s1 + $0x218] sm:$0xff] }
 0x3c3   : > { %4415 = vrcp.f32 %v1741_v22  ;;  %v4412_v26 = vpop.eup %4411  ;;  %v1748_v28 = vadd.f32 1.0, %v4410_v24  ;;  %v2096_v22 = vld [vmem:[%s7712_s1 + $0x118] sm:$0xff] }
 0x3c4   : > { %v2100_v24 = vld [vmem:[%s7712_s1 + $0x138] sm:$0xff] }
 0x3c5   : > { %4417 = vrcp.f32 %v1748_v28  ;;  %v2097_v28 = vld [vmem:[%s7712_s1 + $0x120] sm:$0xff] }
 0x3cc   : > { %v4414_v27 = vpop.eup %4413 }
 0x3cd   : > { %v4416_v30 = vpop.eup %4415  ;;  %v1753_v32 = vmul.f32 %v4414_v27, %v4412_v26  ;;  %v4076_v26 = vpack.c.bf16 %v2098_v10, %v2094_v9  ;;  %v2093_v27 = vld [vmem:[%s7712_s1 + $0x100] sm:$0xff]  ;;  %v2132_v9 = vld [vmem:[%s7712_s1 + $0x238] sm:$0xff]  ;;  %v4092_v10 = vpack.c.bf16 %v2130_v4, %v2126_v3 }
 0x3ce   : > { %v1752_v33 = vmul.f32 %v4416_v30, %v1751_v31  ;;  %v2102_v30 = vld [vmem:[%s7712_s1 + $0x148] sm:$0xff]  ;;  %v4078_v36 = vpack.c.bf16 %v2097_v28, %v2093_v27  ;;  %v2136_v28 = vld [vmem:[%s7712_s1 + $0x258] sm:$0xff] }
 0x3cf   : > { %v4418_v37 = vpop.eup %4417  ;;  %v2106_v31 = vld [vmem:[%s7712_s1 + $0x168] sm:$0xff]  ;;  %v2164_v3 = vld [vmem:[%s7712_s1 + $0x338] sm:$0xff] }
 0x3d0   : > { %v1754_v34 = vadd.f32 %v1753_v32, %v1752_v33  ;;  %v4138_v32 = vpack.c.bf16 %v2091_v20, %v2087_v19  ;;  %v4140_v33 = vpack.c.bf16 %v2100_v24, %v2096_v22  ;;  %v4080_v39 = vpack.c.bf16 %v2106_v31, %v2102_v30  ;;  %v2134_v19 = vld [vmem:[%s7712_s1 + $0x248] sm:$0xff]  ;;  %v2127_v24 = vld [vmem:[%s7712_s1 + $0x210] sm:$0xff]  ;;  %v2140_v30 = vld [vmem:[%s7712_s1 + $0x278] sm:$0xff] }
 0x3d1   : > { %v2138_v20 = vld [vmem:[%s7712_s1 + $0x268] sm:$0xff]  ;;  %v4156_v22 = vpack.c.bf16 %v2132_v9, %v2128_v8  ;;  %v2159_v9 = vld [vmem:[%s7712_s1 + $0x310] sm:$0xff] }
 0x3d2   : > { %4419 = vtanh.f32 %v1754_v34  ;;  %1757 = vst [vmem:[#allocation3] sm:$0xff] %v1754_v34  ;;  %v2095_v34 = vld [vmem:[%s7712_s1 + $0x110] sm:$0xff]  ;;  %v4096_v31 = vpack.c.bf16 %v2138_v20, %v2134_v19  ;;  %v2172_v19 = vld [vmem:[%s7712_s1 + $0x378] sm:$0xff] }
 0x3d3   : > { %v4142_v44 = vpack.c.bf16 %v2099_v35, %v2095_v34  ;;  %v2142_v34 = vld [vmem:[%s7712_s1 + $0x288] sm:$0xff] }
 0x3d4   : > { %v2146_v35 = vld [vmem:[%s7712_s1 + $0x2a8] sm:$0xff] }
 0x3dc   : > { %v4420_v42 = vpop.eup %4419 }
 0x3dd   : > { %v1756_v46 = vmul.f32 %v4420_v42, %v4418_v37  ;;  %v2104_v37 = vld [vmem:[%s7712_s1 + $0x158] sm:$0xff]  ;;  %v2110_v42 = vld [vmem:[%s7712_s1 + $0x188] sm:$0xff] }
 0x3de   : > { %v4144_v45 = vpack.c.bf16 %v2108_v38, %v2104_v37  ;;  %v4160_v37 = vpack.c.bf16 %v2140_v30, %v2136_v28  ;;  %v2135_v38 = vld [vmem:[%s7712_s1 + $0x250] sm:$0xff] }
 0x3df   : > { %1953 = vmatmul.mubr.f32.vlgmr.msra.gmra.mrb[10].mxu0 %v1756_v46  ;;  %2024 = vmatmul.mubr.f32.vlgmr.msra.gmra.mrb[10].mxu1 %v1756_v46  ;;  %v2167_v30 = vld [vmem:[%s7712_s1 + $0x350] sm:$0xff] }
 0x3e0   : > { %4063 = vmatpush1.bf16.msra.mxu0 %v4062_v43  ;;  %2254 = vmatprep.mubr.f32.mxu0 %v1756_v46  ;;  %v2114_v43 = vld [vmem:[%s7712_s1 + $0x1a8] sm:$0xff] }
 0x3e1   : > { %4065 = vmatprep.subr.bf16.mxu0 %v4064_v47  ;;  %2325 = vmatprep.mubr.f32.mxu1 %v1756_v46  ;;  %v2103_v46 = vld [vmem:[%s7712_s1 + $0x150] sm:$0xff]  ;;  %v4084_v53 = vpack.c.bf16 %v2114_v43, %v2110_v42  ;;  %v2148_v42 = vld [vmem:[%s7712_s1 + $0x2b8] sm:$0xff]  ;;  %v4100_v43 = vpack.c.bf16 %v2146_v35, %v2142_v34 }
 0x3e2   : > { %4127 = vmatpush1.bf16.msra.mxu1 %v4126_v54  ;;  %v2107_v47 = vld [vmem:[%s7712_s1 + $0x170] sm:$0xff]  ;;  %v2109_v54 = vld [vmem:[%s7712_s1 + $0x180] sm:$0xff]  ;;  %v4164_v51 = vpack.c.bf16 %v2148_v42, %v2144_v41  ;;  %v2180_v34 = vld [vmem:[%s7712_s1 + $0x3b8] sm:$0xff] }
 0x3e3   : > { %4129 = vmatprep.subr.bf16.mxu1 %v4128_v55  ;;  %v2113_v55 = vld [vmem:[%s7712_s1 + $0x1a0] sm:$0xff]  ;;  %v2175_v42 = vld [vmem:[%s7712_s1 + $0x390] sm:$0xff] }
 0x3e4   : > { %4067 = vmatpush1.bf16.msra.mxu0 %v4066_v58  ;;  %v4146_v58 = vpack.c.bf16 %v2107_v47, %v2103_v46  ;;  %v4086_v62 = vpack.c.bf16 %v2113_v55, %v2109_v54  ;;  %v2150_v46 = vld [vmem:[%s7712_s1 + $0x2c8] sm:$0xff]  ;;  %v2152_v55 = vld [vmem:[%s7712_s1 + $0x2d8] sm:$0xff] }
 0x3e5   : > { %4069 = vmatprep.subr.bf16.mxu0 %v4068_v61  ;;  %v2115_v61 = vld [vmem:[%s7712_s1 + $0x1b0] sm:$0xff]  ;;  %v2154_v47 = vld [vmem:[%s7712_s1 + $0x2e8] sm:$0xff]  ;;  %v4168_v63 = vpack.c.bf16 %v2156_v56, %v2152_v55 }
 0x3e6   : > { %4131 = vmatpush1.bf16.msra.mxu1 %v4130_v17  ;;  %v2117_v17 = vld [vmem:[%s7712_s1 + $0x1c0] sm:$0xff]  ;;  %v4104_v57 = vpack.c.bf16 %v2154_v47, %v2150_v46  ;;  %v2188_v46 = vld [vmem:[%s7712_s1 + $0x3f8] sm:$0xff]  ;;  %v2187_v55 = vld [vmem:[%s7712_s1 + $0x3f0] sm:$0xff] }
 0x3e7   : > { %4133 = vmatprep.subr.bf16.mxu1 %v4132_v2  ;;  %v2121_v2 = vld [vmem:[%s7712_s1 + $0x1e0] sm:$0xff] }
 0x3e8   : > { %4071 = vmatpush1.bf16.msra.mxu0 %v4070_v5  ;;  %v4150_v5 = vpack.c.bf16 %v2115_v61, %v2111_v60  ;;  %v4090_v7 = vpack.c.bf16 %v2121_v2, %v2117_v17  ;;  %v2158_v60 = vld [vmem:[%s7712_s1 + $0x308] sm:$0xff]  ;;  %v2160_v2 = vld [vmem:[%s7712_s1 + $0x318] sm:$0xff] }
 0x3e9   : > { %4073 = vmatprep.subr.bf16.mxu0 %v4072_v6  ;;  %v2123_v6 = vld [vmem:[%s7712_s1 + $0x1f0] sm:$0xff]  ;;  %v2162_v61 = vld [vmem:[%s7712_s1 + $0x328] sm:$0xff]  ;;  %v4172_v8 = vpack.c.bf16 %v2164_v3, %v2160_v2 }
 0x3ea   : > { %4135 = vmatpush1.bf16.msra.mxu1 %v4134_v13  ;;  %v2125_v13 = vld [vmem:[%s7712_s1 + $0x200] sm:$0xff]  ;;  %v4108_v4 = vpack.c.bf16 %v2162_v61, %v2158_v60  ;;  %v3163_v60 = vld [vmem:[%s7712_s1 + $0x428] sm:$0xff]  ;;  %v3161_v61 = vld [vmem:[%s7712_s1 + $0x418] sm:$0xff] }
 0x3eb   : > { %4137 = vmatprep.subr.bf16.mxu1 %v4136_v18  ;;  %v2129_v18 = vld [vmem:[%s7712_s1 + $0x220] sm:$0xff]  ;;  %v3160_v3 = vld [vmem:[%s7712_s1 + $0x410] sm:$0xff] }
 0x3ec   : > { %4075 = vmatpush1.bf16.msra.mxu0 %v4074_v21  ;;  %v4154_v21 = vpack.c.bf16 %v2123_v6, %v2119_v25  ;;  %v4094_v27 = vpack.c.bf16 %v2129_v18, %v2125_v13  ;;  %v2166_v25 = vld [vmem:[%s7712_s1 + $0x348] sm:$0xff]  ;;  %v2168_v18 = vld [vmem:[%s7712_s1 + $0x358] sm:$0xff] }
 0x3ed   : > { %4077 = vmatprep.subr.bf16.mxu0 %v4076_v26  ;;  %v2131_v26 = vld [vmem:[%s7712_s1 + $0x230] sm:$0xff]  ;;  %v2170_v6 = vld [vmem:[%s7712_s1 + $0x368] sm:$0xff]  ;;  %v4176_v28 = vpack.c.bf16 %v2172_v19, %v2168_v18 }
 0x3ee   : > { %4139 = vmatpush1.bf16.msra.mxu1 %v4138_v32  ;;  %v2133_v32 = vld [vmem:[%s7712_s1 + $0x240] sm:$0xff]  ;;  %v4112_v20 = vpack.c.bf16 %v2170_v6, %v2166_v25  ;;  %v3171_v25 = vld [vmem:[%s7712_s1 + $0x468] sm:$0xff]  ;;  %v3169_v6 = vld [vmem:[%s7712_s1 + $0x458] sm:$0xff] }
 0x3ef   : > { %4141 = vmatprep.subr.bf16.mxu1 %v4140_v33  ;;  %v2137_v33 = vld [vmem:[%s7712_s1 + $0x260] sm:$0xff]  ;;  %v3168_v19 = vld [vmem:[%s7712_s1 + $0x450] sm:$0xff] }
 0x3f0   : > { %4079 = vmatpush1.bf16.msra.mxu0 %v4078_v36  ;;  %v4158_v36 = vpack.c.bf16 %v2131_v26, %v2127_v24  ;;  %v4098_v40 = vpack.c.bf16 %v2137_v33, %v2133_v32  ;;  %v2174_v24 = vld [vmem:[%s7712_s1 + $0x388] sm:$0xff]  ;;  %v2176_v33 = vld [vmem:[%s7712_s1 + $0x398] sm:$0xff] }
 0x3f1   : > { %4081 = vmatprep.subr.bf16.mxu0 %v4080_v39  ;;  %v2139_v39 = vld [vmem:[%s7712_s1 + $0x270] sm:$0xff]  ;;  %v2178_v26 = vld [vmem:[%s7712_s1 + $0x3a8] sm:$0xff]  ;;  %v4180_v41 = vpack.c.bf16 %v2180_v34, %v2176_v33 }
 0x3f2   : > { %4143 = vmatpush1.bf16.msra.mxu1 %v4142_v44  ;;  %v2141_v44 = vld [vmem:[%s7712_s1 + $0x280] sm:$0xff]  ;;  %v4116_v35 = vpack.c.bf16 %v2178_v26, %v2174_v24  ;;  %v3179_v24 = vld [vmem:[%s7712_s1 + $0x4a8] sm:$0xff]  ;;  %v3177_v26 = vld [vmem:[%s7712_s1 + $0x498] sm:$0xff] }
 0x3f3   : > { %4145 = vmatprep.subr.bf16.mxu1 %v4144_v45  ;;  %v2145_v45 = vld [vmem:[%s7712_s1 + $0x2a0] sm:$0xff]  ;;  %v3176_v33 = vld [vmem:[%s7712_s1 + $0x490] sm:$0xff] }
 0x3f4   : > { %4083 = vmatpush1.bf16.msra.mxu0 %v4082_v48  ;;  %v4162_v48 = vpack.c.bf16 %v2139_v39, %v2135_v38  ;;  %v4102_v54 = vpack.c.bf16 %v2145_v45, %v2141_v44  ;;  %v2182_v38 = vld [vmem:[%s7712_s1 + $0x3c8] sm:$0xff]  ;;  %v2184_v45 = vld [vmem:[%s7712_s1 + $0x3d8] sm:$0xff] }
 0x3f5   : > { %4085 = vmatprep.subr.bf16.mxu0 %v4084_v53  ;;  %v2147_v53 = vld [vmem:[%s7712_s1 + $0x2b0] sm:$0xff]  ;;  %v2186_v39 = vld [vmem:[%s7712_s1 + $0x3e8] sm:$0xff] }
 0x3f6   : > { %4147 = vmatpush1.bf16.msra.mxu1 %v4146_v58  ;;  %v2149_v58 = vld [vmem:[%s7712_s1 + $0x2c0] sm:$0xff]  ;;  %v4120_v47 = vpack.c.bf16 %v2186_v39, %v2182_v38 }
 0x3f7   : > { %4149 = vmatprep.subr.bf16.mxu1 %v4148_v12  ;;  %v2153_v12 = vld [vmem:[%s7712_s1 + $0x2e0] sm:$0xff] }
 0x3f8   : > { %4087 = vmatpush1.bf16.msra.mxu0 %v4086_v62  ;;  %v4166_v62 = vpack.c.bf16 %v2147_v53, %v2143_v52  ;;  %v4106_v17 = vpack.c.bf16 %v2153_v12, %v2149_v58  ;;  %v4184_v53 = vpack.c.bf16 %v2188_v46, %v2184_v45  ;;  %v3154_v58 = vld [vmem:[%s4535_s20 + $0x18] sm:$0xff]  ;;  %v3159_v12 = vld [vmem:[%s7712_s1 + $0x408] sm:$0xff]  ;;  %v3184_v45 = vld [vmem:[%s7712_s1 + $0x4d0] sm:$0xff] }
 0x3f9   : > { %4089 = vmatprep.subr.bf16.mxu0 %v4088_v1  ;;  %v2155_v1 = vld [vmem:[%s7712_s1 + $0x2f0] sm:$0xff] }
 0x3fa   : > { %4151 = vmatpush1.bf16.msra.mxu1 %v4150_v5  ;;  %v2157_v5 = vld [vmem:[%s7712_s1 + $0x300] sm:$0xff]  ;;  %v3188_v46 = vld [vmem:[%s7712_s1 + $0x4f0] sm:$0xff] }
 0x3fb   : > { %4153 = vmatprep.subr.bf16.mxu1 %v4152_v11  ;;  %v2161_v11 = vld [vmem:[%s7712_s1 + $0x320] sm:$0xff] }
 0x3fc   : > { %4091 = vmatpush1.bf16.msra.mxu0 %v4090_v7  ;;  %v4170_v7 = vpack.c.bf16 %v2155_v1, %v2151_v0  ;;  %v4110_v13 = vpack.c.bf16 %v2161_v11, %v2157_v5  ;;  %v3158_v0 = vld [vmem:[%s7712_s1 + $0x400] sm:$0xff]  ;;  %v3167_v11 = vld [vmem:[%s7712_s1 + $0x448] sm:$0xff] }
 0x3fd   : > { %4093 = vmatprep.subr.bf16.mxu0 %v4092_v10  ;;  %v2163_v10 = vld [vmem:[%s7712_s1 + $0x330] sm:$0xff]  ;;  %v3162_v1 = vld [vmem:[%s7712_s1 + $0x420] sm:$0xff] }
 0x3fe   : > { %4155 = vmatpush1.bf16.msra.mxu1 %v4154_v21  ;;  %v2165_v21 = vld [vmem:[%s7712_s1 + $0x340] sm:$0xff]  ;;  %v4190_v2 = vpack.c.bf16 %v3162_v1, %v3158_v0  ;;  %v3203_v0 = vld [vmem:[%s7712_s1 + $0x568] sm:$0xff]  ;;  %v3201_v1 = vld [vmem:[%s7712_s1 + $0x558] sm:$0xff] }
 0x3ff   : > { %4157 = vmatprep.subr.bf16.mxu1 %v4156_v22  ;;  %v2169_v22 = vld [vmem:[%s7712_s1 + $0x360] sm:$0xff] }
 0x400   : > { %4095 = vmatpush1.bf16.msra.mxu0 %v4094_v27  ;;  %v4174_v27 = vpack.c.bf16 %v2163_v10, %v2159_v9  ;;  %v4114_v32 = vpack.c.bf16 %v2169_v22, %v2165_v21  ;;  %v3166_v9 = vld [vmem:[%s7712_s1 + $0x440] sm:$0xff]  ;;  %v3175_v21 = vld [vmem:[%s7712_s1 + $0x488] sm:$0xff] }
 0x401   : > { %4097 = vmatprep.subr.bf16.mxu0 %v4096_v31  ;;  %v2171_v31 = vld [vmem:[%s7712_s1 + $0x370] sm:$0xff]  ;;  %v3170_v10 = vld [vmem:[%s7712_s1 + $0x460] sm:$0xff] }
 0x402   : > { %4159 = vmatpush1.bf16.msra.mxu1 %v4158_v36  ;;  %v2173_v36 = vld [vmem:[%s7712_s1 + $0x380] sm:$0xff]  ;;  %v4194_v18 = vpack.c.bf16 %v3170_v10, %v3166_v9  ;;  %v3211_v9 = vld [vmem:[%s7712_s1 + $0x5a8] sm:$0xff]  ;;  %v3209_v10 = vld [vmem:[%s7712_s1 + $0x598] sm:$0xff] }
 0x403   : > { %4161 = vmatprep.subr.bf16.mxu1 %v4160_v37  ;;  %v2177_v37 = vld [vmem:[%s7712_s1 + $0x3a0] sm:$0xff] }
 0x404   : > { %4099 = vmatpush1.bf16.msra.mxu0 %v4098_v40  ;;  %v4178_v40 = vpack.c.bf16 %v2171_v31, %v2167_v30  ;;  %v4118_v44 = vpack.c.bf16 %v2177_v37, %v2173_v36  ;;  %v3174_v31 = vld [vmem:[%s7712_s1 + $0x480] sm:$0xff]  ;;  %v3183_v36 = vld [vmem:[%s7712_s1 + $0x4c8] sm:$0xff] }
 0x405   : > { %4101 = vmatprep.subr.bf16.mxu0 %v4100_v43  ;;  %v2179_v43 = vld [vmem:[%s7712_s1 + $0x3b0] sm:$0xff]  ;;  %v3187_v37 = vld [vmem:[%s7712_s1 + $0x4e8] sm:$0xff] }
 0x406   : > { %4163 = vmatpush1.bf16.msra.mxu1 %v4162_v48  ;;  %v2181_v48 = vld [vmem:[%s7712_s1 + $0x3c0] sm:$0xff]  ;;  %v4182_v52 = vpack.c.bf16 %v2179_v43, %v2175_v42  ;;  %v4200_v39 = vpack.c.bf16 %v3187_v37, %v3183_v36 }
 0x407   : > { %4165 = vmatprep.subr.bf16.mxu1 %v4164_v51  ;;  %v2185_v51 = vld [vmem:[%s7712_s1 + $0x3e0] sm:$0xff] }
 0x408   : > { %4103 = vmatpush1.bf16.msra.mxu0 %v4102_v54  ;;  %v2183_v54 = vld [vmem:[%s7712_s1 + $0x3d0] sm:$0xff]  ;;  %v4122_v56 = vpack.c.bf16 %v2185_v51, %v2181_v48  ;;  %v3182_v42 = vld [vmem:[%s7712_s1 + $0x4c0] sm:$0xff]  ;;  %v3195_v48 = vld [vmem:[%s7712_s1 + $0x528] sm:$0xff] }
 0x409   : > { %4105 = vmatprep.subr.bf16.mxu0 %v4104_v57  ;;  %v4186_v57 = vpack.c.bf16 %v2187_v55, %v2183_v54  ;;  %v3193_v51 = vld [vmem:[%s7712_s1 + $0x518] sm:$0xff]  ;;  %v4266_v54 = vpack.c.bf16 %v3188_v46, %v3184_v45  ;;  %v3222_v46 = vld [vmem:[%s7712_s1 + $0x600] sm:$0xff] }
 0x40a   : > { %4167 = vmatpush1.bf16.msra.mxu1 %v4166_v62  ;;  %v4188_v62 = vpack.c.bf16 %v3163_v60, %v3159_v12  ;;  %v3192_v12 = vld [vmem:[%s7712_s1 + $0x510] sm:$0xff]  ;;  %v3229_v45 = vld [vmem:[%s7712_s1 + $0x638] sm:$0xff] }
 0x40b   : > { %4169 = vmatprep.subr.bf16.mxu1 %v4168_v63  ;;  %v3165_v63 = vld [vmem:[%s7712_s1 + $0x438] sm:$0xff] }
 0x40c   : > { %4107 = vmatpush1.bf16.msra.mxu0 %v4106_v17  ;;  %v4252_v17 = vpack.c.bf16 %v3165_v63, %v3161_v61  ;;  %v3196_v61 = vld [vmem:[%s7712_s1 + $0x530] sm:$0xff]  ;;  %v3199_v63 = vld [vmem:[%s7712_s1 + $0x548] sm:$0xff] }
 0x40d   : > { %4109 = vmatprep.subr.bf16.mxu0 %v4108_v4  ;;  %v3164_v4 = vld [vmem:[%s7712_s1 + $0x430] sm:$0xff] }
 0x40e   : > { %4171 = vmatpush1.bf16.msra.mxu1 %v4170_v7  ;;  %v4254_v5 = vpack.c.bf16 %v3164_v4, %v3160_v3  ;;  %v4192_v7 = vpack.c.bf16 %v3171_v25, %v3167_v11  ;;  %v3198_v3 = vld [vmem:[%s7712_s1 + $0x540] sm:$0xff]  ;;  %v3200_v25 = vld [vmem:[%s7712_s1 + $0x550] sm:$0xff] }
 0x40f   : > { %4173 = vmatprep.subr.bf16.mxu1 %v4172_v8  ;;  %v3173_v8 = vld [vmem:[%s7712_s1 + $0x478] sm:$0xff]  ;;  %v3202_v4 = vld [vmem:[%s7712_s1 + $0x560] sm:$0xff] }
 0x410   : > { %4111 = vmatpush1.bf16.msra.mxu0 %v4110_v13  ;;  %v4256_v13 = vpack.c.bf16 %v3173_v8, %v3169_v6  ;;  %v4210_v11 = vpack.c.bf16 %v3202_v4, %v3198_v3  ;;  %v3204_v6 = vld [vmem:[%s7712_s1 + $0x570] sm:$0xff]  ;;  %v3207_v8 = vld [vmem:[%s7712_s1 + $0x588] sm:$0xff]  ;;  %v3241_v4 = vld [vmem:[%s7712_s1 + $0x698] sm:$0xff] }
 0x411   : > { %4113 = vmatprep.subr.bf16.mxu0 %v4112_v20  ;;  %v3172_v20 = vld [vmem:[%s7712_s1 + $0x470] sm:$0xff]  ;;  %v3243_v3 = vld [vmem:[%s7712_s1 + $0x6a8] sm:$0xff] }
 0x412   : > { %4175 = vmatpush1.bf16.msra.mxu1 %v4174_v27  ;;  %v4258_v22 = vpack.c.bf16 %v3172_v20, %v3168_v19  ;;  %v3181_v27 = vld [vmem:[%s7712_s1 + $0x4b8] sm:$0xff]  ;;  %v3206_v19 = vld [vmem:[%s7712_s1 + $0x580] sm:$0xff] }
 0x413   : > { %4177 = vmatprep.subr.bf16.mxu1 %v4176_v28  ;;  %v4196_v28 = vpack.c.bf16 %v3179_v24, %v3175_v21  ;;  %v4260_v30 = vpack.c.bf16 %v3181_v27, %v3177_v26  ;;  %v3210_v20 = vld [vmem:[%s7712_s1 + $0x5a0] sm:$0xff]  ;;  %v3208_v24 = vld [vmem:[%s7712_s1 + $0x590] sm:$0xff] }
 0x414   : > { %4115 = vmatpush1.bf16.msra.mxu0 %v4114_v32  ;;  %v3178_v32 = vld [vmem:[%s7712_s1 + $0x4a0] sm:$0xff]  ;;  %v3212_v26 = vld [vmem:[%s7712_s1 + $0x5b0] sm:$0xff] }
 0x415   : > { %4117 = vmatprep.subr.bf16.mxu0 %v4116_v35  ;;  %v4198_v34 = vpack.c.bf16 %v3178_v32, %v3174_v31  ;;  %v3180_v35 = vld [vmem:[%s7712_s1 + $0x4b0] sm:$0xff]  ;;  %v4278_v27 = vpack.c.bf16 %v3212_v26, %v3208_v24  ;;  %v3217_v31 = vld [vmem:[%s7712_s1 + $0x5d8] sm:$0xff]  ;;  %v3246_v24 = vld [vmem:[%s7712_s1 + $0x6c0] sm:$0xff] }
 0x416   : > { %4179 = vmatpush1.bf16.msra.mxu1 %v4178_v40  ;;  %v4262_v38 = vpack.c.bf16 %v3180_v35, %v3176_v33  ;;  %v3185_v40 = vld [vmem:[%s7712_s1 + $0x4d8] sm:$0xff]  ;;  %v3218_v35 = vld [vmem:[%s7712_s1 + $0x5e0] sm:$0xff] }
 0x417   : > { %4181 = vmatprep.subr.bf16.mxu1 %v4180_v41  ;;  %v3189_v41 = vld [vmem:[%s7712_s1 + $0x4f8] sm:$0xff]  ;;  %v3250_v26 = vld [vmem:[%s7712_s1 + $0x6e0] sm:$0xff] }
 0x418   : > { %4119 = vmatpush1.bf16.msra.mxu0 %v4118_v44  ;;  %v4264_v43 = vpack.c.bf16 %v3189_v41, %v3185_v40  ;;  %v3186_v44 = vld [vmem:[%s7712_s1 + $0x4e0] sm:$0xff]  ;;  %v3221_v33 = vld [vmem:[%s7712_s1 + $0x5f8] sm:$0xff]  ;;  %v3223_v41 = vld [vmem:[%s7712_s1 + $0x608] sm:$0xff] }
 0x419   : > { %4121 = vmatprep.subr.bf16.mxu0 %v4120_v47  ;;  %v3191_v47 = vld [vmem:[%s7712_s1 + $0x508] sm:$0xff]  ;;  %v4280_v36 = vpack.c.bf16 %v3221_v33, %v3217_v31  ;;  %v3252_v31 = vld [vmem:[%s7712_s1 + $0x6f0] sm:$0xff] }
 0x41a   : > { %4183 = vmatpush1.bf16.msra.mxu1 %v4182_v52  ;;  %v4202_v52 = vpack.c.bf16 %v3186_v44, %v3182_v42  ;;  %v4204_v55 = vpack.c.bf16 %v3195_v48, %v3191_v47  ;;  %v3227_v42 = vld [vmem:[%s7712_s1 + $0x628] sm:$0xff]  ;;  %v3226_v47 = vld [vmem:[%s7712_s1 + $0x620] sm:$0xff] }
 0x41b   : > { %4185 = vmatprep.subr.bf16.mxu1 %v4184_v53  ;;  %v3197_v53 = vld [vmem:[%s7712_s1 + $0x538] sm:$0xff]  ;;  %v4220_v44 = vpack.c.bf16 %v3227_v42, %v3223_v41  ;;  %v3255_v33 = vld [vmem:[%s7712_s1 + $0x708] sm:$0xff]  ;;  %v3256_v42 = vld [vmem:[%s7712_s1 + $0x710] sm:$0xff] }
 0x41c   : > { %4123 = vmatpush1.bf16.msra.mxu0 %v4122_v56  ;;  %v4268_v56 = vpack.c.bf16 %v3197_v53, %v3193_v51  ;;  %v4222_v51 = vpack.c.bf16 %v3226_v47, %v3222_v46  ;;  %v3228_v53 = vld [vmem:[%s7712_s1 + $0x630] sm:$0xff]  ;;  %v3267_v46 = vld [vmem:[%s7712_s1 + $0x768] sm:$0xff]  ;;  %v3265_v47 = vld [vmem:[%s7712_s1 + $0x758] sm:$0xff] }
 0x41d   : > { %4189 = vmatprep.subr.bf16.mxu0 %v4188_v62  ;;  %v4270_v62 = vpack.c.bf16 %v3196_v61, %v3192_v12  ;;  %v3237_v12 = vld [vmem:[%s7712_s1 + $0x678] sm:$0xff]  ;;  %v3234_v61 = vld [vmem:[%s7712_s1 + $0x660] sm:$0xff] }
 0x41e   : > { %4187 = vmatpush1.bf16.msra.mxu1 %v4186_v57  ;;  %v3190_v57 = vld [vmem:[%s7712_s1 + $0x500] sm:$0xff] }
 0x41f   : > { %2255 = vmatmul.mubr.f32.vlgmr.msra.gmra.mrb[12].mxu0 %v3154_v58  ;;  %4253 = vmatprep.subr.bf16.mxu1 %v4252_v17  ;;  %v4208_v17 = vpack.c.bf16 %v3203_v0, %v3199_v63  ;;  %v3232_v0 = vld [vmem:[%s7712_s1 + $0x650] sm:$0xff] }
 0x420   : > { %4191 = vmatpush1.bf16.msra.mxu0 %v4190_v2  ;;  %v3205_v2 = vld [vmem:[%s7712_s1 + $0x578] sm:$0xff] }
 0x421   : > { %2326 = vmatmul.mubr.f32.vlgmr.msra.gmra.mrb[12].mxu1 %v3154_v58  ;;  %4193 = vmatprep.subr.bf16.mxu0 %v4192_v7  ;;  %v3194_v58 = vld [vmem:[%s7712_s1 + $0x520] sm:$0xff]  ;;  %v4274_v7 = vpack.c.bf16 %v3204_v6, %v3200_v25 }
 0x422   : > { %4255 = vmatpush1.bf16.msra.mxu1 %v4254_v5  ;;  %v4206_v60 = vpack.c.bf16 %v3194_v58, %v3190_v57  ;;  %v4272_v5 = vpack.c.bf16 %v3205_v2, %v3201_v1  ;;  %v3233_v57 = vld [vmem:[%s7712_s1 + $0x658] sm:$0xff]  ;;  %v3236_v1 = vld [vmem:[%s7712_s1 + $0x670] sm:$0xff]  ;;  %v3239_v2 = vld [vmem:[%s7712_s1 + $0x688] sm:$0xff] }
 0x423   : > { %4257 = vmatprep.subr.bf16.mxu1 %v4256_v13  ;;  %v4212_v13 = vpack.c.bf16 %v3211_v9, %v3207_v8  ;;  %v3238_v25 = vld [vmem:[%s7712_s1 + $0x680] sm:$0xff]  ;;  %v3240_v9 = vld [vmem:[%s7712_s1 + $0x690] sm:$0xff] }
 0x424   : > { %4195 = vmatpush1.bf16.msra.mxu0 %v4194_v18  ;;  %v3213_v18 = vld [vmem:[%s7712_s1 + $0x5b8] sm:$0xff]  ;;  %v3242_v6 = vld [vmem:[%s7712_s1 + $0x6a0] sm:$0xff] }
 0x425   : > { %4197 = vmatprep.subr.bf16.mxu0 %v4196_v28  ;;  %v4276_v21 = vpack.c.bf16 %v3213_v18, %v3209_v10  ;;  %v3215_v28 = vld [vmem:[%s7712_s1 + $0x5c8] sm:$0xff]  ;;  %v4230_v8 = vpack.c.bf16 %v3242_v6, %v3238_v25  ;;  %v3244_v10 = vld [vmem:[%s7712_s1 + $0x6b0] sm:$0xff] }
 0x426   : > { %4259 = vmatpush1.bf16.msra.mxu1 %v4258_v22  ;;  %v4214_v22 = vpack.c.bf16 %v3210_v20, %v3206_v19  ;;  %v3247_v18 = vld [vmem:[%s7712_s1 + $0x6c8] sm:$0xff]  ;;  %v3249_v20 = vld [vmem:[%s7712_s1 + $0x6d8] sm:$0xff] }
 0x427   : > { %4261 = vmatprep.subr.bf16.mxu1 %v4260_v30  ;;  %v3219_v30 = vld [vmem:[%s7712_s1 + $0x5e8] sm:$0xff] }
 0x428   : > { %4199 = vmatpush1.bf16.msra.mxu0 %v4198_v34  ;;  %v4216_v32 = vpack.c.bf16 %v3219_v30, %v3215_v28  ;;  %v3214_v34 = vld [vmem:[%s7712_s1 + $0x5c0] sm:$0xff]  ;;  %v3251_v19 = vld [vmem:[%s7712_s1 + $0x6e8] sm:$0xff]  ;;  %v4234_v28 = vpack.c.bf16 %v3250_v26, %v3246_v24  ;;  %v3248_v30 = vld [vmem:[%s7712_s1 + $0x6d0] sm:$0xff] }
 0x429   : > { %4201 = vmatprep.subr.bf16.mxu0 %v4200_v39  ;;  %v4218_v37 = vpack.c.bf16 %v3218_v35, %v3214_v34  ;;  %v3220_v39 = vld [vmem:[%s7712_s1 + $0x5f0] sm:$0xff]  ;;  %v3259_v34 = vld [vmem:[%s7712_s1 + $0x728] sm:$0xff]  ;;  %v3257_v35 = vld [vmem:[%s7712_s1 + $0x718] sm:$0xff] }
 0x42a   : > { %4263 = vmatpush1.bf16.msra.mxu1 %v4262_v38  ;;  %v3216_v38 = vld [vmem:[%s7712_s1 + $0x5d0] sm:$0xff] }
 0x42b   : > { %4265 = vmatprep.subr.bf16.mxu1 %v4264_v43  ;;  %v4282_v40 = vpack.c.bf16 %v3220_v39, %v3216_v38  ;;  %v3225_v43 = vld [vmem:[%s7712_s1 + $0x618] sm:$0xff]  ;;  %v3254_v38 = vld [vmem:[%s7712_s1 + $0x700] sm:$0xff] }
 0x42c   : > { %4203 = vmatpush1.bf16.msra.mxu0 %v4202_v52  ;;  %v4284_v48 = vpack.c.bf16 %v3229_v45, %v3225_v43  ;;  %v3224_v52 = vld [vmem:[%s7712_s1 + $0x610] sm:$0xff]  ;;  %v3258_v39 = vld [vmem:[%s7712_s1 + $0x720] sm:$0xff]  ;;  %v3263_v45 = vld [vmem:[%s7712_s1 + $0x748] sm:$0xff] }
 0x42d   : > { %4205 = vmatprep.subr.bf16.mxu0 %v4204_v55  ;;  %v3231_v55 = vld [vmem:[%s7712_s1 + $0x648] sm:$0xff]  ;;  %v4238_v41 = vpack.c.bf16 %v3258_v39, %v3254_v38  ;;  %v3260_v43 = vld [vmem:[%s7712_s1 + $0x730] sm:$0xff] }
 0x42e   : > { %4267 = vmatpush1.bf16.msra.mxu1 %v4266_v54  ;;  %v4286_v54 = vpack.c.bf16 %v3228_v53, %v3224_v52  ;;  %v3262_v52 = vld [vmem:[%s7712_s1 + $0x740] sm:$0xff] }
 0x42f   : > { %4269 = vmatprep.subr.bf16.mxu1 %v4268_v56  ;;  %v3235_v56 = vld [vmem:[%s7712_s1 + $0x668] sm:$0xff]  ;;  %v3266_v53 = vld [vmem:[%s7712_s1 + $0x760] sm:$0xff] }
 0x430   : > { %4207 = vmatpush1.bf16.msra.mxu0 %v4206_v60  ;;  %v4224_v58 = vpack.c.bf16 %v3235_v56, %v3231_v55  ;;  %v3230_v60 = vld [vmem:[%s7712_s1 + $0x640] sm:$0xff]  ;;  %v4242_v55 = vpack.c.bf16 %v3266_v53, %v3262_v52  ;;  %v3264_v56 = vld [vmem:[%s7712_s1 + $0x750] sm:$0xff] }
 0x431   : > { %4209 = vmatprep.subr.bf16.mxu0 %v4208_v17  ;;  %v4226_v63 = vpack.c.bf16 %v3234_v61, %v3230_v60  ;;  %v4290_v17 = vpack.c.bf16 %v3236_v1, %v3232_v0  ;;  %v3275_v60 = vld [vmem:[%s7712_s1 + $0x7a8] sm:$0xff]  ;;  %v3273_v61 = vld [vmem:[%s7712_s1 + $0x798] sm:$0xff]  ;;  %v3270_v1 = vld [vmem:[%s7712_s1 + $0x780] sm:$0xff] }
 0x432   : > { %4271 = vmatpush1.bf16.msra.mxu1 %v4270_v62  ;;  %v4288_v62 = vpack.c.bf16 %v3237_v12, %v3233_v57  ;;  %v3268_v57 = vld [vmem:[%s7712_s1 + $0x770] sm:$0xff] }
 0x433   : > { %4273 = vmatprep.subr.bf16.mxu1 %v4272_v5  ;;  %v4228_v5 = vpack.c.bf16 %v3243_v3, %v3239_v2  ;;  %v4306_v12 = vpack.c.bf16 %v3268_v57, %v3264_v56  ;;  %v3272_v2 = vld [vmem:[%s7712_s1 + $0x790] sm:$0xff] }
 0x434   : > { %4211 = vmatpush1.bf16.msra.mxu0 %v4210_v11  ;;  %v3245_v11 = vld [vmem:[%s7712_s1 + $0x6b8] sm:$0xff] }
 0x435   : > { %4213 = vmatprep.subr.bf16.mxu0 %v4212_v13  ;;  %v4294_v13 = vpack.c.bf16 %v3244_v10, %v3240_v9  ;;  %v3278_v9 = vld [vmem:[%s7712_s1 + $0x7c0] sm:$0xff] }
 0x436   : > { %4275 = vmatpush1.bf16.msra.mxu1 %v4274_v7  ;;  %v4292_v7 = vpack.c.bf16 %v3245_v11, %v3241_v4  ;;  %v3276_v4 = vld [vmem:[%s7712_s1 + $0x7b0] sm:$0xff]  ;;  %v3283_v11 = vld [vmem:[%s7712_s1 + $0x7e8] sm:$0xff] }
 0x437   : > { %4277 = vmatprep.subr.bf16.mxu1 %v4276_v21  ;;  %v4232_v21 = vpack.c.bf16 %v3251_v19, %v3247_v18  ;;  %v4310_v25 = vpack.c.bf16 %v3276_v4, %v3272_v2  ;;  %v3280_v18 = vld [vmem:[%s7712_s1 + $0x7d0] sm:$0xff] }
 0x438   : > { %4215 = vmatpush1.bf16.msra.mxu0 %v4214_v22  ;;  %v3253_v22 = vld [vmem:[%s7712_s1 + $0x6f8] sm:$0xff]  ;;  %v3284_v19 = vld [vmem:[%s7712_s1 + $0x7f0] sm:$0xff] }
 0x439   : > { %4217 = vmatprep.subr.bf16.mxu0 %v4216_v32  ;;  %v4298_v32 = vpack.c.bf16 %v3252_v31, %v3248_v30 }
 0x43a   : > { %4279 = vmatpush1.bf16.msra.mxu1 %v4278_v27  ;;  %v4296_v27 = vpack.c.bf16 %v3253_v22, %v3249_v20 }
 0x43b   : > { %4281 = vmatprep.subr.bf16.mxu1 %v4280_v36  ;;  %v4236_v36 = vpack.c.bf16 %v3259_v34, %v3255_v33 }
 0x43c   : > { %4219 = vmatpush1.bf16.msra.mxu0 %v4218_v37  ;;  %v3261_v37 = vld [vmem:[%s7712_s1 + $0x738] sm:$0xff] }
 0x43d   : > { %4221 = vmatprep.subr.bf16.mxu0 %v4220_v44  ;;  %v4302_v44 = vpack.c.bf16 %v3260_v43, %v3256_v42 }
 0x43e   : > { %4283 = vmatpush1.bf16.msra.mxu1 %v4282_v40  ;;  %v4300_v40 = vpack.c.bf16 %v3261_v37, %v3257_v35 }
 0x43f   : > { %4285 = vmatprep.subr.bf16.mxu1 %v4284_v48  ;;  %v4240_v48 = vpack.c.bf16 %v3267_v46, %v3263_v45  ;;  %v2049_v45 = vld [vmem:[#allocation3 + $0x8] sm:$0xff] }
 0x440   : > { %4223 = vmatpush1.bf16.msra.mxu0 %v4222_v51  ;;  %v3269_v51 = vld [vmem:[%s7712_s1 + $0x778] sm:$0xff] }
 0x441   : > { %4225 = vmatprep.subr.bf16.mxu0 %v4224_v58  ;;  %v3271_v58 = vld [vmem:[%s7712_s1 + $0x788] sm:$0xff] }
 0x442   : > { %4287 = vmatpush1.bf16.msra.mxu1 %v4286_v54  ;;  %v4304_v54 = vpack.c.bf16 %v3269_v51, %v3265_v47 }
 0x443   : > { %4289 = vmatprep.subr.bf16.mxu1 %v4288_v62  ;;  %v3277_v62 = vld [vmem:[%s7712_s1 + $0x7b8] sm:$0xff] }
 0x444   : > { %4227 = vmatpush1.bf16.msra.mxu0 %v4226_v63  ;;  %v4244_v63 = vpack.c.bf16 %v3275_v60, %v3271_v58  ;;  %v4308_v0 = vpack.c.bf16 %v3277_v62, %v3273_v61 }
 0x445   : > { %4229 = vmatprep.subr.bf16.mxu0 %v4228_v5  ;;  %v3279_v5 = vld [vmem:[%s7712_s1 + $0x7c8] sm:$0xff] }
 0x446   : > { %4291 = vmatpush1.bf16.msra.mxu1 %v4290_v17  ;;  %v3274_v17 = vld [vmem:[%s7712_s1 + $0x7a0] sm:$0xff]  ;;  %v4248_v6 = vpack.c.bf16 %v3283_v11, %v3279_v5 }
 0x447   : > { %4293 = vmatprep.subr.bf16.mxu1 %v4292_v7  ;;  %v4246_v3 = vpack.c.bf16 %v3274_v17, %v3270_v1  ;;  %v3281_v7 = vld [vmem:[%s7712_s1 + $0x7d8] sm:$0xff] }
 0x448   : > { %4231 = vmatpush1.bf16.msra.mxu0 %v4230_v8  ;;  %v3285_v8 = vld [vmem:[%s7712_s1 + $0x7f8] sm:$0xff] }
 0x449   : > { %4233 = vmatprep.subr.bf16.mxu0 %v4232_v21  ;;  %v4312_v10 = vpack.c.bf16 %v3285_v8, %v3281_v7  ;;  %v4314_v21 = vpack.c.bf16 %v3284_v19, %v3280_v18 }
 0x44a   : > { %4295 = vmatpush1.bf16.msra.mxu1 %v4294_v13  ;;  %v3282_v13 = vld [vmem:[%s7712_s1 + $0x7e0] sm:$0xff] }
 0x44b   : > { %4297 = vmatprep.subr.bf16.mxu1 %v4296_v27  ;;  %v4250_v20 = vpack.c.bf16 %v3282_v13, %v3278_v9 }
 0x44c   : > { %4235 = vmatpush1.bf16.msra.mxu0 %v4234_v28 }
 0x44d   : > { %4237 = vmatprep.subr.bf16.mxu0 %v4236_v36 }
 0x44e   : > { %4299 = vmatpush1.bf16.msra.mxu1 %v4298_v32 }
 0x44f   : > { %4301 = vmatprep.subr.bf16.mxu1 %v4300_v40 }
 0x450   : > { %4239 = vmatpush1.bf16.msra.mxu0 %v4238_v41 }
 0x451   : > { %4241 = vmatprep.subr.bf16.mxu0 %v4240_v48 }
 0x452   : > { %4303 = vmatpush1.bf16.msra.mxu1 %v4302_v44 }
 0x453   : > { %4305 = vmatprep.subr.bf16.mxu1 %v4304_v54 }
 0x454   : > { %4243 = vmatpush1.bf16.msra.mxu0 %v4242_v55 }
 0x455   : > { %4245 = vmatprep.subr.bf16.mxu0 %v4244_v63 }
 0x456   : > { %4307 = vmatpush1.bf16.msra.mxu1 %v4306_v12 }
 0x457   : > { %4309 = vmatprep.subr.bf16.mxu1 %v4308_v0 }
 0x458   : > { %4247 = vmatpush1.bf16.msra.mxu0 %v4246_v3 }
 0x459   : > { %4249 = vmatprep.subr.bf16.mxu0 %v4248_v6 }
 0x45a   : > { %4311 = vmatpush1.bf16.msra.mxu1 %v4310_v25  ;;  %v2351_v25 = vld [vmem:[#allocation3] sm:$0xff] }
 0x45b   : > { %4313 = vmatprep.subr.bf16.mxu1 %v4312_v10 }
 0x45c   : > { %4251 = vmatpush1.bf16.msra.mxu0 %v4250_v20 }
 0x45e   : > { %4315 = vmatpush1.bf16.msra.mxu1 %v4314_v21 }
 0x4b2   : > { %v1954_v22 = vpop.f32.mrb[10].mxu0  ;;  %v2025_v24 = vpop.f32.mrb[10].mxu1 }
 0x4b3   : > { %v1955_v26 = vadd.f32 %v1954_v22, %v6126_v49  ;;  %v1956_v27 = vpop.f32.mrb[11].mxu0  ;;  %v2027_v28 = vpop.f32.mrb[11].mxu1  ;;  %v2026_v35 = vadd.f32 %v2025_v24, %v6141_v14 }
 0x4b4   : > { %v1957_v30 = vadd.f32 %v1956_v27, %v6130_v50  ;;  %v2028_v33 = vadd.f32 %v2027_v28, %v6136_v59 }
 0x4b5   : > { %v3150_v31 = vmul.f32 -1.442695, %v1955_v26 }
 0x4b6   : > { %v3151_v32 = vmul.f32 -1.442695, %v1957_v30  ;;  %v3152_v34 = vmul.f32 -1.442695, %v2028_v33 }
 0x4b7   : > { %4421 = vpow2.f32 %v3150_v31 }
 0x4b8   : > { %4423 = vpow2.f32 %v3151_v32 }
 0x4b9   : > { %4425 = vpow2.f32 %v3152_v34 }
 0x4ba   : > { %4427 = vtanh.f32 %v2026_v35 }
 0x4c1   : > { %v4422_v36 = vpop.eup %4421 }
 0x4c2   : > { %v4424_v37 = vpop.eup %4423  ;;  %v2033_v38 = vadd.f32 1.0, %v4422_v36 }
 0x4c3   : > { %v2039_v39 = vadd.f32 1.0, %v4424_v37  ;;  %v4426_v40 = vpop.eup %4425 }
 0x4c4   : > { %4429 = vrcp.f32 %v2033_v38  ;;  %v4428_v41 = vpop.eup %4427  ;;  %v2046_v46 = vadd.f32 1.0, %v4426_v40 }
 0x4c5   : > { %4431 = vrcp.f32 %v2039_v39 }
 0x4c6   : > { %4433 = vrcp.f32 %v2046_v46 }
 0x4ce   : > { %v4430_v42 = vpop.eup %4429 }
 0x4cf   : > { %v4432_v43 = vpop.eup %4431  ;;  %v2051_v44 = vmul.f32 %v4430_v42, %v4428_v41 }
 0x4d0   : > { %v2050_v47 = vmul.f32 %v4432_v43, %v2049_v45  ;;  %v4434_v51 = vpop.eup %4433 }
 0x4d2   : > { %v7688_v48 = vadd.f32 %v2051_v44, %v2050_v47 }
 0x4d4   : > { %4435 = vtanh.f32 %v7688_v48 }
 0x4de   : > { %v4436_v52 = vpop.eup %4435 }
 0x4df   : > { %v2054_v53 = vmul.f32 %v4436_v52, %v4434_v51 }
 0x4e1   : > { %3153 = vst [vmem:[%s4540_s23 + $0x10] sm:$0xff] %v2054_v53  ;;  %2552 = vmatprep.mubr.f32.mxu0 %v2054_v53  ;;  %2623 = vmatprep.mubr.f32.mxu1 %v2054_v53 }
 0x4f2   : > { %v2256_v54 = vpop.f32.mrb[12].mxu0 }
 0x4f3   : > { %v2257_v55 = vadd.f32 %v2256_v54, %v5332_v15  ;;  %v2258_v56 = vpop.f32.mrb[13].mxu0 }
 0x4f4   : > { %v2259_v57 = vadd.f32 %v2258_v56, %v5336_v16  ;;  %v2327_v58 = vpop.f32.mrb[12].mxu1 }
 0x4f5   : > { %v3155_v12 = vmul.f32 -1.442695, %v2257_v55  ;;  %v2329_v60 = vpop.f32.mrb[13].mxu1  ;;  %v2328_v0 = vadd.f32 %v2327_v58, %v5349_v29 }
 0x4f6   : > { %v3156_v61 = vmul.f32 -1.442695, %v2259_v57  ;;  %v2330_v62 = vadd.f32 %v2329_v60, %v5343_v23 }
 0x4f7   : > { %4437 = vpow2.f32 %v3155_v12 }
 0x4f8   : > { %4439 = vpow2.f32 %v3156_v61  ;;  %v3157_v63 = vmul.f32 -1.442695, %v2330_v62 }
 0x4fa   : > { %4441 = vpow2.f32 %v3157_v63 }
 0x4fb   : > { %4443 = vtanh.f32 %v2328_v0 }
 0x501   : > { %v4438_v1 = vpop.eup %4437 }
 0x502   : > { %v4440_v17 = vpop.eup %4439  ;;  %v2335_v2 = vadd.f32 1.0, %v4438_v1 }
 0x503   : > { %v2341_v15 = vadd.f32 1.0, %v4440_v17 }
 0x504   : > { %4445 = vrcp.f32 %v2335_v2  ;;  %v4442_v16 = vpop.eup %4441 }
 0x505   : > { %4447 = vrcp.f32 %v2341_v15  ;;  %v4444_v3 = vpop.eup %4443  ;;  %v2348_v5 = vadd.f32 1.0, %v4442_v16 }
 0x507   : > { %4449 = vrcp.f32 %v2348_v5 }
 0x50e   : > { %v4446_v4 = vpop.eup %4445 }
 0x50f   : > { %v4448_v11 = vpop.eup %4447  ;;  %v2353_v6 = vmul.f32 %v4446_v4, %v4444_v3 }
 0x510   : > { %v2352_v7 = vmul.f32 %v4448_v11, %v2351_v25 }
 0x511   : > { %v4450_v29 = vpop.eup %4449 }
 0x512   : > { %v2354_v23 = vadd.f32 %v2353_v6, %v2352_v7 }
 0x514   : > { %4451 = vtanh.f32 %v2354_v23  ;;  %2357 = vst [vmem:[#allocation3] sm:$0xff] %v2354_v23 }
 0x51e   : > { %v4452_v8 = vpop.eup %4451 }
 0x51f   : > { %v2356_v9 = vmul.f32 %v4452_v8, %v4450_v29 }
 0x521   : > { %2358 = vst [vmem:[#allocation2] sm:$0xff] %v2356_v9  ;;  %2553 = vmatmul.mubr.f32.vlgmr.msra.gmra.mrb[14].mxu0 %v2356_v9  ;;  %2624 = vmatmul.mubr.f32.vlgmr.msra.gmra.mrb[14].mxu1 %v2356_v9 }
 0x5f4   : > { %v2554_v10 = vpop.f32.mrb[14].mxu0  ;;  %v2625_v13 = vpop.f32.mrb[14].mxu1 }
 0x5f5   : > { %v2555_v18 = vadd.f32 %v2554_v10, %v6126_v49  ;;  %v2556_v19 = vpop.f32.mrb[15].mxu0  ;;  %v2627_v20 = vpop.f32.mrb[15].mxu1  ;;  %v2626_v28 = vadd.f32 %v2625_v13, %v6141_v14 }
 0x5f6   : > { %v2557_v21 = vadd.f32 %v2556_v19, %v6130_v50  ;;  %v2628_v26 = vadd.f32 %v2627_v20, %v6136_v59 }
 0x5f7   : > { %v3286_v22 = vmul.f32 -1.442695, %v2555_v18 }
 0x5f8   : > { %v3287_v24 = vmul.f32 -1.442695, %v2557_v21  ;;  %v3288_v27 = vmul.f32 -1.442695, %v2628_v26 }
 0x5f9   : > { %4453 = vpow2.f32 %v3286_v22 }
 0x5fa   : > { %4455 = vpow2.f32 %v3287_v24 }
 0x5fb   : > { %4457 = vpow2.f32 %v3288_v27 }
 0x5fc   : > { %4459 = vtanh.f32 %v2626_v28 }
 0x603   : > { %v4454_v30 = vpop.eup %4453 }
 0x604   : > { %v4456_v31 = vpop.eup %4455  ;;  %v2633_v32 = vadd.f32 1.0, %v4454_v30 }
 0x605   : > { %v2639_v33 = vadd.f32 1.0, %v4456_v31  ;;  %v4458_v49 = vpop.eup %4457 }
 0x606   : > { %4461 = vrcp.f32 %v2633_v32  ;;  %v4460_v50 = vpop.eup %4459  ;;  %v2646_v37 = vadd.f32 1.0, %v4458_v49 }
 0x607   : > { %4463 = vrcp.f32 %v2639_v33 }
 0x608   : > { %4465 = vrcp.f32 %v2646_v37 }
 0x610   : > { %v4462_v34 = vpop.eup %4461 }
 0x611   : > { %v4464_v35 = vpop.eup %4463  ;;  %v2651_v36 = vmul.f32 %v4462_v34, %v4460_v50 }
 0x612   : > { %v2650_v59 = vmul.f32 %v4464_v35, %v7688_v48  ;;  %v4466_v14 = vpop.eup %4465 }
 0x614   : > { %v2652_v38 = vadd.f32 %v2651_v36, %v2650_v59 }
 0x616   : > { %4467 = vtanh.f32 %v2652_v38  ;;  %2655 = vst [vmem:[#allocation3 + $0x8] sm:$0xff] %v2652_v38 }
 0x620   : > { %v4468_v39 = vpop.eup %4467 }
 0x621   : > { %v2654_v40 = vmul.f32 %v4468_v39, %v4466_v14 }
 0x623   : > { %2656 = vst [vmem:[#allocation2 + $0x8] sm:$0xff] %v2654_v40  ;;  %3289 = vst [vmem:[%s4540_s23 + $0x18] sm:$0xff] %v2654_v40 }
 0x624 PF: > { %s13_s14 = sadd.s32 1, %s4491_s14   ;;  %s7715_s12 = smov %s4487_s13 }
 0x625   : > { %p10_p6 = scmp.ge.s32.totalorder %s13_s14, 4   ;;  %s7716_s13 = smov %s7718_s15 }
 0x627   :  { %12 = sbr.rel (!%p10_p6) target bundleno = 2 (0x2), region = 76 }

</bundles_post_ra>
